<compile_context>
chip_gen: v7x
topology: tpu7x:2x2x1
jax: 0.10.0
libtpu: 0.0.40
codegen_flags: <defaults>
</compile_context>

<pallas_src>
import math
from functools import partial

import jax
import jax.numpy as jnp
from jax.experimental import pallas as pl
from jax.experimental.pallas import tpu as pltpu

IN_FEATURES = 3 * 32 * 32
LANE = 128
SUBLANE = 8
TILE_M_MAX = 256      # fills the 256-wide MXU on v6e/v7x; fine on v5e too


def fused_mlp_kernel(x_ref,
                     w1, s1, b1, w2, s2, b2, w3, s3, b3,
                     w4, s4, b4, w5, s5, b5,
                     o_ref):
    # x_ref: (TILE_M, 3072) f32; wN: (K, N) bf16 or int8; sN, bN: (1, N) f32
    # o_ref: (TILE_M, 128) f32 (lane-dense padded logits)
    def layer(h, w_ref, s_ref, b_ref, out_dtype):
        w = w_ref[...].astype(jnp.bfloat16)          # no-op for bf16, dequant load for int8
        acc = jnp.dot(h, w, preferred_element_type=jnp.float32)
        acc = acc * s_ref[...] + b_ref[...]          # f32 per-channel scale + bias
        return jnp.maximum(acc, 0.0).astype(out_dtype)

    h = x_ref[...].astype(jnp.bfloat16)              # in-kernel f32 -> bf16 cast (VPU slack)
    h = layer(h, w1, s1, b1, jnp.bfloat16)           # 3072 -> 256
    h = layer(h, w2, s2, b2, jnp.bfloat16)           # 256  -> 512
    h = layer(h, w3, s3, b3, jnp.bfloat16)           # 512  -> 1024
    h = layer(h, w4, s4, b4, jnp.bfloat16)           # 1024 -> 512
    # The reference nn.Sequential ends with Linear -> ReLU as well.
    h = layer(h, w5, s5, b5, jnp.float32)            # 512  -> 128 (padded classes)
    o_ref[...] = h


def fused_mlp(x2d, params):
    """x2d: (B_pad, 3072) f32; params: list of (w (K,N), scale (1,N) f32, bias (1,N) f32)."""
    b_pad, k_in = x2d.shape
    n_out = params[-1][0].shape[1]                   # padded class dim (128)
    tile_m = b_pad if b_pad <= TILE_M_MAX else TILE_M_MAX
    grid = (b_pad // tile_m,)

    in_specs = [pl.BlockSpec((tile_m, k_in), lambda i: (i, 0))]
    flat_args = [x2d]
    weight_bytes = 0
    for w, s, b in params:
        k, n = w.shape
        # Grid-invariant blocks: single-buffer them (default 2-deep pipelining
        # would double their VMEM footprint for zero benefit).
        in_specs.append(pl.BlockSpec((k, n), lambda i: (0, 0),
                                     pipeline_mode=pl.Buffered(1)))
        in_specs.append(pl.BlockSpec((1, n), lambda i: (0, 0),
                                     pipeline_mode=pl.Buffered(1)))
        in_specs.append(pl.BlockSpec((1, n), lambda i: (0, 0),
                                     pipeline_mode=pl.Buffered(1)))
        flat_args += [w, s, b]
        weight_bytes += (w.size * w.dtype.itemsize
                         + s.size * s.dtype.itemsize
                         + b.size * b.dtype.itemsize)

    flops = 2 * b_pad * sum(w.shape[0] * w.shape[1] for w, _, _ in params)
    bytes_accessed = (weight_bytes
                      + x2d.size * x2d.dtype.itemsize
                      + b_pad * n_out * 4)

    return pl.pallas_call(
        fused_mlp_kernel,
        out_shape=jax.ShapeDtypeStruct((b_pad, n_out), jnp.float32),
        grid=grid,
        in_specs=in_specs,
        out_specs=pl.BlockSpec((tile_m, n_out), lambda i: (i, 0)),
        compiler_params=pltpu.CompilerParams(
            dimension_semantics=("parallel",),       # M axis: megacore-shardable on v7x
            vmem_limit_bytes=32 * 1024 * 1024,       # headroom over v5e's 16 MiB default scope
        ),
        cost_estimate=pl.CostEstimate(flops=flops, transcendentals=0,
                                      bytes_accessed=bytes_accessed),
    )(*flat_args)


def init_linear(key, in_features, out_features):
    """Deterministic PyTorch-style init: U(-1/sqrt(in), 1/sqrt(in))."""
    kw, kb = jax.random.split(key)
    bound = 1.0 / math.sqrt(in_features)
    w = jax.random.uniform(kw, (out_features, in_features), jnp.float32,
                           minval=-bound, maxval=bound)
    b = jax.random.uniform(kb, (out_features,), jnp.float32,
                           minval=-bound, maxval=bound)
    return w, b


def make_params(key, num_classes=10, weight_format="bf16"):
    """weight_format: 'bf16' (reference-faithful) or 'int8' (weight-only quant,
    per-output-channel scales — halves the weight-DMA floor on v5e/v6e; use the
    same structure with fp8 on v7x)."""
    dims = [(IN_FEATURES, 256), (256, 512), (512, 1024), (1024, 512),
            (512, num_classes)]
    keys = jax.random.split(key, len(dims))
    params = []
    for idx, (k, (fin, fout)) in enumerate(zip(keys, dims)):
        w, b = init_linear(k, fin, fout)
        w_t = jnp.transpose(w)                       # (in, out)
        b_row = b.reshape(1, -1).astype(jnp.float32)
        if idx == len(dims) - 1:
            # Lane-dense final layer: pad classes to a multiple of 128 with zeros.
            n_pad = ((fout + LANE - 1) // LANE) * LANE
            w_t = jnp.pad(w_t, ((0, 0), (0, n_pad - fout)))
            b_row = jnp.pad(b_row, ((0, 0), (0, n_pad - fout)))
        n = w_t.shape[1]
        if weight_format == "int8":
            absmax = jnp.max(jnp.abs(w_t), axis=0, keepdims=True)       # (1, N)
            scale = jnp.maximum(absmax, 1e-8) / 127.0
            w_q = jnp.clip(jnp.round(w_t / scale), -127, 127).astype(jnp.int8)
            params.append((w_q, scale.astype(jnp.float32), b_row))
        else:
            params.append((w_t.astype(jnp.bfloat16),
                           jnp.ones((1, n), jnp.float32), b_row))
    return params


@partial(jax.jit, static_argnums=(2,))
def simple_neural_network_forward(x, params, num_classes=10):
    b = x.shape[0]
    h = x.reshape(b, -1).astype(jnp.float32)         # nn.Flatten; stays f32, cast in-kernel
    # Pad batch to a sublane multiple (>=8); to a TILE_M_MAX multiple for large batches.
    if b <= TILE_M_MAX:
        b_pad = max(SUBLANE, ((b + SUBLANE - 1) // SUBLANE) * SUBLANE)
    else:
        b_pad = ((b + TILE_M_MAX - 1) // TILE_M_MAX) * TILE_M_MAX
    if b_pad != b:
        h = jnp.pad(h, ((0, b_pad - b), (0, 0)))
    out = fused_mlp(h, params)                       # (b_pad, 128) f32 padded logits
    return out[:b, :num_classes]


if __name__ == "__main__":
    key = jax.random.PRNGKey(0)
    k_params, k_x = jax.random.split(key)

    num_classes = 10
    # Input shape implied by in_features = 3*32*32: (batch=2, C=3, H=32, W=32)
    x = jax.random.normal(k_x, (2, 3, 32, 32), dtype=jnp.float32)

    # Default path: bf16 weights (closest numerics to the f32 PyTorch reference).
    params = make_params(k_params, num_classes=num_classes, weight_format="bf16")
    out = jax.block_until_ready(simple_neural_network_forward(x, params, num_classes))
    assert out.shape == (2, num_classes), out.shape

    # Weight-only int8 path (halves the weight-DMA floor that dominates at small batch).
    params_q = make_params(k_params, num_classes=num_classes, weight_format="int8")
    out_q = jax.block_until_ready(simple_neural_network_forward(x, params_q, num_classes))
    assert out_q.shape == (2, num_classes), out_q.shape

    print("KERNEL_OK")
</pallas_src>

<mosaic_0001>
module attributes {stable_mosaic.version = 11 : i64} {
  func.func @fused_mlp_kernel(%arg0: i32, %arg1: memref<8x3072xf32, #tpu.memory_space<vmem>>, %arg2: memref<3072x256xbf16, #tpu.memory_space<vmem>>, %arg3: memref<1x256xf32, #tpu.memory_space<vmem>>, %arg4: memref<1x256xf32, #tpu.memory_space<vmem>>, %arg5: memref<256x512xbf16, #tpu.memory_space<vmem>>, %arg6: memref<1x512xf32, #tpu.memory_space<vmem>>, %arg7: memref<1x512xf32, #tpu.memory_space<vmem>>, %arg8: memref<512x1024xbf16, #tpu.memory_space<vmem>>, %arg9: memref<1x1024xf32, #tpu.memory_space<vmem>>, %arg10: memref<1x1024xf32, #tpu.memory_space<vmem>>, %arg11: memref<1024x512xbf16, #tpu.memory_space<vmem>>, %arg12: memref<1x512xf32, #tpu.memory_space<vmem>>, %arg13: memref<1x512xf32, #tpu.memory_space<vmem>>, %arg14: memref<512x128xbf16, #tpu.memory_space<vmem>>, %arg15: memref<1x128xf32, #tpu.memory_space<vmem>>, %arg16: memref<1x128xf32, #tpu.memory_space<vmem>>, %arg17: memref<8x128xf32, #tpu.memory_space<vmem>>) attributes {dimension_semantics = [#tpu.dimension_semantics<parallel>], iteration_bounds = array<i64: 1>, scalar_prefetch = 0 : i64, scratch_operands = 0 : i64, tpu.core_type = #tpu.core_type<tc>, window_params = [{transform_indices = @transform_0, window_bounds = array<i64: 8, 3072>}, {pipeline_mode = #tpu.pipeline_mode<synchronous>, transform_indices = @transform_1, window_bounds = array<i64: 3072, 256>}, {pipeline_mode = #tpu.pipeline_mode<synchronous>, transform_indices = @transform_2, window_bounds = array<i64: 1, 256>}, {pipeline_mode = #tpu.pipeline_mode<synchronous>, transform_indices = @transform_3, window_bounds = array<i64: 1, 256>}, {pipeline_mode = #tpu.pipeline_mode<synchronous>, transform_indices = @transform_4, window_bounds = array<i64: 256, 512>}, {pipeline_mode = #tpu.pipeline_mode<synchronous>, transform_indices = @transform_5, window_bounds = array<i64: 1, 512>}, {pipeline_mode = #tpu.pipeline_mode<synchronous>, transform_indices = @transform_6, window_bounds = array<i64: 1, 512>}, {pipeline_mode = #tpu.pipeline_mode<synchronous>, transform_indices = @transform_7, window_bounds = array<i64: 512, 1024>}, {pipeline_mode = #tpu.pipeline_mode<synchronous>, transform_indices = @transform_8, window_bounds = array<i64: 1, 1024>}, {pipeline_mode = #tpu.pipeline_mode<synchronous>, transform_indices = @transform_9, window_bounds = array<i64: 1, 1024>}, {pipeline_mode = #tpu.pipeline_mode<synchronous>, transform_indices = @transform_10, window_bounds = array<i64: 1024, 512>}, {pipeline_mode = #tpu.pipeline_mode<synchronous>, transform_indices = @transform_11, window_bounds = array<i64: 1, 512>}, {pipeline_mode = #tpu.pipeline_mode<synchronous>, transform_indices = @transform_12, window_bounds = array<i64: 1, 512>}, {pipeline_mode = #tpu.pipeline_mode<synchronous>, transform_indices = @transform_13, window_bounds = array<i64: 512, 128>}, {pipeline_mode = #tpu.pipeline_mode<synchronous>, transform_indices = @transform_14, window_bounds = array<i64: 1, 128>}, {pipeline_mode = #tpu.pipeline_mode<synchronous>, transform_indices = @transform_15, window_bounds = array<i64: 1, 128>}, {transform_indices = @transform_16, window_bounds = array<i64: 8, 128>}]} {
    %c0 = arith.constant 0 : index
    %c0_0 = arith.constant 0 : index
    %0 = vector.load %arg1[%c0, %c0_0] : memref<8x3072xf32, #tpu.memory_space<vmem>>, vector<8x3072xf32>
    %1 = arith.truncf %0 : vector<8x3072xf32> to vector<8x3072xbf16>
    %c0_1 = arith.constant 0 : index
    %c0_2 = arith.constant 0 : index
    %2 = vector.load %arg2[%c0_1, %c0_2] : memref<3072x256xbf16, #tpu.memory_space<vmem>>, vector<3072x256xbf16>
    %cst = arith.constant dense<0.000000e+00> : vector<8x256xf32>
    %3 = tpu.matmul %1, %2, %cst {dimension_numbers = #tpu.dot_dimension_numbers<[1], [0], [0], [1], [0, 0, 1, 1], [], []>} : vector<8x3072xbf16>, vector<3072x256xbf16>, vector<8x256xf32> -> vector<8x256xf32>
    %c0_3 = arith.constant 0 : index
    %c0_4 = arith.constant 0 : index
    %4 = vector.load %arg3[%c0_3, %c0_4] : memref<1x256xf32, #tpu.memory_space<vmem>>, vector<1x256xf32>
    %5 = vector.broadcast %4 : vector<1x256xf32> to vector<8x256xf32>
    %6 = arith.mulf %3, %5 : vector<8x256xf32>
    %c0_5 = arith.constant 0 : index
    %c0_6 = arith.constant 0 : index
    %7 = vector.load %arg4[%c0_5, %c0_6] : memref<1x256xf32, #tpu.memory_space<vmem>>, vector<1x256xf32>
    %8 = vector.broadcast %7 : vector<1x256xf32> to vector<8x256xf32>
    %9 = arith.addf %6, %8 : vector<8x256xf32>
    %cst_7 = arith.constant 0.000000e+00 : f32
    %10 = vector.broadcast %cst_7 : f32 to vector<8x256xf32>
    %11 = arith.maximumf %9, %10 : vector<8x256xf32>
    %12 = arith.truncf %11 : vector<8x256xf32> to vector<8x256xbf16>
    %c0_8 = arith.constant 0 : index
    %c0_9 = arith.constant 0 : index
    %13 = vector.load %arg5[%c0_8, %c0_9] : memref<256x512xbf16, #tpu.memory_space<vmem>>, vector<256x512xbf16>
    %cst_10 = arith.constant dense<0.000000e+00> : vector<8x512xf32>
    %14 = tpu.matmul %12, %13, %cst_10 {dimension_numbers = #tpu.dot_dimension_numbers<[1], [0], [0], [1], [0, 0, 1, 1], [], []>} : vector<8x256xbf16>, vector<256x512xbf16>, vector<8x512xf32> -> vector<8x512xf32>
    %c0_11 = arith.constant 0 : index
    %c0_12 = arith.constant 0 : index
    %15 = vector.load %arg6[%c0_11, %c0_12] : memref<1x512xf32, #tpu.memory_space<vmem>>, vector<1x512xf32>
    %16 = vector.broadcast %15 : vector<1x512xf32> to vector<8x512xf32>
    %17 = arith.mulf %14, %16 : vector<8x512xf32>
    %c0_13 = arith.constant 0 : index
    %c0_14 = arith.constant 0 : index
    %18 = vector.load %arg7[%c0_13, %c0_14] : memref<1x512xf32, #tpu.memory_space<vmem>>, vector<1x512xf32>
    %19 = vector.broadcast %18 : vector<1x512xf32> to vector<8x512xf32>
    %20 = arith.addf %17, %19 : vector<8x512xf32>
    %cst_15 = arith.constant 0.000000e+00 : f32
    %21 = vector.broadcast %cst_15 : f32 to vector<8x512xf32>
    %22 = arith.maximumf %20, %21 : vector<8x512xf32>
    %23 = arith.truncf %22 : vector<8x512xf32> to vector<8x512xbf16>
    %c0_16 = arith.constant 0 : index
    %c0_17 = arith.constant 0 : index
    %24 = vector.load %arg8[%c0_16, %c0_17] : memref<512x1024xbf16, #tpu.memory_space<vmem>>, vector<512x1024xbf16>
    %cst_18 = arith.constant dense<0.000000e+00> : vector<8x1024xf32>
    %25 = tpu.matmul %23, %24, %cst_18 {dimension_numbers = #tpu.dot_dimension_numbers<[1], [0], [0], [1], [0, 0, 1, 1], [], []>} : vector<8x512xbf16>, vector<512x1024xbf16>, vector<8x1024xf32> -> vector<8x1024xf32>
    %c0_19 = arith.constant 0 : index
    %c0_20 = arith.constant 0 : index
    %26 = vector.load %arg9[%c0_19, %c0_20] : memref<1x1024xf32, #tpu.memory_space<vmem>>, vector<1x1024xf32>
    %27 = vector.broadcast %26 : vector<1x1024xf32> to vector<8x1024xf32>
    %28 = arith.mulf %25, %27 : vector<8x1024xf32>
    %c0_21 = arith.constant 0 : index
    %c0_22 = arith.constant 0 : index
    %29 = vector.load %arg10[%c0_21, %c0_22] : memref<1x1024xf32, #tpu.memory_space<vmem>>, vector<1x1024xf32>
    %30 = vector.broadcast %29 : vector<1x1024xf32> to vector<8x1024xf32>
    %31 = arith.addf %28, %30 : vector<8x1024xf32>
    %cst_23 = arith.constant 0.000000e+00 : f32
    %32 = vector.broadcast %cst_23 : f32 to vector<8x1024xf32>
    %33 = arith.maximumf %31, %32 : vector<8x1024xf32>
    %34 = arith.truncf %33 : vector<8x1024xf32> to vector<8x1024xbf16>
    %c0_24 = arith.constant 0 : index
    %c0_25 = arith.constant 0 : index
    %35 = vector.load %arg11[%c0_24, %c0_25] : memref<1024x512xbf16, #tpu.memory_space<vmem>>, vector<1024x512xbf16>
    %cst_26 = arith.constant dense<0.000000e+00> : vector<8x512xf32>
    %36 = tpu.matmul %34, %35, %cst_26 {dimension_numbers = #tpu.dot_dimension_numbers<[1], [0], [0], [1], [0, 0, 1, 1], [], []>} : vector<8x1024xbf16>, vector<1024x512xbf16>, vector<8x512xf32> -> vector<8x512xf32>
    %c0_27 = arith.constant 0 : index
    %c0_28 = arith.constant 0 : index
    %37 = vector.load %arg12[%c0_27, %c0_28] : memref<1x512xf32, #tpu.memory_space<vmem>>, vector<1x512xf32>
    %38 = vector.broadcast %37 : vector<1x512xf32> to vector<8x512xf32>
    %39 = arith.mulf %36, %38 : vector<8x512xf32>
    %c0_29 = arith.constant 0 : index
    %c0_30 = arith.constant 0 : index
    %40 = vector.load %arg13[%c0_29, %c0_30] : memref<1x512xf32, #tpu.memory_space<vmem>>, vector<1x512xf32>
    %41 = vector.broadcast %40 : vector<1x512xf32> to vector<8x512xf32>
    %42 = arith.addf %39, %41 : vector<8x512xf32>
    %cst_31 = arith.constant 0.000000e+00 : f32
    %43 = vector.broadcast %cst_31 : f32 to vector<8x512xf32>
    %44 = arith.maximumf %42, %43 : vector<8x512xf32>
    %45 = arith.truncf %44 : vector<8x512xf32> to vector<8x512xbf16>
    %c0_32 = arith.constant 0 : index
    %c0_33 = arith.constant 0 : index
    %46 = vector.load %arg14[%c0_32, %c0_33] : memref<512x128xbf16, #tpu.memory_space<vmem>>, vector<512x128xbf16>
    %cst_34 = arith.constant dense<0.000000e+00> : vector<8x128xf32>
    %47 = tpu.matmul %45, %46, %cst_34 {dimension_numbers = #tpu.dot_dimension_numbers<[1], [0], [0], [1], [0, 0, 1, 1], [], []>} : vector<8x512xbf16>, vector<512x128xbf16>, vector<8x128xf32> -> vector<8x128xf32>
    %c0_35 = arith.constant 0 : index
    %c0_36 = arith.constant 0 : index
    %48 = vector.load %arg15[%c0_35, %c0_36] : memref<1x128xf32, #tpu.memory_space<vmem>>, vector<1x128xf32>
    %49 = vector.broadcast %48 : vector<1x128xf32> to vector<8x128xf32>
    %50 = arith.mulf %47, %49 : vector<8x128xf32>
    %c0_37 = arith.constant 0 : index
    %c0_38 = arith.constant 0 : index
    %51 = vector.load %arg16[%c0_37, %c0_38] : memref<1x128xf32, #tpu.memory_space<vmem>>, vector<1x128xf32>
    %52 = vector.broadcast %51 : vector<1x128xf32> to vector<8x128xf32>
    %53 = arith.addf %50, %52 : vector<8x128xf32>
    %cst_39 = arith.constant 0.000000e+00 : f32
    %54 = vector.broadcast %cst_39 : f32 to vector<8x128xf32>
    %55 = arith.maximumf %53, %54 : vector<8x128xf32>
    %c0_40 = arith.constant 0 : index
    %c0_41 = arith.constant 0 : index
    %56 = vector.load %arg17[%c0_40, %c0_41] : memref<8x128xf32, #tpu.memory_space<vmem>>, vector<8x128xf32>
    tpu.vector_store %arg17[%c0_40, %c0_41], %55 {strides = array<i32>} : memref<8x128xf32, #tpu.memory_space<vmem>>, vector<8x128xf32>,
    return
  }
  func.func @transform_0(%arg0: i32) -> (i32, i32) {
    %c0_i32 = arith.constant 0 : i32
    %c0_i32_0 = arith.constant 0 : i32
    return %arg0, %c0_i32 : i32, i32
  }
  func.func @transform_1(%arg0: i32) -> (i32, i32) {
    %c0_i32 = arith.constant 0 : i32
    %c0_i32_0 = arith.constant 0 : i32
    %c0_i32_1 = arith.constant 0 : i32
    return %c0_i32, %c0_i32_0 : i32, i32
  }
  func.func @transform_2(%arg0: i32) -> (i32, i32) {
    %c0_i32 = arith.constant 0 : i32
    %c0_i32_0 = arith.constant 0 : i32
    %c0_i32_1 = arith.constant 0 : i32
    return %c0_i32, %c0_i32_0 : i32, i32
  }
  func.func @transform_3(%arg0: i32) -> (i32, i32) {
    %c0_i32 = arith.constant 0 : i32
    %c0_i32_0 = arith.constant 0 : i32
    %c0_i32_1 = arith.constant 0 : i32
    return %c0_i32, %c0_i32_0 : i32, i32
  }
  func.func @transform_4(%arg0: i32) -> (i32, i32) {
    %c0_i32 = arith.constant 0 : i32
    %c0_i32_0 = arith.constant 0 : i32
    %c0_i32_1 = arith.constant 0 : i32
    return %c0_i32, %c0_i32_0 : i32, i32
  }
  func.func @transform_5(%arg0: i32) -> (i32, i32) {
    %c0_i32 = arith.constant 0 : i32
    %c0_i32_0 = arith.constant 0 : i32
    %c0_i32_1 = arith.constant 0 : i32
    return %c0_i32, %c0_i32_0 : i32, i32
  }
  func.func @transform_6(%arg0: i32) -> (i32, i32) {
    %c0_i32 = arith.constant 0 : i32
    %c0_i32_0 = arith.constant 0 : i32
    %c0_i32_1 = arith.constant 0 : i32
    return %c0_i32, %c0_i32_0 : i32, i32
  }
  func.func @transform_7(%arg0: i32) -> (i32, i32) {
    %c0_i32 = arith.constant 0 : i32
    %c0_i32_0 = arith.constant 0 : i32
    %c0_i32_1 = arith.constant 0 : i32
    return %c0_i32, %c0_i32_0 : i32, i32
  }
  func.func @transform_8(%arg0: i32) -> (i32, i32) {
    %c0_i32 = arith.constant 0 : i32
    %c0_i32_0 = arith.constant 0 : i32
    %c0_i32_1 = arith.constant 0 : i32
    return %c0_i32, %c0_i32_0 : i32, i32
  }
  func.func @transform_9(%arg0: i32) -> (i32, i32) {
    %c0_i32 = arith.constant 0 : i32
    %c0_i32_0 = arith.constant 0 : i32
    %c0_i32_1 = arith.constant 0 : i32
    return %c0_i32, %c0_i32_0 : i32, i32
  }
  func.func @transform_10(%arg0: i32) -> (i32, i32) {
    %c0_i32 = arith.constant 0 : i32
    %c0_i32_0 = arith.constant 0 : i32
    %c0_i32_1 = arith.constant 0 : i32
    return %c0_i32, %c0_i32_0 : i32, i32
  }
  func.func @transform_11(%arg0: i32) -> (i32, i32) {
    %c0_i32 = arith.constant 0 : i32
    %c0_i32_0 = arith.constant 0 : i32
    %c0_i32_1 = arith.constant 0 : i32
    return %c0_i32, %c0_i32_0 : i32, i32
  }
  func.func @transform_12(%arg0: i32) -> (i32, i32) {
    %c0_i32 = arith.constant 0 : i32
    %c0_i32_0 = arith.constant 0 : i32
    %c0_i32_1 = arith.constant 0 : i32
    return %c0_i32, %c0_i32_0 : i32, i32
  }
  func.func @transform_13(%arg0: i32) -> (i32, i32) {
    %c0_i32 = arith.constant 0 : i32
    %c0_i32_0 = arith.constant 0 : i32
    %c0_i32_1 = arith.constant 0 : i32
    return %c0_i32, %c0_i32_0 : i32, i32
  }
  func.func @transform_14(%arg0: i32) -> (i32, i32) {
    %c0_i32 = arith.constant 0 : i32
    %c0_i32_0 = arith.constant 0 : i32
    %c0_i32_1 = arith.constant 0 : i32
    return %c0_i32, %c0_i32_0 : i32, i32
  }
  func.func @transform_15(%arg0: i32) -> (i32, i32) {
    %c0_i32 = arith.constant 0 : i32
    %c0_i32_0 = arith.constant 0 : i32
    %c0_i32_1 = arith.constant 0 : i32
    return %c0_i32, %c0_i32_0 : i32, i32
  }
  func.func @transform_16(%arg0: i32) -> (i32, i32) {
    %c0_i32 = arith.constant 0 : i32
    %c0_i32_0 = arith.constant 0 : i32
    return %arg0, %c0_i32 : i32, i32
  }
}

</mosaic_0001>

<bundles_post_ra>
// kernel: simple_neural_network_forward.1
= control target key start
LH: loop header
LB: loop body
LE: loop exit
PB: predicated region body
PF: predicated region fallthrough
CT: control target
= control target key end

     0   :  { %s11018_s0 = inlined_call_operand.vmem [shape: f32[8,3072], index: 0, kind: input, shape index: {}]   ;;  %s11019_s1 = inlined_call_operand.hbm [shape: bf16[3072,256], index: 1, kind: input, shape index: {}]   ;;  %s11020_s2 = inlined_call_operand.hbm [shape: f32[1,256], index: 2, kind: input, shape index: {}]   ;;  %s11021_s3 = inlined_call_operand.hbm [shape: f32[1,256], index: 3, kind: input, shape index: {}]   ;;  %s11022_s4 = inlined_call_operand.hbm [shape: bf16[256,512], index: 4, kind: input, shape index: {}]   ;;  %s11023_s5 = inlined_call_operand.hbm [shape: f32[1,512], index: 5, kind: input, shape index: {}]   ;;  %s11024_s6 = inlined_call_operand.hbm [shape: f32[1,512], index: 6, kind: input, shape index: {}]   ;;  %s11025_s7 = inlined_call_operand.hbm [shape: bf16[512,1024], index: 7, kind: input, shape index: {}]   ;;  %s11026_s8 = inlined_call_operand.hbm [shape: f32[1,1024], index: 8, kind: input, shape index: {}]   ;;  %s11027_s9 = inlined_call_operand.hbm [shape: f32[1,1024], index: 9, kind: input, shape index: {}]   ;;  %s11028_s10 = inlined_call_operand.hbm [shape: bf16[1024,512], index: 10, kind: input, shape index: {}]   ;;  %s11029_s11 = inlined_call_operand.hbm [shape: f32[1,512], index: 11, kind: input, shape index: {}]   ;;  %s11030_s12 = inlined_call_operand.hbm [shape: f32[1,512], index: 12, kind: input, shape index: {}]   ;;  %s11031_s13 = inlined_call_operand.hbm [shape: bf16[512,128], index: 13, kind: input, shape index: {}]   ;;  %s11032_s14 = inlined_call_operand.hbm [shape: f32[1,128], index: 14, kind: input, shape index: {}]   ;;  %s11033_s15 = inlined_call_operand.hbm [shape: f32[1,128], index: 15, kind: input, shape index: {}]   ;;  %s11034_s16 = inlined_call_operand.vmem [shape: f32[8,128], index: 16, kind: output, shape index: {}]  }
   0x1   :  { %11036 = sst [smem:[#allocation33_spill]] %s11018_s0 }
   0x2   :  { %21 = vsyncpa [#allocation3], 0 }
   0x3   :  { %22 = vsyncpa [#allocation5], 0 }
   0x4   :  { %23 = vsyncpa [#allocation8], 0 }
   0x5   :  { %24 = vsyncpa [#allocation11], 0 }
   0x6   :  { %25 = vsyncpa [#allocation14], 0 }
   0x7   :  { %26 = vsyncpa [#allocation17], 0 }
   0x8   :  { %27 = vsyncpa [#allocation20], 0 }
   0x9   :  { %28 = vsyncpa [#allocation23], 0  ;;  %s10490_s21 = smov [#allocation4]   ;;  %s10491_s23 = smov [#allocation7]  }
   0xa   :  { %s49_s22 = sshll.u32 %s10490_s21, 4  ;;  %s68_s24 = sshll.u32 %s10491_s23, 4  ;;  %s50_s22 = int_to_ptr.vmem [resolvable:$true] %s49_s22  ;;  %s10598_s24 = int_to_ptr.vmem [resolvable:$true] %s68_s24 }
   0xb   :  { %s10144_s27 = scalar_lea.hbm %s11020_s2, 32 }
   0xc   :  { %p10145_p0 = scmp.ne.s32.totalorder %s11020_s2, %s10144_s27  ;;  %p10148_p1 = scmp.lt.u32.totalorder %s10144_s27, %s11020_s2 }
   0xe   :  { %p10150_p2 = pnand %p10148_p1, %p10145_p0 }
  0x10   :  { %10153 = shalt.err (!%p10150_p2)
}
  0x11   :  { %s10154_s17 = scalar_lea.vmem %s50_s22, 32  ;;  %p10159_p4 = scmp.lt.s32.totalorder %s50_s22, %s50_s22 }
  0x12   :  { %p10155_p3 = scmp.ne.s32.totalorder %s50_s22, %s10154_s17  ;;  %p10160_p5 = scmp.lt.s32.totalorder %s10154_s17, %s10154_s17 }
  0x14   :  { %p10161_p6 = por %p10160_p5, %p10159_p4 }
  0x16   :  { %p10162_p7 = pnand %p10161_p6, %p10155_p3 }
  0x18   :  { %10165 = shalt.err (!%p10162_p7)
}
  0x19   :  { %52 = dma.hbm_to_vmem [thread:$0]  %s11020_s2, 32, %s50_s22, [#allocation5]  }
  0x1a   :  { %s10166_s23 = scalar_lea.hbm %s11022_s4, 8192 }
  0x1b   :  { %p10167_p8 = scmp.ne.s32.totalorder %s11022_s4, %s10166_s23  ;;  %p10170_p9 = scmp.lt.u32.totalorder %s10166_s23, %s11022_s4 }
  0x1d   :  { %p10172_p10 = pnand %p10170_p9, %p10167_p8 }
  0x1f   :  { %10175 = shalt.err (!%p10172_p10)
}
  0x20   :  { %s10176_s29 = scalar_lea.vmem %s10598_s24, 8192  ;;  %p10181_p12 = scmp.lt.s32.totalorder %s10598_s24, %s10598_s24 }
  0x21   :  { %p10177_p11 = scmp.ne.s32.totalorder %s10598_s24, %s10176_s29  ;;  %p10182_p13 = scmp.lt.s32.totalorder %s10176_s29, %s10176_s29 }
  0x23   :  { %p10183_p0 = por %p10182_p13, %p10181_p12 }
  0x25   :  { %p10184_p1 = pnand %p10183_p0, %p10177_p11 }
  0x27   :  { %10187 = shalt.err (!%p10184_p1)
}
  0x28   :  { %s10492_s2 = smov 256   ;;  %s10493_s22 = smov 16  }
  0x29   :  { %74 = dma.hbm_to_vmem [thread:$0]  %s11022_s4, 8192, %s10598_s24, [#allocation8], %s10492_s2, %s10492_s2, %s10493_s22  }
  0x2a   :  { %s10494_s17 = smov [#allocation10]   ;;  %s10495_s19 = smov [#allocation13]  }
  0x2b   :  { %s91_s18 = sshll.u32 %s10494_s17, 4  ;;  %s113_s20 = sshll.u32 %s10495_s19, 4  ;;  %s92_s18 = int_to_ptr.vmem [resolvable:$true] %s91_s18  ;;  %s114_s20 = int_to_ptr.vmem [resolvable:$true] %s113_s20 }
  0x2c   :  { %s10188_s25 = scalar_lea.hbm %s11024_s6, 64 }
  0x2d   :  { %p10189_p2 = scmp.ne.s32.totalorder %s11024_s6, %s10188_s25  ;;  %p10192_p3 = scmp.lt.u32.totalorder %s10188_s25, %s11024_s6 }
  0x2f   :  { %p10194_p4 = pnand %p10192_p3, %p10189_p2 }
  0x31   :  { %10197 = shalt.err (!%p10194_p4)
}
  0x32   :  { %s10198_s4 = scalar_lea.vmem %s92_s18, 64  ;;  %p10203_p6 = scmp.lt.s32.totalorder %s92_s18, %s92_s18 }
  0x33   :  { %p10199_p5 = scmp.ne.s32.totalorder %s92_s18, %s10198_s4  ;;  %p10204_p7 = scmp.lt.s32.totalorder %s10198_s4, %s10198_s4 }
  0x35   :  { %p10205_p8 = por %p10204_p7, %p10203_p6 }
  0x37   :  { %p10206_p9 = pnand %p10205_p8, %p10199_p5 }
  0x39   :  { %10209 = shalt.err (!%p10206_p9)
}
  0x3a   :  { %94 = dma.hbm_to_vmem [thread:$0]  %s11024_s6, 64, %s92_s18, [#allocation11]  }
  0x3b   :  { %s10210_s19 = scalar_lea.hbm %s11026_s8, 128 }
  0x3c   :  { %p10211_p10 = scmp.ne.s32.totalorder %s11026_s8, %s10210_s19  ;;  %p10214_p11 = scmp.lt.u32.totalorder %s10210_s19, %s11026_s8 }
  0x3e   :  { %p10216_p12 = pnand %p10214_p11, %p10211_p10 }
  0x40   :  { %10219 = shalt.err (!%p10216_p12)
}
  0x41   :  { %s10220_s27 = scalar_lea.vmem %s114_s20, 128  ;;  %p10225_p0 = scmp.lt.s32.totalorder %s114_s20, %s114_s20 }
  0x42   :  { %p10221_p13 = scmp.ne.s32.totalorder %s114_s20, %s10220_s27  ;;  %p10226_p1 = scmp.lt.s32.totalorder %s10220_s27, %s10220_s27 }
  0x44   :  { %p10227_p2 = por %p10226_p1, %p10225_p0 }
  0x46   :  { %p10228_p3 = pnand %p10227_p2, %p10221_p13 }
  0x48   :  { %10231 = shalt.err (!%p10228_p3)
}
  0x49   :  { %116 = dma.hbm_to_vmem [thread:$0]  %s11026_s8, 128, %s114_s20, [#allocation14]  }
  0x4a   :  { %s10496_s28 = smov [#allocation16]   ;;  %s10497_s4 = smov [#allocation19]  }
  0x4b   :  { %s132_s29 = sshll.u32 %s10496_s28, 4  ;;  %s155_s24 = sshll.u32 %s10497_s4, 4  ;;  %s133_s29 = int_to_ptr.vmem [resolvable:$true] %s132_s29  ;;  %s156_s24 = int_to_ptr.vmem [resolvable:$true] %s155_s24 }
  0x4c   :  { %s10232_s17 = scalar_lea.hbm %s11028_s10, 32768 }
  0x4d   :  { %p10233_p4 = scmp.ne.s32.totalorder %s11028_s10, %s10232_s17  ;;  %p10236_p5 = scmp.lt.u32.totalorder %s10232_s17, %s11028_s10 }
  0x4f   :  { %p10238_p6 = pnand %p10236_p5, %p10233_p4 }
  0x51   :  { %10241 = shalt.err (!%p10238_p6)
}
  0x52   :  { %s10242_s8 = scalar_lea.vmem %s133_s29, 32768  ;;  %p10247_p8 = scmp.lt.s32.totalorder %s133_s29, %s133_s29 }
  0x53   :  { %p10243_p7 = scmp.ne.s32.totalorder %s133_s29, %s10242_s8  ;;  %p10248_p9 = scmp.lt.s32.totalorder %s10242_s8, %s10242_s8 }
  0x55   :  { %p10249_p10 = por %p10248_p9, %p10247_p8 }
  0x57   :  { %p10250_p11 = pnand %p10249_p10, %p10243_p7 }
  0x59   :  { %10253 = shalt.err (!%p10250_p11)
}
  0x5a   :  { %138 = dma.hbm_to_vmem [thread:$0]  %s11028_s10, 32768, %s133_s29, [#allocation17], %s10492_s2, %s10492_s2, %s10493_s22  }
  0x5b   :  { %s10254_s18 = scalar_lea.hbm %s11030_s12, 64 }
  0x5c   :  { %p10255_p12 = scmp.ne.s32.totalorder %s11030_s12, %s10254_s18  ;;  %p10258_p13 = scmp.lt.u32.totalorder %s10254_s18, %s11030_s12 }
  0x5e   :  { %p10260_p0 = pnand %p10258_p13, %p10255_p12 }
  0x60   :  { %10263 = shalt.err (!%p10260_p0)
}
  0x61   :  { %s10264_s17 = scalar_lea.vmem %s156_s24, 64  ;;  %p10269_p2 = scmp.lt.s32.totalorder %s156_s24, %s156_s24 }
  0x62   :  { %p10265_p1 = scmp.ne.s32.totalorder %s156_s24, %s10264_s17  ;;  %p10270_p3 = scmp.lt.s32.totalorder %s10264_s17, %s10264_s17 }
  0x64   :  { %p10271_p4 = por %p10270_p3, %p10269_p2 }
  0x66   :  { %p10272_p5 = pnand %p10271_p4, %p10265_p1 }
  0x68   :  { %10275 = shalt.err (!%p10272_p5)
}
  0x69   :  { %158 = dma.hbm_to_vmem [thread:$0]  %s11030_s12, 64, %s156_s24, [#allocation20]  }
  0x6a   :  { %s10498_s22 = smov [#allocation22]   ;;  %s10499_s19 = smov [#allocation2]  }
  0x6b   :  { %s177_s29 = sshll.u32 %s10498_s22, 4  ;;  %s36_s21 = sshll.u32 %s10499_s19, 4  ;;  %s178_s29 = int_to_ptr.vmem [resolvable:$true] %s177_s29  ;;  %s10683_s21 = int_to_ptr.vmem [resolvable:$true] %s36_s21 }
  0x6c   :  { %s10276_s8 = scalar_lea.hbm %s11032_s14, 16 }
  0x6d   :  { %p10277_p6 = scmp.ne.s32.totalorder %s11032_s14, %s10276_s8  ;;  %p10280_p7 = scmp.lt.u32.totalorder %s10276_s8, %s11032_s14 }
  0x6f   :  { %p10282_p8 = pnand %p10280_p7, %p10277_p6 }
  0x71   :  { %10285 = shalt.err (!%p10282_p8)
}
  0x72   :  { %s10286_s12 = scalar_lea.vmem %s178_s29, 16  ;;  %s10290_s24 = scalar_lea.vmem %s178_s29, 32 }
  0x73   :  { %p10287_p9 = scmp.ne.s32.totalorder %s178_s29, %s10286_s12  ;;  %p10291_p10 = scmp.lt.s32.totalorder %s178_s29, %s178_s29 }
  0x74   :  { %p10292_p11 = scmp.lt.s32.totalorder %s10290_s24, %s10286_s12 }
  0x76   :  { %p10293_p12 = por %p10292_p11, %p10291_p10 }
  0x78   :  { %p10294_p13 = pnand %p10293_p12, %p10287_p9 }
  0x7a   :  { %10297 = shalt.err (!%p10294_p13)
}
  0x7b   :  { %180 = dma.hbm_to_vmem [thread:$0]  %s11032_s14, 16, %s178_s29, [#allocation23]  }
  0x7c   :  { %s10298_s0 = scalar_lea.hbm %s11019_s1, 49152 }
  0x7d   :  { %p10299_p0 = scmp.ne.s32.totalorder %s11019_s1, %s10298_s0  ;;  %p10302_p1 = scmp.lt.u32.totalorder %s10298_s0, %s11019_s1 }
  0x7f   :  { %p10304_p2 = pnand %p10302_p1, %p10299_p0 }
  0x81   :  { %10307 = shalt.err (!%p10304_p2)
}
  0x82   :  { %s10308_s19 = scalar_lea.vmem %s10683_s21, 49152  ;;  %p10313_p4 = scmp.lt.s32.totalorder %s10683_s21, %s10683_s21 }
  0x83   :  { %p10309_p3 = scmp.ne.s32.totalorder %s10683_s21, %s10308_s19  ;;  %p10314_p5 = scmp.lt.s32.totalorder %s10308_s19, %s10308_s19 }
  0x85   :  { %p10315_p6 = por %p10314_p5, %p10313_p4 }
  0x87   :  { %p10316_p7 = pnand %p10315_p6, %p10309_p3 }
  0x89   :  { %10319 = shalt.err (!%p10316_p7)
}
  0x8a   :  { %s10500_s14 = smov 128   ;;  %s10501_s29 = smov 8  }
  0x8b   :  { %42 = dma.hbm_to_vmem [thread:$0]  %s11019_s1, 49152, %s10683_s21, [#allocation3], %s10500_s14, %s10500_s14, %s10501_s29  }
  0x8c   :  { %s10502_s8 = smov [#allocation6]   ;;  %s10503_s26 = smov [#allocation9]  }
  0x8d   :  { %s59_s20 = sshll.u32 %s10502_s8, 4  ;;  %s81_s27 = sshll.u32 %s10503_s26, 4  ;;  %s60_s20 = int_to_ptr.vmem [resolvable:$true] %s59_s20  ;;  %s82_s27 = int_to_ptr.vmem [resolvable:$true] %s81_s27 }
  0x8e   :  { %s10320_s24 = scalar_lea.hbm %s11021_s3, 32 }
  0x8f   :  { %p10321_p8 = scmp.ne.s32.totalorder %s11021_s3, %s10320_s24  ;;  %p10324_p9 = scmp.lt.u32.totalorder %s10320_s24, %s11021_s3 }
  0x91   :  { %p10326_p10 = pnand %p10324_p9, %p10321_p8 }
  0x93   :  { %10329 = shalt.err (!%p10326_p10)
}
  0x94   :  { %s10330_s1 = scalar_lea.vmem %s60_s20, 32  ;;  %p10335_p12 = scmp.lt.s32.totalorder %s60_s20, %s60_s20 }
  0x95   :  { %p10331_p11 = scmp.ne.s32.totalorder %s60_s20, %s10330_s1  ;;  %p10336_p13 = scmp.lt.s32.totalorder %s10330_s1, %s10330_s1 }
  0x97   :  { %p10337_p0 = por %p10336_p13, %p10335_p12 }
  0x99   :  { %p10338_p1 = pnand %p10337_p0, %p10331_p11 }
  0x9b   :  { %10341 = shalt.err (!%p10338_p1)
}
  0x9c   :  { %62 = dma.hbm_to_vmem [thread:$0]  %s11021_s3, 32, %s60_s20, [#allocation5]  }
  0x9d   :  { %s10342_s2 = scalar_lea.hbm %s11023_s5, 64 }
  0x9e   :  { %p10343_p2 = scmp.ne.s32.totalorder %s11023_s5, %s10342_s2  ;;  %p10346_p3 = scmp.lt.u32.totalorder %s10342_s2, %s11023_s5 }
  0xa0   :  { %p10348_p4 = pnand %p10346_p3, %p10343_p2 }
  0xa2   :  { %10351 = shalt.err (!%p10348_p4)
}
  0xa3   :  { %s10352_s23 = scalar_lea.vmem %s82_s27, 64  ;;  %p10357_p6 = scmp.lt.s32.totalorder %s82_s27, %s82_s27 }
  0xa4   :  { %p10353_p5 = scmp.ne.s32.totalorder %s82_s27, %s10352_s23  ;;  %p10358_p7 = scmp.lt.s32.totalorder %s10352_s23, %s10352_s23 }
  0xa6   :  { %p10359_p8 = por %p10358_p7, %p10357_p6 }
  0xa8   :  { %p10360_p9 = pnand %p10359_p8, %p10353_p5 }
  0xaa   :  { %10363 = shalt.err (!%p10360_p9)
}
  0xab   :  { %84 = dma.hbm_to_vmem [thread:$0]  %s11023_s5, 64, %s82_s27, [#allocation8]  }
  0xac   :  { %s10504_s8 = smov [#allocation12]   ;;  %s10364_s12 = scalar_lea.hbm %s11025_s7, 32768 }
  0xad   :  { %s100_s20 = sshll.u32 %s10504_s8, 4  ;;  %p10365_p10 = scmp.ne.s32.totalorder %s11025_s7, %s10364_s12  ;;  %s101_s20 = int_to_ptr.vmem [resolvable:$true] %s100_s20 }
  0xae   :  { %p10368_p11 = scmp.lt.u32.totalorder %s10364_s12, %s11025_s7 }
  0xb0   :  { %p10370_p12 = pnand %p10368_p11, %p10365_p10 }
  0xb2   :  { %10373 = shalt.err (!%p10370_p12)
}
  0xb3   :  { %s10374_s30 = scalar_lea.vmem %s101_s20, 32768  ;;  %p10379_p0 = scmp.lt.s32.totalorder %s101_s20, %s101_s20 }
  0xb4   :  { %p10375_p13 = scmp.ne.s32.totalorder %s101_s20, %s10374_s30  ;;  %p10380_p1 = scmp.lt.s32.totalorder %s10374_s30, %s10374_s30 }
  0xb6   :  { %p10381_p2 = por %p10380_p1, %p10379_p0 }
  0xb8   :  { %p10382_p3 = pnand %p10381_p2, %p10375_p13 }
  0xba   :  { %10385 = shalt.err (!%p10382_p3)
}
  0xbb   :  { %s10505_s5 = smov 512   ;;  %s10506_s27 = smov 32  }
  0xbc   :  { %106 = dma.hbm_to_vmem [thread:$0]  %s11025_s7, 32768, %s101_s20, [#allocation11], %s10505_s5, %s10505_s5, %s10506_s27  }
  0xbd   :  { %s10507_s0 = smov [#allocation15]   ;;  %s10508_s10 = smov [#allocation18]  }
  0xbe   :  { %s123_s17 = sshll.u32 %s10507_s0, 4  ;;  %s145_s2 = sshll.u32 %s10508_s10, 4  ;;  %s124_s17 = int_to_ptr.vmem [resolvable:$true] %s123_s17  ;;  %s146_s2 = int_to_ptr.vmem [resolvable:$true] %s145_s2 }
  0xbf   :  { %s10386_s14 = scalar_lea.hbm %s11027_s9, 128 }
  0xc0   :  { %p10387_p4 = scmp.ne.s32.totalorder %s11027_s9, %s10386_s14  ;;  %p10390_p5 = scmp.lt.u32.totalorder %s10386_s14, %s11027_s9 }
  0xc2   :  { %p10392_p6 = pnand %p10390_p5, %p10387_p4 }
  0xc4   :  { %10395 = shalt.err (!%p10392_p6)
}
  0xc5   :  { %s10396_s7 = scalar_lea.vmem %s124_s17, 128  ;;  %p10401_p8 = scmp.lt.s32.totalorder %s124_s17, %s124_s17 }
  0xc6   :  { %p10397_p7 = scmp.ne.s32.totalorder %s124_s17, %s10396_s7  ;;  %p10402_p9 = scmp.lt.s32.totalorder %s10396_s7, %s10396_s7 }
  0xc8   :  { %p10403_p10 = por %p10402_p9, %p10401_p8 }
  0xca   :  { %p10404_p11 = pnand %p10403_p10, %p10397_p7 }
  0xcc   :  { %10407 = shalt.err (!%p10404_p11)
}
  0xcd   :  { %126 = dma.hbm_to_vmem [thread:$0]  %s11027_s9, 128, %s124_s17, [#allocation14]  }
  0xce   :  { %s10408_s12 = scalar_lea.hbm %s11029_s11, 64 }
  0xcf   :  { %p10409_p12 = scmp.ne.s32.totalorder %s11029_s11, %s10408_s12  ;;  %p10412_p13 = scmp.lt.u32.totalorder %s10408_s12, %s11029_s11 }
  0xd1   :  { %p10414_p0 = pnand %p10412_p13, %p10409_p12 }
  0xd3   :  { %10417 = shalt.err (!%p10414_p0)
}
  0xd4   :  { %s10418_s30 = scalar_lea.vmem %s146_s2, 64  ;;  %p10423_p2 = scmp.lt.s32.totalorder %s146_s2, %s146_s2 }
  0xd5   :  { %p10419_p1 = scmp.ne.s32.totalorder %s146_s2, %s10418_s30  ;;  %p10424_p3 = scmp.lt.s32.totalorder %s10418_s30, %s10418_s30 }
  0xd7   :  { %p10425_p4 = por %p10424_p3, %p10423_p2 }
  0xd9   :  { %p10426_p5 = pnand %p10425_p4, %p10419_p1 }
  0xdb   :  { %10429 = shalt.err (!%p10426_p5)
}
  0xdc   :  { %148 = dma.hbm_to_vmem [thread:$0]  %s11029_s11, 64, %s146_s2, [#allocation17]  }
  0xdd   :  { %s10509_s27 = smov [#allocation21]   ;;  %s10430_s17 = scalar_lea.hbm %s11031_s13, 4096 }
  0xde   :  { %s164_s1 = sshll.u32 %s10509_s27, 4  ;;  %p10431_p6 = scmp.ne.s32.totalorder %s11031_s13, %s10430_s17  ;;  %s165_s1 = int_to_ptr.vmem [resolvable:$true] %s164_s1 }
  0xdf   :  { %p10434_p7 = scmp.lt.u32.totalorder %s10430_s17, %s11031_s13 }
  0xe1   :  { %p10436_p8 = pnand %p10434_p7, %p10431_p6 }
  0xe3   :  { %10439 = shalt.err (!%p10436_p8)
}
  0xe4   :  { %s10440_s29 = scalar_lea.vmem %s165_s1, 4096  ;;  %p10445_p10 = scmp.lt.s32.totalorder %s165_s1, %s165_s1 }
  0xe5   :  { %p10441_p9 = scmp.ne.s32.totalorder %s165_s1, %s10440_s29  ;;  %p10446_p11 = scmp.lt.s32.totalorder %s10440_s29, %s10440_s29 }
  0xe7   :  { %p10447_p12 = por %p10446_p11, %p10445_p10 }
  0xe9   :  { %p10448_p13 = pnand %p10447_p12, %p10441_p9 }
  0xeb   :  { %10451 = shalt.err (!%p10448_p13)
}
  0xec   :  { %s10510_s11 = smov 64   ;;  %s10511_s2 = smov 4  }
  0xed   :  { %170 = dma.hbm_to_vmem [thread:$0]  %s11031_s13, 4096, %s165_s1, [#allocation20], %s10510_s11, %s10510_s11, %s10511_s2  }
  0xee   :  { %s10512_s25 = smov [#allocation24]   ;;  %s10452_s26 = scalar_lea.hbm %s11033_s15, 16 }
  0xef   :  { %s187_s7 = sshll.u32 %s10512_s25, 4  ;;  %p10453_p0 = scmp.ne.s32.totalorder %s11033_s15, %s10452_s26  ;;  %s188_s7 = int_to_ptr.vmem [resolvable:$true] %s187_s7 }
  0xf0   :  { %p10456_p1 = scmp.lt.u32.totalorder %s10452_s26, %s11033_s15 }
  0xf2   :  { %p10458_p2 = pnand %p10456_p1, %p10453_p0 }
  0xf4   :  { %10461 = shalt.err (!%p10458_p2)
}
  0xf5   :  { %s10462_s28 = scalar_lea.vmem %s188_s7, 16  ;;  %s10466_s13 = scalar_lea.vmem %s188_s7, 32 }
  0xf6   :  { %p10463_p3 = scmp.ne.s32.totalorder %s188_s7, %s10462_s28  ;;  %p10467_p4 = scmp.lt.s32.totalorder %s188_s7, %s188_s7 }
  0xf7   :  { %p10468_p5 = scmp.lt.s32.totalorder %s10466_s13, %s10462_s28 }
  0xf9   :  { %p10469_p6 = por %p10468_p5, %p10467_p4 }
  0xfb   :  { %p10470_p7 = pnand %p10469_p6, %p10463_p3 }
  0xfd   :  { %10473 = shalt.err (!%p10470_p7)
}
  0xfe   :  { %190 = dma.hbm_to_vmem [thread:$0]  %s11033_s15, 16, %s188_s7, [#allocation23]  }
  0xff   :  { %10474 = dma.done.wait [#allocation3], 49152  }
 0x100   :  { %10475 = vsyncadd [#allocation3], 4294918144 }
 0x101   :  { %10476 = dma.done.wait [#allocation5], 64  }
 0x102   :  { %10477 = vsyncadd [#allocation5], 4294967232 }
 0x103   :  { %10478 = dma.done.wait [#allocation8], 8256  }
 0x104   :  { %10479 = vsyncadd [#allocation8], 4294959040 }
 0x105   :  { %10480 = dma.done.wait [#allocation11], 32832  }
 0x106   :  { %10481 = vsyncadd [#allocation11], 4294934464 }
 0x107   :  { %10482 = dma.done.wait [#allocation14], 256  }
 0x108   :  { %10483 = vsyncadd [#allocation14], 4294967040 }
 0x109   :  { %10484 = dma.done.wait [#allocation17], 32832  }
 0x10a   :  { %10485 = vsyncadd [#allocation17], 4294934464 }
 0x10b   :  { %10486 = dma.done.wait [#allocation20], 4160  }
 0x10c   :  { %10487 = vsyncadd [#allocation20], 4294963136 }
 0x10d   :  { %10488 = dma.done.wait [#allocation23], 32  }
 0x10e   :  { %10489 = vsyncadd [#allocation23], 4294967264  ;;  %v9054_v0 = vld [vmem:[#allocation2 + $0x4] ss:$8 sps:$4 sm:$0xff]   ;;  %v9056_v1 = vld [vmem:[#allocation2] ss:$8 sps:$4 sm:$0xff]  }
 0x10f   :  { %2589 = vmatprep.subr.bf16.mxu0 %v9054_v0  ;;  %v9057_v2 = vld [vmem:[#allocation2 + $0x14] ss:$8 sps:$4 sm:$0xff]   ;;  %v9059_v3 = vld [vmem:[#allocation2 + $0x10] ss:$8 sps:$4 sm:$0xff]   ;;  %v9060_v4 = vld [vmem:[#allocation2 + $0x24] ss:$8 sps:$4 sm:$0xff]  }
 0x110   :  { %2590 = vmatpush1.bf16.msra.mxu0 %v9056_v1  ;;  %v9062_v5 = vld [vmem:[#allocation2 + $0x20] ss:$8 sps:$4 sm:$0xff]   ;;  %v9063_v6 = vld [vmem:[#allocation2 + $0x34] ss:$8 sps:$4 sm:$0xff]   ;;  %v9065_v7 = vld [vmem:[#allocation2 + $0x30] ss:$8 sps:$4 sm:$0xff]  }
 0x111   :  { %2591 = vmatprep.subr.bf16.mxu0 %v9057_v2  ;;  %v9066_v8 = vld [vmem:[#allocation2 + $0x44] ss:$8 sps:$4 sm:$0xff]   ;;  %v9068_v9 = vld [vmem:[#allocation2 + $0x40] ss:$8 sps:$4 sm:$0xff]   ;;  %v9069_v10 = vld [vmem:[#allocation2 + $0x54] ss:$8 sps:$4 sm:$0xff]  }
 0x112   :  { %v9071_v11 = vld [vmem:[#allocation2 + $0x50] ss:$8 sps:$4 sm:$0xff]   ;;  %v9072_v12 = vld [vmem:[#allocation2 + $0x64] ss:$8 sps:$4 sm:$0xff]   ;;  %s11037_s5 = sld [smem:[#allocation33_spill]] }
 0x113   :  { %v9074_v15 = vld [vmem:[#allocation2 + $0x60] ss:$8 sps:$4 sm:$0xff]   ;;  %v9075_v16 = vld [vmem:[#allocation2 + $0x74] ss:$8 sps:$4 sm:$0xff]   ;;  %v9077_v17 = vld [vmem:[#allocation2 + $0x70] ss:$8 sps:$4 sm:$0xff]  }
 0x114   :  { %2592 = vmatpush1.bf16.msra.mxu0 %v9059_v3  ;;  %v9078_v18 = vld [vmem:[#allocation2 + $0x84] ss:$8 sps:$4 sm:$0xff]   ;;  %v9080_v19 = vld [vmem:[#allocation2 + $0x80] ss:$8 sps:$4 sm:$0xff]   ;;  %v9081_v20 = vld [vmem:[#allocation2 + $0x94] ss:$8 sps:$4 sm:$0xff]  }
 0x115   :  { %2593 = vmatprep.subr.bf16.mxu0 %v9060_v4  ;;  %v9083_v21 = vld [vmem:[#allocation2 + $0x90] ss:$8 sps:$4 sm:$0xff]   ;;  %v9084_v22 = vld [vmem:[#allocation2 + $0xa4] ss:$8 sps:$4 sm:$0xff]   ;;  %v9086_v23 = vld [vmem:[#allocation2 + $0xa0] ss:$8 sps:$4 sm:$0xff]  }
 0x116   :  { %v9087_v24 = vld [vmem:[#allocation2 + $0xb4] ss:$8 sps:$4 sm:$0xff]   ;;  %v9089_v25 = vld [vmem:[#allocation2 + $0xb0] ss:$8 sps:$4 sm:$0xff]   ;;  %v9090_v26 = vld [vmem:[#allocation2 + $0xc4] ss:$8 sps:$4 sm:$0xff]  }
 0x117   :  { %v9092_v27 = vld [vmem:[#allocation2 + $0xc0] ss:$8 sps:$4 sm:$0xff]   ;;  %v9093_v28 = vld [vmem:[#allocation2 + $0xd4] ss:$8 sps:$4 sm:$0xff]   ;;  %v9095_v29 = vld [vmem:[#allocation2 + $0xd0] ss:$8 sps:$4 sm:$0xff]  }
 0x118   :  { %2594 = vmatpush1.bf16.msra.mxu0 %v9062_v5  ;;  %v238_v13 = vld [vmem:[%s11037_s5 + $0x8] sm:$0xff]  ;;  %v9099_v32 = vld [vmem:[#allocation2 + $0xf4] ss:$8 sps:$4 sm:$0xff]   ;;  %v9101_v33 = vld [vmem:[#allocation2 + $0xf0] ss:$8 sps:$4 sm:$0xff]  }
 0x119   :  { %2595 = vmatprep.subr.bf16.mxu0 %v9063_v6  ;;  %v262_v14 = vpack.c.bf16 %v238_v13, %v238_v13  ;;  %v9096_v30 = vld [vmem:[#allocation2 + $0xe4] ss:$8 sps:$4 sm:$0xff]   ;;  %v9098_v31 = vld [vmem:[#allocation2 + $0xe0] ss:$8 sps:$4 sm:$0xff]   ;;  %v240_v36 = vld [vmem:[%s11037_s5 + $0x18] sm:$0xff] }
 0x11a   :  { %v9104_v34 = vld [vmem:[#allocation2 + $0x104] ss:$8 sps:$4 sm:$0xff]   ;;  %v9102_v38 = vld [vmem:[#allocation2 + $0x100] ss:$8 sps:$4 sm:$0xff]   ;;  %v264_v39 = vpack.c.bf16 %v240_v36, %v240_v36  ;;  %v9107_v40 = vld [vmem:[#allocation2 + $0x114] ss:$8 sps:$4 sm:$0xff]  }
 0x11b   :  { %2621 = vmatprep.mubr.bf16.mxu0 %v262_v14  ;;  %v237_v35 = vld [vmem:[%s11037_s5] sm:$0xff]  ;;  %v9105_v41 = vld [vmem:[#allocation2 + $0x110] ss:$8 sps:$4 sm:$0xff]   ;;  %v9113_v44 = vld [vmem:[#allocation2 + $0x134] ss:$8 sps:$4 sm:$0xff]  }
 0x11c   :  { %2596 = vmatpush1.bf16.msra.mxu0 %v9065_v7  ;;  %v261_v37 = vpack.c.bf16 %v237_v35, %v237_v35  ;;  %v9110_v42 = vld [vmem:[#allocation2 + $0x124] ss:$8 sps:$4 sm:$0xff]   ;;  %v9108_v43 = vld [vmem:[#allocation2 + $0x120] ss:$8 sps:$4 sm:$0xff]   ;;  %v9111_v45 = vld [vmem:[#allocation2 + $0x130] ss:$8 sps:$4 sm:$0xff]  }
 0x11d   :  { %2597 = vmatprep.subr.bf16.mxu0 %v9066_v8  ;;  %v9116_v46 = vld [vmem:[#allocation2 + $0x144] ss:$8 sps:$4 sm:$0xff]   ;;  %v9114_v47 = vld [vmem:[#allocation2 + $0x140] ss:$8 sps:$4 sm:$0xff]   ;;  %v9119_v48 = vld [vmem:[#allocation2 + $0x154] ss:$8 sps:$4 sm:$0xff]  }
 0x11e   :  { %v9117_v49 = vld [vmem:[#allocation2 + $0x150] ss:$8 sps:$4 sm:$0xff]   ;;  %v9122_v50 = vld [vmem:[#allocation2 + $0x164] ss:$8 sps:$4 sm:$0xff]   ;;  %v9120_v51 = vld [vmem:[#allocation2 + $0x160] ss:$8 sps:$4 sm:$0xff]  }
 0x11f   :  { %v9125_v52 = vld [vmem:[#allocation2 + $0x174] ss:$8 sps:$4 sm:$0xff]   ;;  %v9123_v53 = vld [vmem:[#allocation2 + $0x170] ss:$8 sps:$4 sm:$0xff]   ;;  %v9128_v54 = vld [vmem:[#allocation2 + $0x184] ss:$8 sps:$4 sm:$0xff]  }
 0x120   :  { %2598 = vmatpush1.bf16.msra.mxu0 %v9068_v9  ;;  %v9126_v55 = vld [vmem:[#allocation2 + $0x180] ss:$8 sps:$4 sm:$0xff]   ;;  %v9131_v56 = vld [vmem:[#allocation2 + $0x194] ss:$8 sps:$4 sm:$0xff]   ;;  %v9129_v57 = vld [vmem:[#allocation2 + $0x190] ss:$8 sps:$4 sm:$0xff]  }
 0x121   :  { %2599 = vmatprep.subr.bf16.mxu0 %v9069_v10  ;;  %v9134_v58 = vld [vmem:[#allocation2 + $0x1a4] ss:$8 sps:$4 sm:$0xff]   ;;  %v9132_v59 = vld [vmem:[#allocation2 + $0x1a0] ss:$8 sps:$4 sm:$0xff]   ;;  %v9137_v60 = vld [vmem:[#allocation2 + $0x1b4] ss:$8 sps:$4 sm:$0xff]  }
 0x122   :  { %v9135_v61 = vld [vmem:[#allocation2 + $0x1b0] ss:$8 sps:$4 sm:$0xff]   ;;  %v9140_v62 = vld [vmem:[#allocation2 + $0x1c4] ss:$8 sps:$4 sm:$0xff]   ;;  %v9138_v63 = vld [vmem:[#allocation2 + $0x1c0] ss:$8 sps:$4 sm:$0xff]  }
 0x123   :  { %v9143_v0 = vld [vmem:[#allocation2 + $0x1d4] ss:$8 sps:$4 sm:$0xff]   ;;  %v9141_v1 = vld [vmem:[#allocation2 + $0x1d0] ss:$8 sps:$4 sm:$0xff]   ;;  %v9146_v2 = vld [vmem:[#allocation2 + $0x1e4] ss:$8 sps:$4 sm:$0xff]  }
 0x124   :  { %2600 = vmatpush1.bf16.msra.mxu0 %v9071_v11  ;;  %v9144_v3 = vld [vmem:[#allocation2 + $0x1e0] ss:$8 sps:$4 sm:$0xff]   ;;  %v9149_v4 = vld [vmem:[#allocation2 + $0x1f4] ss:$8 sps:$4 sm:$0xff]   ;;  %v9147_v5 = vld [vmem:[#allocation2 + $0x1f0] ss:$8 sps:$4 sm:$0xff]  }
 0x125   :  { %2601 = vmatprep.subr.bf16.mxu0 %v9072_v12  ;;  %v9152_v6 = vld [vmem:[#allocation2 + $0x204] ss:$8 sps:$4 sm:$0xff]   ;;  %v239_v7 = vld [vmem:[%s11037_s5 + $0x10] sm:$0xff]  ;;  %v9150_v10 = vld [vmem:[#allocation2 + $0x200] ss:$8 sps:$4 sm:$0xff]  }
 0x126   :  { %v242_v8 = vld [vmem:[%s11037_s5 + $0x28] sm:$0xff]  ;;  %v263_v9 = vpack.c.bf16 %v239_v7, %v239_v7  ;;  %v9155_v12 = vld [vmem:[#allocation2 + $0x214] ss:$8 sps:$4 sm:$0xff]   ;;  %v9153_v13 = vld [vmem:[#allocation2 + $0x210] ss:$8 sps:$4 sm:$0xff]  }
 0x127   :  { %v266_v11 = vpack.c.bf16 %v242_v8, %v242_v8  ;;  %v9158_v14 = vld [vmem:[#allocation2 + $0x224] ss:$8 sps:$4 sm:$0xff]   ;;  %v9186_v35 = vld [vmem:[#allocation2 + $0x2c0] ss:$8 sps:$4 sm:$0xff]   ;;  %v9191_v36 = vld [vmem:[#allocation2 + $0x2d4] ss:$8 sps:$4 sm:$0xff]  }
 0x128   :  { %2602 = vmatpush1.bf16.msra.mxu0 %v9074_v15  ;;  %v9156_v15 = vld [vmem:[#allocation2 + $0x220] ss:$8 sps:$4 sm:$0xff]   ;;  %v9239_v8 = vld [vmem:[#allocation2 + $0x3d4] ss:$8 sps:$4 sm:$0xff]  }
 0x129   :  { %2603 = vmatprep.subr.bf16.mxu0 %v9075_v16  ;;  %v9161_v16 = vld [vmem:[#allocation2 + $0x234] ss:$8 sps:$4 sm:$0xff]   ;;  %v9234_v7 = vld [vmem:[#allocation2 + $0x3c0] ss:$8 sps:$4 sm:$0xff]  }
 0x12c   :  { %2604 = vmatpush1.bf16.msra.mxu0 %v9077_v17  ;;  %v9159_v17 = vld [vmem:[#allocation2 + $0x230] ss:$8 sps:$4 sm:$0xff]  }
 0x12d   :  { %2605 = vmatprep.subr.bf16.mxu0 %v9078_v18  ;;  %v9164_v18 = vld [vmem:[#allocation2 + $0x244] ss:$8 sps:$4 sm:$0xff]  }
 0x130   :  { %2606 = vmatpush1.bf16.msra.mxu0 %v9080_v19  ;;  %v9162_v19 = vld [vmem:[#allocation2 + $0x240] ss:$8 sps:$4 sm:$0xff]  }
 0x131   :  { %2607 = vmatprep.subr.bf16.mxu0 %v9081_v20  ;;  %v9167_v20 = vld [vmem:[#allocation2 + $0x254] ss:$8 sps:$4 sm:$0xff]  }
 0x134   :  { %2608 = vmatpush1.bf16.msra.mxu0 %v9083_v21  ;;  %v9165_v21 = vld [vmem:[#allocation2 + $0x250] ss:$8 sps:$4 sm:$0xff]  }
 0x135   :  { %2609 = vmatprep.subr.bf16.mxu0 %v9084_v22  ;;  %v9170_v22 = vld [vmem:[#allocation2 + $0x264] ss:$8 sps:$4 sm:$0xff]  }
 0x138   :  { %2610 = vmatpush1.bf16.msra.mxu0 %v9086_v23  ;;  %v9168_v23 = vld [vmem:[#allocation2 + $0x260] ss:$8 sps:$4 sm:$0xff]  }
 0x139   :  { %2611 = vmatprep.subr.bf16.mxu0 %v9087_v24  ;;  %v9173_v24 = vld [vmem:[#allocation2 + $0x274] ss:$8 sps:$4 sm:$0xff]  }
 0x13c   :  { %2612 = vmatpush1.bf16.msra.mxu0 %v9089_v25  ;;  %v9171_v25 = vld [vmem:[#allocation2 + $0x270] ss:$8 sps:$4 sm:$0xff]  }
 0x13d   :  { %2613 = vmatprep.subr.bf16.mxu0 %v9090_v26  ;;  %v9176_v26 = vld [vmem:[#allocation2 + $0x284] ss:$8 sps:$4 sm:$0xff]  }
 0x140   :  { %2614 = vmatpush1.bf16.msra.mxu0 %v9092_v27  ;;  %v9174_v27 = vld [vmem:[#allocation2 + $0x280] ss:$8 sps:$4 sm:$0xff]  }
 0x141   :  { %2615 = vmatprep.subr.bf16.mxu0 %v9093_v28  ;;  %v9179_v28 = vld [vmem:[#allocation2 + $0x294] ss:$8 sps:$4 sm:$0xff]  }
 0x144   :  { %2616 = vmatpush1.bf16.msra.mxu0 %v9095_v29  ;;  %v9177_v29 = vld [vmem:[#allocation2 + $0x290] ss:$8 sps:$4 sm:$0xff]  }
 0x145   :  { %2617 = vmatprep.subr.bf16.mxu0 %v9096_v30  ;;  %v9182_v30 = vld [vmem:[#allocation2 + $0x2a4] ss:$8 sps:$4 sm:$0xff]  }
 0x148   :  { %2618 = vmatpush1.bf16.msra.mxu0 %v9098_v31  ;;  %v9180_v31 = vld [vmem:[#allocation2 + $0x2a0] ss:$8 sps:$4 sm:$0xff]  }
 0x149   :  { %2619 = vmatprep.subr.bf16.mxu0 %v9099_v32  ;;  %v9185_v32 = vld [vmem:[#allocation2 + $0x2b4] ss:$8 sps:$4 sm:$0xff]  }
 0x14c   :  { %2620 = vmatpush1.bf16.msra.mxu0 %v9101_v33  ;;  %v9183_v33 = vld [vmem:[#allocation2 + $0x2b0] ss:$8 sps:$4 sm:$0xff]  }
 0x14d   :  { %2630 = vmatprep.subr.bf16.mxu0 %v9104_v34  ;;  %v9188_v34 = vld [vmem:[#allocation2 + $0x2c4] ss:$8 sps:$4 sm:$0xff]  }
 0x14f   :  { %2622 = vmatmul.mubr.bf16.vlgmr.msra.gmra.mrb[0].mxu0 %v261_v37  ;;  %v9189_v37 = vld [vmem:[#allocation2 + $0x2d0] ss:$8 sps:$4 sm:$0xff]  }
 0x150   :  { %2631 = vmatpush1.bf16.msra.mxu0 %v9102_v38  ;;  %2662 = vmatprep.mubr.bf16.mxu0 %v264_v39  ;;  %v9194_v38 = vld [vmem:[#allocation2 + $0x2e4] ss:$8 sps:$4 sm:$0xff]   ;;  %v9192_v39 = vld [vmem:[#allocation2 + $0x2e0] ss:$8 sps:$4 sm:$0xff]  }
 0x151   :  { %2632 = vmatprep.subr.bf16.mxu0 %v9107_v40  ;;  %v9197_v40 = vld [vmem:[#allocation2 + $0x2f4] ss:$8 sps:$4 sm:$0xff]  }
 0x154   :  { %2633 = vmatpush1.bf16.msra.mxu0 %v9105_v41  ;;  %v9195_v41 = vld [vmem:[#allocation2 + $0x2f0] ss:$8 sps:$4 sm:$0xff]  }
 0x155   :  { %2634 = vmatprep.subr.bf16.mxu0 %v9110_v42  ;;  %v9200_v42 = vld [vmem:[#allocation2 + $0x304] ss:$8 sps:$4 sm:$0xff]  }
 0x158   :  { %2635 = vmatpush1.bf16.msra.mxu0 %v9108_v43  ;;  %v241_v43 = vld [vmem:[%s11037_s5 + $0x20] sm:$0xff] }
 0x159   :  { %2636 = vmatprep.subr.bf16.mxu0 %v9113_v44  ;;  %v244_v44 = vld [vmem:[%s11037_s5 + $0x38] sm:$0xff] }
 0x15c   :  { %2637 = vmatpush1.bf16.msra.mxu0 %v9111_v45  ;;  %v265_v45 = vpack.c.bf16 %v241_v43, %v241_v43  ;;  %v9282_v43 = vld [vmem:[#allocation2 + $0x4c0] ss:$8 sps:$4 sm:$0xff]  }
 0x15d   :  { %2638 = vmatprep.subr.bf16.mxu0 %v9116_v46  ;;  %v9198_v46 = vld [vmem:[#allocation2 + $0x300] ss:$8 sps:$4 sm:$0xff]  }
 0x160   :  { %2639 = vmatpush1.bf16.msra.mxu0 %v9114_v47  ;;  %v268_v47 = vpack.c.bf16 %v244_v44, %v244_v44  ;;  %v9287_v44 = vld [vmem:[#allocation2 + $0x4d4] ss:$8 sps:$4 sm:$0xff]  }
 0x161   :  { %2640 = vmatprep.subr.bf16.mxu0 %v9119_v48  ;;  %v9203_v48 = vld [vmem:[#allocation2 + $0x314] ss:$8 sps:$4 sm:$0xff]  }
 0x164   :  { %2641 = vmatpush1.bf16.msra.mxu0 %v9117_v49  ;;  %v9201_v49 = vld [vmem:[#allocation2 + $0x310] ss:$8 sps:$4 sm:$0xff]  }
 0x165   :  { %2642 = vmatprep.subr.bf16.mxu0 %v9122_v50  ;;  %v9206_v50 = vld [vmem:[#allocation2 + $0x324] ss:$8 sps:$4 sm:$0xff]  }
 0x168   :  { %2643 = vmatpush1.bf16.msra.mxu0 %v9120_v51  ;;  %v9204_v51 = vld [vmem:[#allocation2 + $0x320] ss:$8 sps:$4 sm:$0xff]  }
 0x169   :  { %2644 = vmatprep.subr.bf16.mxu0 %v9125_v52  ;;  %v9209_v52 = vld [vmem:[#allocation2 + $0x334] ss:$8 sps:$4 sm:$0xff]  }
 0x16c   :  { %2645 = vmatpush1.bf16.msra.mxu0 %v9123_v53  ;;  %v9207_v53 = vld [vmem:[#allocation2 + $0x330] ss:$8 sps:$4 sm:$0xff]  }
 0x16d   :  { %2646 = vmatprep.subr.bf16.mxu0 %v9128_v54  ;;  %v9212_v54 = vld [vmem:[#allocation2 + $0x344] ss:$8 sps:$4 sm:$0xff]  }
 0x170   :  { %2647 = vmatpush1.bf16.msra.mxu0 %v9126_v55  ;;  %v9210_v55 = vld [vmem:[#allocation2 + $0x340] ss:$8 sps:$4 sm:$0xff]  }
 0x171   :  { %2648 = vmatprep.subr.bf16.mxu0 %v9131_v56  ;;  %v9215_v56 = vld [vmem:[#allocation2 + $0x354] ss:$8 sps:$4 sm:$0xff]  }
 0x174   :  { %2649 = vmatpush1.bf16.msra.mxu0 %v9129_v57  ;;  %v9213_v57 = vld [vmem:[#allocation2 + $0x350] ss:$8 sps:$4 sm:$0xff]  }
 0x175   :  { %2650 = vmatprep.subr.bf16.mxu0 %v9134_v58  ;;  %v9218_v58 = vld [vmem:[#allocation2 + $0x364] ss:$8 sps:$4 sm:$0xff]  }
 0x178   :  { %2651 = vmatpush1.bf16.msra.mxu0 %v9132_v59  ;;  %v9216_v59 = vld [vmem:[#allocation2 + $0x360] ss:$8 sps:$4 sm:$0xff]  }
 0x179   :  { %2652 = vmatprep.subr.bf16.mxu0 %v9137_v60  ;;  %v9221_v60 = vld [vmem:[#allocation2 + $0x374] ss:$8 sps:$4 sm:$0xff]  }
 0x17c   :  { %2653 = vmatpush1.bf16.msra.mxu0 %v9135_v61  ;;  %v9219_v61 = vld [vmem:[#allocation2 + $0x370] ss:$8 sps:$4 sm:$0xff]  }
 0x17d   :  { %2654 = vmatprep.subr.bf16.mxu0 %v9140_v62  ;;  %v9224_v62 = vld [vmem:[#allocation2 + $0x384] ss:$8 sps:$4 sm:$0xff]  }
 0x180   :  { %2655 = vmatpush1.bf16.msra.mxu0 %v9138_v63  ;;  %v9222_v63 = vld [vmem:[#allocation2 + $0x380] ss:$8 sps:$4 sm:$0xff]  }
 0x181   :  { %2656 = vmatprep.subr.bf16.mxu0 %v9143_v0  ;;  %v9227_v0 = vld [vmem:[#allocation2 + $0x394] ss:$8 sps:$4 sm:$0xff]  }
 0x184   :  { %2657 = vmatpush1.bf16.msra.mxu0 %v9141_v1  ;;  %v9225_v1 = vld [vmem:[#allocation2 + $0x390] ss:$8 sps:$4 sm:$0xff]  }
 0x185   :  { %2658 = vmatprep.subr.bf16.mxu0 %v9146_v2  ;;  %v9230_v2 = vld [vmem:[#allocation2 + $0x3a4] ss:$8 sps:$4 sm:$0xff]  }
 0x188   :  { %2659 = vmatpush1.bf16.msra.mxu0 %v9144_v3  ;;  %v9228_v3 = vld [vmem:[#allocation2 + $0x3a0] ss:$8 sps:$4 sm:$0xff]  }
 0x189   :  { %2660 = vmatprep.subr.bf16.mxu0 %v9149_v4  ;;  %v9233_v4 = vld [vmem:[#allocation2 + $0x3b4] ss:$8 sps:$4 sm:$0xff]  }
 0x18c   :  { %2661 = vmatpush1.bf16.msra.mxu0 %v9147_v5  ;;  %v9231_v5 = vld [vmem:[#allocation2 + $0x3b0] ss:$8 sps:$4 sm:$0xff]  }
 0x18d   :  { %2671 = vmatprep.subr.bf16.mxu0 %v9152_v6  ;;  %v9236_v6 = vld [vmem:[#allocation2 + $0x3c4] ss:$8 sps:$4 sm:$0xff]  }
 0x18f   :  { %2663 = vmatmul.mubr.bf16.vlgmr.msra.gmra.mrb[0].mxu0 %v263_v9  ;;  %v9237_v9 = vld [vmem:[#allocation2 + $0x3d0] ss:$8 sps:$4 sm:$0xff]  }
 0x190   :  { %2672 = vmatpush1.bf16.msra.mxu0 %v9150_v10  ;;  %2703 = vmatprep.mubr.bf16.mxu0 %v266_v11  ;;  %v9242_v10 = vld [vmem:[#allocation2 + $0x3e4] ss:$8 sps:$4 sm:$0xff]   ;;  %v9240_v11 = vld [vmem:[#allocation2 + $0x3e0] ss:$8 sps:$4 sm:$0xff]  }
 0x191   :  { %2673 = vmatprep.subr.bf16.mxu0 %v9155_v12  ;;  %v9245_v12 = vld [vmem:[#allocation2 + $0x3f4] ss:$8 sps:$4 sm:$0xff]  }
 0x194   :  { %2674 = vmatpush1.bf16.msra.mxu0 %v9153_v13  ;;  %v9243_v13 = vld [vmem:[#allocation2 + $0x3f0] ss:$8 sps:$4 sm:$0xff]  }
 0x195   :  { %2675 = vmatprep.subr.bf16.mxu0 %v9158_v14  ;;  %v9248_v14 = vld [vmem:[#allocation2 + $0x404] ss:$8 sps:$4 sm:$0xff]  }
 0x198   :  { %2676 = vmatpush1.bf16.msra.mxu0 %v9156_v15  ;;  %v243_v15 = vld [vmem:[%s11037_s5 + $0x30] sm:$0xff] }
 0x199   :  { %2677 = vmatprep.subr.bf16.mxu0 %v9161_v16  ;;  %v246_v16 = vld [vmem:[%s11037_s5 + $0x48] sm:$0xff] }
 0x19c   :  { %2678 = vmatpush1.bf16.msra.mxu0 %v9159_v17  ;;  %v267_v17 = vpack.c.bf16 %v243_v15, %v243_v15  ;;  %v9330_v15 = vld [vmem:[#allocation2 + $0x5c0] ss:$8 sps:$4 sm:$0xff]  }
 0x19d   :  { %2679 = vmatprep.subr.bf16.mxu0 %v9164_v18  ;;  %v9246_v18 = vld [vmem:[#allocation2 + $0x400] ss:$8 sps:$4 sm:$0xff]  }
 0x1a0   :  { %2680 = vmatpush1.bf16.msra.mxu0 %v9162_v19  ;;  %v270_v19 = vpack.c.bf16 %v246_v16, %v246_v16  ;;  %v9335_v16 = vld [vmem:[#allocation2 + $0x5d4] ss:$8 sps:$4 sm:$0xff]  }
 0x1a1   :  { %2681 = vmatprep.subr.bf16.mxu0 %v9167_v20  ;;  %v9251_v20 = vld [vmem:[#allocation2 + $0x414] ss:$8 sps:$4 sm:$0xff]  }
 0x1a4   :  { %2682 = vmatpush1.bf16.msra.mxu0 %v9165_v21  ;;  %v9249_v21 = vld [vmem:[#allocation2 + $0x410] ss:$8 sps:$4 sm:$0xff]  }
 0x1a5   :  { %2683 = vmatprep.subr.bf16.mxu0 %v9170_v22  ;;  %v9254_v22 = vld [vmem:[#allocation2 + $0x424] ss:$8 sps:$4 sm:$0xff]  }
 0x1a8   :  { %2684 = vmatpush1.bf16.msra.mxu0 %v9168_v23  ;;  %v9252_v23 = vld [vmem:[#allocation2 + $0x420] ss:$8 sps:$4 sm:$0xff]  }
 0x1a9   :  { %2685 = vmatprep.subr.bf16.mxu0 %v9173_v24  ;;  %v9257_v24 = vld [vmem:[#allocation2 + $0x434] ss:$8 sps:$4 sm:$0xff]  }
 0x1ac   :  { %2686 = vmatpush1.bf16.msra.mxu0 %v9171_v25  ;;  %v9255_v25 = vld [vmem:[#allocation2 + $0x430] ss:$8 sps:$4 sm:$0xff]  }
 0x1ad   :  { %2687 = vmatprep.subr.bf16.mxu0 %v9176_v26  ;;  %v9260_v26 = vld [vmem:[#allocation2 + $0x444] ss:$8 sps:$4 sm:$0xff]  }
 0x1b0   :  { %2688 = vmatpush1.bf16.msra.mxu0 %v9174_v27  ;;  %v9258_v27 = vld [vmem:[#allocation2 + $0x440] ss:$8 sps:$4 sm:$0xff]  }
 0x1b1   :  { %2689 = vmatprep.subr.bf16.mxu0 %v9179_v28  ;;  %v9263_v28 = vld [vmem:[#allocation2 + $0x454] ss:$8 sps:$4 sm:$0xff]  }
 0x1b4   :  { %2690 = vmatpush1.bf16.msra.mxu0 %v9177_v29  ;;  %v9261_v29 = vld [vmem:[#allocation2 + $0x450] ss:$8 sps:$4 sm:$0xff]  }
 0x1b5   :  { %2691 = vmatprep.subr.bf16.mxu0 %v9182_v30  ;;  %v9266_v30 = vld [vmem:[#allocation2 + $0x464] ss:$8 sps:$4 sm:$0xff]  }
 0x1b8   :  { %2692 = vmatpush1.bf16.msra.mxu0 %v9180_v31  ;;  %v9264_v31 = vld [vmem:[#allocation2 + $0x460] ss:$8 sps:$4 sm:$0xff]  }
 0x1b9   :  { %2693 = vmatprep.subr.bf16.mxu0 %v9185_v32  ;;  %v9269_v32 = vld [vmem:[#allocation2 + $0x474] ss:$8 sps:$4 sm:$0xff]  }
 0x1bc   :  { %2694 = vmatpush1.bf16.msra.mxu0 %v9183_v33  ;;  %v9267_v33 = vld [vmem:[#allocation2 + $0x470] ss:$8 sps:$4 sm:$0xff]  }
 0x1bd   :  { %2695 = vmatprep.subr.bf16.mxu0 %v9188_v34  ;;  %v9272_v34 = vld [vmem:[#allocation2 + $0x484] ss:$8 sps:$4 sm:$0xff]  }
 0x1c0   :  { %2696 = vmatpush1.bf16.msra.mxu0 %v9186_v35  ;;  %v9270_v35 = vld [vmem:[#allocation2 + $0x480] ss:$8 sps:$4 sm:$0xff]  }
 0x1c1   :  { %2697 = vmatprep.subr.bf16.mxu0 %v9191_v36  ;;  %v9275_v36 = vld [vmem:[#allocation2 + $0x494] ss:$8 sps:$4 sm:$0xff]  }
 0x1c4   :  { %2698 = vmatpush1.bf16.msra.mxu0 %v9189_v37  ;;  %v9273_v37 = vld [vmem:[#allocation2 + $0x490] ss:$8 sps:$4 sm:$0xff]  }
 0x1c5   :  { %2699 = vmatprep.subr.bf16.mxu0 %v9194_v38  ;;  %v9278_v38 = vld [vmem:[#allocation2 + $0x4a4] ss:$8 sps:$4 sm:$0xff]  }
 0x1c8   :  { %2700 = vmatpush1.bf16.msra.mxu0 %v9192_v39  ;;  %v9276_v39 = vld [vmem:[#allocation2 + $0x4a0] ss:$8 sps:$4 sm:$0xff]  }
 0x1c9   :  { %2701 = vmatprep.subr.bf16.mxu0 %v9197_v40  ;;  %v9281_v40 = vld [vmem:[#allocation2 + $0x4b4] ss:$8 sps:$4 sm:$0xff]  }
 0x1cc   :  { %2702 = vmatpush1.bf16.msra.mxu0 %v9195_v41  ;;  %v9279_v41 = vld [vmem:[#allocation2 + $0x4b0] ss:$8 sps:$4 sm:$0xff]  }
 0x1cd   :  { %2712 = vmatprep.subr.bf16.mxu0 %v9200_v42  ;;  %v9284_v42 = vld [vmem:[#allocation2 + $0x4c4] ss:$8 sps:$4 sm:$0xff]  }
 0x1cf   :  { %2704 = vmatmul.mubr.bf16.vlgmr.msra.gmra.mrb[0].mxu0 %v265_v45  ;;  %v9285_v45 = vld [vmem:[#allocation2 + $0x4d0] ss:$8 sps:$4 sm:$0xff]  }
 0x1d0   :  { %2713 = vmatpush1.bf16.msra.mxu0 %v9198_v46  ;;  %2744 = vmatprep.mubr.bf16.mxu0 %v268_v47  ;;  %v9290_v46 = vld [vmem:[#allocation2 + $0x4e4] ss:$8 sps:$4 sm:$0xff]   ;;  %v9288_v47 = vld [vmem:[#allocation2 + $0x4e0] ss:$8 sps:$4 sm:$0xff]  }
 0x1d1   :  { %2714 = vmatprep.subr.bf16.mxu0 %v9203_v48  ;;  %v9293_v48 = vld [vmem:[#allocation2 + $0x4f4] ss:$8 sps:$4 sm:$0xff]  }
 0x1d4   :  { %2715 = vmatpush1.bf16.msra.mxu0 %v9201_v49  ;;  %v9291_v49 = vld [vmem:[#allocation2 + $0x4f0] ss:$8 sps:$4 sm:$0xff]  }
 0x1d5   :  { %2716 = vmatprep.subr.bf16.mxu0 %v9206_v50  ;;  %v9296_v50 = vld [vmem:[#allocation2 + $0x504] ss:$8 sps:$4 sm:$0xff]  }
 0x1d8   :  { %2717 = vmatpush1.bf16.msra.mxu0 %v9204_v51  ;;  %v245_v51 = vld [vmem:[%s11037_s5 + $0x40] sm:$0xff] }
 0x1d9   :  { %2718 = vmatprep.subr.bf16.mxu0 %v9209_v52  ;;  %v248_v52 = vld [vmem:[%s11037_s5 + $0x58] sm:$0xff] }
 0x1dc   :  { %2719 = vmatpush1.bf16.msra.mxu0 %v9207_v53  ;;  %v269_v53 = vpack.c.bf16 %v245_v51, %v245_v51  ;;  %v9378_v51 = vld [vmem:[#allocation2 + $0x6c0] ss:$8 sps:$4 sm:$0xff]  }
 0x1dd   :  { %2720 = vmatprep.subr.bf16.mxu0 %v9212_v54  ;;  %v9294_v54 = vld [vmem:[#allocation2 + $0x500] ss:$8 sps:$4 sm:$0xff]  }
 0x1e0   :  { %2721 = vmatpush1.bf16.msra.mxu0 %v9210_v55  ;;  %v272_v55 = vpack.c.bf16 %v248_v52, %v248_v52  ;;  %v9383_v52 = vld [vmem:[#allocation2 + $0x6d4] ss:$8 sps:$4 sm:$0xff]  }
 0x1e1   :  { %2722 = vmatprep.subr.bf16.mxu0 %v9215_v56  ;;  %v9299_v56 = vld [vmem:[#allocation2 + $0x514] ss:$8 sps:$4 sm:$0xff]  }
 0x1e4   :  { %2723 = vmatpush1.bf16.msra.mxu0 %v9213_v57  ;;  %v9297_v57 = vld [vmem:[#allocation2 + $0x510] ss:$8 sps:$4 sm:$0xff]  }
 0x1e5   :  { %2724 = vmatprep.subr.bf16.mxu0 %v9218_v58  ;;  %v9302_v58 = vld [vmem:[#allocation2 + $0x524] ss:$8 sps:$4 sm:$0xff]  }
 0x1e8   :  { %2725 = vmatpush1.bf16.msra.mxu0 %v9216_v59  ;;  %v9300_v59 = vld [vmem:[#allocation2 + $0x520] ss:$8 sps:$4 sm:$0xff]  }
 0x1e9   :  { %2726 = vmatprep.subr.bf16.mxu0 %v9221_v60  ;;  %v9305_v60 = vld [vmem:[#allocation2 + $0x534] ss:$8 sps:$4 sm:$0xff]  }
 0x1ec   :  { %2727 = vmatpush1.bf16.msra.mxu0 %v9219_v61  ;;  %v9303_v61 = vld [vmem:[#allocation2 + $0x530] ss:$8 sps:$4 sm:$0xff]  }
 0x1ed   :  { %2728 = vmatprep.subr.bf16.mxu0 %v9224_v62  ;;  %v9308_v62 = vld [vmem:[#allocation2 + $0x544] ss:$8 sps:$4 sm:$0xff]  }
 0x1f0   :  { %2729 = vmatpush1.bf16.msra.mxu0 %v9222_v63  ;;  %v9306_v63 = vld [vmem:[#allocation2 + $0x540] ss:$8 sps:$4 sm:$0xff]  }
 0x1f1   :  { %2730 = vmatprep.subr.bf16.mxu0 %v9227_v0  ;;  %v9311_v0 = vld [vmem:[#allocation2 + $0x554] ss:$8 sps:$4 sm:$0xff]  }
 0x1f4   :  { %2731 = vmatpush1.bf16.msra.mxu0 %v9225_v1  ;;  %v9309_v1 = vld [vmem:[#allocation2 + $0x550] ss:$8 sps:$4 sm:$0xff]  }
 0x1f5   :  { %2732 = vmatprep.subr.bf16.mxu0 %v9230_v2  ;;  %v9314_v2 = vld [vmem:[#allocation2 + $0x564] ss:$8 sps:$4 sm:$0xff]  }
 0x1f8   :  { %2733 = vmatpush1.bf16.msra.mxu0 %v9228_v3  ;;  %v9312_v3 = vld [vmem:[#allocation2 + $0x560] ss:$8 sps:$4 sm:$0xff]  }
 0x1f9   :  { %2734 = vmatprep.subr.bf16.mxu0 %v9233_v4  ;;  %v9317_v4 = vld [vmem:[#allocation2 + $0x574] ss:$8 sps:$4 sm:$0xff]  }
 0x1fc   :  { %2735 = vmatpush1.bf16.msra.mxu0 %v9231_v5  ;;  %v9315_v5 = vld [vmem:[#allocation2 + $0x570] ss:$8 sps:$4 sm:$0xff]  }
 0x1fd   :  { %2736 = vmatprep.subr.bf16.mxu0 %v9236_v6  ;;  %v9320_v6 = vld [vmem:[#allocation2 + $0x584] ss:$8 sps:$4 sm:$0xff]  }
 0x200   :  { %2737 = vmatpush1.bf16.msra.mxu0 %v9234_v7  ;;  %v9318_v7 = vld [vmem:[#allocation2 + $0x580] ss:$8 sps:$4 sm:$0xff]  }
 0x201   :  { %2738 = vmatprep.subr.bf16.mxu0 %v9239_v8  ;;  %v9323_v8 = vld [vmem:[#allocation2 + $0x594] ss:$8 sps:$4 sm:$0xff]  }
 0x204   :  { %2739 = vmatpush1.bf16.msra.mxu0 %v9237_v9  ;;  %v9321_v9 = vld [vmem:[#allocation2 + $0x590] ss:$8 sps:$4 sm:$0xff]  }
 0x205   :  { %2740 = vmatprep.subr.bf16.mxu0 %v9242_v10  ;;  %v9326_v10 = vld [vmem:[#allocation2 + $0x5a4] ss:$8 sps:$4 sm:$0xff]  }
 0x208   :  { %2741 = vmatpush1.bf16.msra.mxu0 %v9240_v11  ;;  %v9324_v11 = vld [vmem:[#allocation2 + $0x5a0] ss:$8 sps:$4 sm:$0xff]  }
 0x209   :  { %2742 = vmatprep.subr.bf16.mxu0 %v9245_v12  ;;  %v9329_v12 = vld [vmem:[#allocation2 + $0x5b4] ss:$8 sps:$4 sm:$0xff]  }
 0x20c   :  { %2743 = vmatpush1.bf16.msra.mxu0 %v9243_v13  ;;  %v9327_v13 = vld [vmem:[#allocation2 + $0x5b0] ss:$8 sps:$4 sm:$0xff]  }
 0x20d   :  { %2753 = vmatprep.subr.bf16.mxu0 %v9248_v14  ;;  %v9332_v14 = vld [vmem:[#allocation2 + $0x5c4] ss:$8 sps:$4 sm:$0xff]  }
 0x20f   :  { %2745 = vmatmul.mubr.bf16.vlgmr.msra.gmra.mrb[0].mxu0 %v267_v17  ;;  %v9333_v17 = vld [vmem:[#allocation2 + $0x5d0] ss:$8 sps:$4 sm:$0xff]  }
 0x210   :  { %2754 = vmatpush1.bf16.msra.mxu0 %v9246_v18  ;;  %2785 = vmatprep.mubr.bf16.mxu0 %v270_v19  ;;  %v9338_v18 = vld [vmem:[#allocation2 + $0x5e4] ss:$8 sps:$4 sm:$0xff]   ;;  %v9336_v19 = vld [vmem:[#allocation2 + $0x5e0] ss:$8 sps:$4 sm:$0xff]  }
 0x211   :  { %2755 = vmatprep.subr.bf16.mxu0 %v9251_v20  ;;  %v9341_v20 = vld [vmem:[#allocation2 + $0x5f4] ss:$8 sps:$4 sm:$0xff]  }
 0x214   :  { %2756 = vmatpush1.bf16.msra.mxu0 %v9249_v21  ;;  %v9339_v21 = vld [vmem:[#allocation2 + $0x5f0] ss:$8 sps:$4 sm:$0xff]  }
 0x215   :  { %2757 = vmatprep.subr.bf16.mxu0 %v9254_v22  ;;  %v247_v22 = vld [vmem:[%s11037_s5 + $0x50] sm:$0xff] }
 0x218   :  { %2758 = vmatpush1.bf16.msra.mxu0 %v9252_v23  ;;  %v9344_v23 = vld [vmem:[#allocation2 + $0x604] ss:$8 sps:$4 sm:$0xff]  }
 0x219   :  { %2759 = vmatprep.subr.bf16.mxu0 %v9257_v24  ;;  %v250_v24 = vld [vmem:[%s11037_s5 + $0x68] sm:$0xff] }
 0x21c   :  { %2760 = vmatpush1.bf16.msra.mxu0 %v9255_v25  ;;  %v271_v25 = vpack.c.bf16 %v247_v22, %v247_v22  ;;  %v9428_v22 = vld [vmem:[#allocation2 + $0x7c4] ss:$8 sps:$4 sm:$0xff]  }
 0x21d   :  { %2761 = vmatprep.subr.bf16.mxu0 %v9260_v26  ;;  %v9342_v26 = vld [vmem:[#allocation2 + $0x600] ss:$8 sps:$4 sm:$0xff]  }
 0x220   :  { %2762 = vmatpush1.bf16.msra.mxu0 %v9258_v27  ;;  %v274_v27 = vpack.c.bf16 %v250_v24, %v250_v24  ;;  %v9431_v24 = vld [vmem:[#allocation2 + $0x7d4] ss:$8 sps:$4 sm:$0xff]  }
 0x221   :  { %2763 = vmatprep.subr.bf16.mxu0 %v9263_v28  ;;  %v9347_v28 = vld [vmem:[#allocation2 + $0x614] ss:$8 sps:$4 sm:$0xff]  }
 0x224   :  { %2764 = vmatpush1.bf16.msra.mxu0 %v9261_v29  ;;  %v9345_v29 = vld [vmem:[#allocation2 + $0x610] ss:$8 sps:$4 sm:$0xff]  }
 0x225   :  { %2765 = vmatprep.subr.bf16.mxu0 %v9266_v30  ;;  %v9350_v30 = vld [vmem:[#allocation2 + $0x624] ss:$8 sps:$4 sm:$0xff]  }
 0x228   :  { %2766 = vmatpush1.bf16.msra.mxu0 %v9264_v31  ;;  %v9348_v31 = vld [vmem:[#allocation2 + $0x620] ss:$8 sps:$4 sm:$0xff]  }
 0x229   :  { %2767 = vmatprep.subr.bf16.mxu0 %v9269_v32  ;;  %v9353_v32 = vld [vmem:[#allocation2 + $0x634] ss:$8 sps:$4 sm:$0xff]  }
 0x22c   :  { %2768 = vmatpush1.bf16.msra.mxu0 %v9267_v33  ;;  %v9351_v33 = vld [vmem:[#allocation2 + $0x630] ss:$8 sps:$4 sm:$0xff]  }
 0x22d   :  { %2769 = vmatprep.subr.bf16.mxu0 %v9272_v34  ;;  %v9356_v34 = vld [vmem:[#allocation2 + $0x644] ss:$8 sps:$4 sm:$0xff]  }
 0x230   :  { %2770 = vmatpush1.bf16.msra.mxu0 %v9270_v35  ;;  %v9354_v35 = vld [vmem:[#allocation2 + $0x640] ss:$8 sps:$4 sm:$0xff]  }
 0x231   :  { %2771 = vmatprep.subr.bf16.mxu0 %v9275_v36  ;;  %v9359_v36 = vld [vmem:[#allocation2 + $0x654] ss:$8 sps:$4 sm:$0xff]  }
 0x234   :  { %2772 = vmatpush1.bf16.msra.mxu0 %v9273_v37  ;;  %v9357_v37 = vld [vmem:[#allocation2 + $0x650] ss:$8 sps:$4 sm:$0xff]  }
 0x235   :  { %2773 = vmatprep.subr.bf16.mxu0 %v9278_v38  ;;  %v9362_v38 = vld [vmem:[#allocation2 + $0x664] ss:$8 sps:$4 sm:$0xff]  }
 0x238   :  { %2774 = vmatpush1.bf16.msra.mxu0 %v9276_v39  ;;  %v9360_v39 = vld [vmem:[#allocation2 + $0x660] ss:$8 sps:$4 sm:$0xff]  }
 0x239   :  { %2775 = vmatprep.subr.bf16.mxu0 %v9281_v40  ;;  %v9365_v40 = vld [vmem:[#allocation2 + $0x674] ss:$8 sps:$4 sm:$0xff]  }
 0x23c   :  { %2776 = vmatpush1.bf16.msra.mxu0 %v9279_v41  ;;  %v9363_v41 = vld [vmem:[#allocation2 + $0x670] ss:$8 sps:$4 sm:$0xff]  }
 0x23d   :  { %2777 = vmatprep.subr.bf16.mxu0 %v9284_v42  ;;  %v9368_v42 = vld [vmem:[#allocation2 + $0x684] ss:$8 sps:$4 sm:$0xff]  }
 0x240   :  { %2778 = vmatpush1.bf16.msra.mxu0 %v9282_v43  ;;  %v9366_v43 = vld [vmem:[#allocation2 + $0x680] ss:$8 sps:$4 sm:$0xff]  }
 0x241   :  { %2779 = vmatprep.subr.bf16.mxu0 %v9287_v44  ;;  %v9371_v44 = vld [vmem:[#allocation2 + $0x694] ss:$8 sps:$4 sm:$0xff]  }
 0x244   :  { %2780 = vmatpush1.bf16.msra.mxu0 %v9285_v45  ;;  %v9369_v45 = vld [vmem:[#allocation2 + $0x690] ss:$8 sps:$4 sm:$0xff]  }
 0x245   :  { %2781 = vmatprep.subr.bf16.mxu0 %v9290_v46  ;;  %v9374_v46 = vld [vmem:[#allocation2 + $0x6a4] ss:$8 sps:$4 sm:$0xff]  }
 0x248   :  { %2782 = vmatpush1.bf16.msra.mxu0 %v9288_v47  ;;  %v9372_v47 = vld [vmem:[#allocation2 + $0x6a0] ss:$8 sps:$4 sm:$0xff]  }
 0x249   :  { %2783 = vmatprep.subr.bf16.mxu0 %v9293_v48  ;;  %v9377_v48 = vld [vmem:[#allocation2 + $0x6b4] ss:$8 sps:$4 sm:$0xff]  }
 0x24c   :  { %2784 = vmatpush1.bf16.msra.mxu0 %v9291_v49  ;;  %v9375_v49 = vld [vmem:[#allocation2 + $0x6b0] ss:$8 sps:$4 sm:$0xff]  }
 0x24d   :  { %2794 = vmatprep.subr.bf16.mxu0 %v9296_v50  ;;  %v9380_v50 = vld [vmem:[#allocation2 + $0x6c4] ss:$8 sps:$4 sm:$0xff]  }
 0x24f   :  { %2786 = vmatmul.mubr.bf16.vlgmr.msra.gmra.mrb[0].mxu0 %v269_v53  ;;  %v9381_v53 = vld [vmem:[#allocation2 + $0x6d0] ss:$8 sps:$4 sm:$0xff]  }
 0x250   :  { %2795 = vmatpush1.bf16.msra.mxu0 %v9294_v54  ;;  %2826 = vmatprep.mubr.bf16.mxu0 %v272_v55  ;;  %v9386_v54 = vld [vmem:[#allocation2 + $0x6e4] ss:$8 sps:$4 sm:$0xff]   ;;  %v9384_v55 = vld [vmem:[#allocation2 + $0x6e0] ss:$8 sps:$4 sm:$0xff]  }
 0x251   :  { %2796 = vmatprep.subr.bf16.mxu0 %v9299_v56  ;;  %v9389_v56 = vld [vmem:[#allocation2 + $0x6f4] ss:$8 sps:$4 sm:$0xff]  }
 0x254   :  { %2797 = vmatpush1.bf16.msra.mxu0 %v9297_v57  ;;  %v9387_v57 = vld [vmem:[#allocation2 + $0x6f0] ss:$8 sps:$4 sm:$0xff]  }
 0x255   :  { %2798 = vmatprep.subr.bf16.mxu0 %v9302_v58  ;;  %v249_v58 = vld [vmem:[%s11037_s5 + $0x60] sm:$0xff] }
 0x258   :  { %2799 = vmatpush1.bf16.msra.mxu0 %v9300_v59  ;;  %v9392_v59 = vld [vmem:[#allocation2 + $0x704] ss:$8 sps:$4 sm:$0xff]  }
 0x259   :  { %2800 = vmatprep.subr.bf16.mxu0 %v9305_v60  ;;  %v252_v60 = vld [vmem:[%s11037_s5 + $0x78] sm:$0xff] }
 0x25c   :  { %2801 = vmatpush1.bf16.msra.mxu0 %v9303_v61  ;;  %v273_v61 = vpack.c.bf16 %v249_v58, %v249_v58  ;;  %v9476_v58 = vld [vmem:[#allocation2 + $0x8c4] ss:$8 sps:$4 sm:$0xff]  }
 0x25d   :  { %2802 = vmatprep.subr.bf16.mxu0 %v9308_v62  ;;  %v9390_v62 = vld [vmem:[#allocation2 + $0x700] ss:$8 sps:$4 sm:$0xff]  }
 0x260   :  { %2803 = vmatpush1.bf16.msra.mxu0 %v9306_v63  ;;  %v276_v63 = vpack.c.bf16 %v252_v60, %v252_v60  ;;  %v9479_v60 = vld [vmem:[#allocation2 + $0x8d4] ss:$8 sps:$4 sm:$0xff]  }
 0x261   :  { %2804 = vmatprep.subr.bf16.mxu0 %v9311_v0  ;;  %v9395_v0 = vld [vmem:[#allocation2 + $0x714] ss:$8 sps:$4 sm:$0xff]  }
 0x264   :  { %2805 = vmatpush1.bf16.msra.mxu0 %v9309_v1  ;;  %v9393_v1 = vld [vmem:[#allocation2 + $0x710] ss:$8 sps:$4 sm:$0xff]  }
 0x265   :  { %2806 = vmatprep.subr.bf16.mxu0 %v9314_v2  ;;  %v9398_v2 = vld [vmem:[#allocation2 + $0x724] ss:$8 sps:$4 sm:$0xff]  }
 0x268   :  { %2807 = vmatpush1.bf16.msra.mxu0 %v9312_v3  ;;  %v9396_v3 = vld [vmem:[#allocation2 + $0x720] ss:$8 sps:$4 sm:$0xff]  }
 0x269   :  { %2808 = vmatprep.subr.bf16.mxu0 %v9317_v4  ;;  %v9401_v4 = vld [vmem:[#allocation2 + $0x734] ss:$8 sps:$4 sm:$0xff]  }
 0x26c   :  { %2809 = vmatpush1.bf16.msra.mxu0 %v9315_v5  ;;  %v9399_v5 = vld [vmem:[#allocation2 + $0x730] ss:$8 sps:$4 sm:$0xff]  }
 0x26d   :  { %2810 = vmatprep.subr.bf16.mxu0 %v9320_v6  ;;  %v9404_v6 = vld [vmem:[#allocation2 + $0x744] ss:$8 sps:$4 sm:$0xff]  }
 0x270   :  { %2811 = vmatpush1.bf16.msra.mxu0 %v9318_v7  ;;  %v9402_v7 = vld [vmem:[#allocation2 + $0x740] ss:$8 sps:$4 sm:$0xff]  }
 0x271   :  { %2812 = vmatprep.subr.bf16.mxu0 %v9323_v8  ;;  %v9407_v8 = vld [vmem:[#allocation2 + $0x754] ss:$8 sps:$4 sm:$0xff]  }
 0x274   :  { %2813 = vmatpush1.bf16.msra.mxu0 %v9321_v9  ;;  %v9405_v9 = vld [vmem:[#allocation2 + $0x750] ss:$8 sps:$4 sm:$0xff]  }
 0x275   :  { %2814 = vmatprep.subr.bf16.mxu0 %v9326_v10  ;;  %v9410_v10 = vld [vmem:[#allocation2 + $0x764] ss:$8 sps:$4 sm:$0xff]  }
 0x278   :  { %2815 = vmatpush1.bf16.msra.mxu0 %v9324_v11  ;;  %v9408_v11 = vld [vmem:[#allocation2 + $0x760] ss:$8 sps:$4 sm:$0xff]  }
 0x279   :  { %2816 = vmatprep.subr.bf16.mxu0 %v9329_v12  ;;  %v9413_v12 = vld [vmem:[#allocation2 + $0x774] ss:$8 sps:$4 sm:$0xff]  }
 0x27c   :  { %2817 = vmatpush1.bf16.msra.mxu0 %v9327_v13  ;;  %v9411_v13 = vld [vmem:[#allocation2 + $0x770] ss:$8 sps:$4 sm:$0xff]  }
 0x27d   :  { %2818 = vmatprep.subr.bf16.mxu0 %v9332_v14  ;;  %v9416_v14 = vld [vmem:[#allocation2 + $0x784] ss:$8 sps:$4 sm:$0xff]  }
 0x280   :  { %2819 = vmatpush1.bf16.msra.mxu0 %v9330_v15  ;;  %v9414_v15 = vld [vmem:[#allocation2 + $0x780] ss:$8 sps:$4 sm:$0xff]  }
 0x281   :  { %2820 = vmatprep.subr.bf16.mxu0 %v9335_v16  ;;  %v9419_v16 = vld [vmem:[#allocation2 + $0x794] ss:$8 sps:$4 sm:$0xff]  }
 0x284   :  { %2821 = vmatpush1.bf16.msra.mxu0 %v9333_v17  ;;  %v9417_v17 = vld [vmem:[#allocation2 + $0x790] ss:$8 sps:$4 sm:$0xff]  }
 0x285   :  { %2822 = vmatprep.subr.bf16.mxu0 %v9338_v18  ;;  %v9422_v18 = vld [vmem:[#allocation2 + $0x7a4] ss:$8 sps:$4 sm:$0xff]  }
 0x288   :  { %2823 = vmatpush1.bf16.msra.mxu0 %v9336_v19  ;;  %v9420_v19 = vld [vmem:[#allocation2 + $0x7a0] ss:$8 sps:$4 sm:$0xff]  }
 0x289   :  { %2824 = vmatprep.subr.bf16.mxu0 %v9341_v20  ;;  %v9425_v20 = vld [vmem:[#allocation2 + $0x7b4] ss:$8 sps:$4 sm:$0xff]  }
 0x28c   :  { %2825 = vmatpush1.bf16.msra.mxu0 %v9339_v21  ;;  %v9423_v21 = vld [vmem:[#allocation2 + $0x7b0] ss:$8 sps:$4 sm:$0xff]  }
 0x28d   :  { %2835 = vmatprep.subr.bf16.mxu0 %v9344_v23  ;;  %v9426_v23 = vld [vmem:[#allocation2 + $0x7c0] ss:$8 sps:$4 sm:$0xff]  }
 0x28f   :  { %2827 = vmatmul.mubr.bf16.vlgmr.msra.gmra.mrb[0].mxu0 %v271_v25  ;;  %v9429_v25 = vld [vmem:[#allocation2 + $0x7d0] ss:$8 sps:$4 sm:$0xff]  }
 0x290   :  { %2836 = vmatpush1.bf16.msra.mxu0 %v9342_v26  ;;  %2867 = vmatprep.mubr.bf16.mxu0 %v274_v27  ;;  %v9434_v26 = vld [vmem:[#allocation2 + $0x7e4] ss:$8 sps:$4 sm:$0xff]   ;;  %v9432_v27 = vld [vmem:[#allocation2 + $0x7e0] ss:$8 sps:$4 sm:$0xff]  }
 0x291   :  { %2837 = vmatprep.subr.bf16.mxu0 %v9347_v28  ;;  %v9437_v28 = vld [vmem:[#allocation2 + $0x7f4] ss:$8 sps:$4 sm:$0xff]  }
 0x294   :  { %2838 = vmatpush1.bf16.msra.mxu0 %v9345_v29  ;;  %v9435_v29 = vld [vmem:[#allocation2 + $0x7f0] ss:$8 sps:$4 sm:$0xff]  }
 0x295   :  { %2839 = vmatprep.subr.bf16.mxu0 %v9350_v30  ;;  %v251_v30 = vld [vmem:[%s11037_s5 + $0x70] sm:$0xff] }
 0x298   :  { %2840 = vmatpush1.bf16.msra.mxu0 %v9348_v31  ;;  %v9440_v31 = vld [vmem:[#allocation2 + $0x804] ss:$8 sps:$4 sm:$0xff]  }
 0x299   :  { %2841 = vmatprep.subr.bf16.mxu0 %v9353_v32  ;;  %v254_v32 = vld [vmem:[%s11037_s5 + $0x88] sm:$0xff] }
 0x29c   :  { %2842 = vmatpush1.bf16.msra.mxu0 %v9351_v33  ;;  %v275_v33 = vpack.c.bf16 %v251_v30, %v251_v30  ;;  %v9524_v30 = vld [vmem:[#allocation2 + $0x9c4] ss:$8 sps:$4 sm:$0xff]  }
 0x29d   :  { %2843 = vmatprep.subr.bf16.mxu0 %v9356_v34  ;;  %v9438_v34 = vld [vmem:[#allocation2 + $0x800] ss:$8 sps:$4 sm:$0xff]  }
 0x2a0   :  { %2844 = vmatpush1.bf16.msra.mxu0 %v9354_v35  ;;  %v278_v35 = vpack.c.bf16 %v254_v32, %v254_v32  ;;  %v9527_v32 = vld [vmem:[#allocation2 + $0x9d4] ss:$8 sps:$4 sm:$0xff]  }
 0x2a1   :  { %2845 = vmatprep.subr.bf16.mxu0 %v9359_v36  ;;  %v9443_v36 = vld [vmem:[#allocation2 + $0x814] ss:$8 sps:$4 sm:$0xff]  }
 0x2a4   :  { %2846 = vmatpush1.bf16.msra.mxu0 %v9357_v37  ;;  %v9441_v37 = vld [vmem:[#allocation2 + $0x810] ss:$8 sps:$4 sm:$0xff]  }
 0x2a5   :  { %2847 = vmatprep.subr.bf16.mxu0 %v9362_v38  ;;  %v9446_v38 = vld [vmem:[#allocation2 + $0x824] ss:$8 sps:$4 sm:$0xff]  }
 0x2a8   :  { %2848 = vmatpush1.bf16.msra.mxu0 %v9360_v39  ;;  %v9444_v39 = vld [vmem:[#allocation2 + $0x820] ss:$8 sps:$4 sm:$0xff]  }
 0x2a9   :  { %2849 = vmatprep.subr.bf16.mxu0 %v9365_v40  ;;  %v9449_v40 = vld [vmem:[#allocation2 + $0x834] ss:$8 sps:$4 sm:$0xff]  }
 0x2ac   :  { %2850 = vmatpush1.bf16.msra.mxu0 %v9363_v41  ;;  %v9447_v41 = vld [vmem:[#allocation2 + $0x830] ss:$8 sps:$4 sm:$0xff]  }
 0x2ad   :  { %2851 = vmatprep.subr.bf16.mxu0 %v9368_v42  ;;  %v9452_v42 = vld [vmem:[#allocation2 + $0x844] ss:$8 sps:$4 sm:$0xff]  }
 0x2b0   :  { %2852 = vmatpush1.bf16.msra.mxu0 %v9366_v43  ;;  %v9450_v43 = vld [vmem:[#allocation2 + $0x840] ss:$8 sps:$4 sm:$0xff]  }
 0x2b1   :  { %2853 = vmatprep.subr.bf16.mxu0 %v9371_v44  ;;  %v9455_v44 = vld [vmem:[#allocation2 + $0x854] ss:$8 sps:$4 sm:$0xff]  }
 0x2b4   :  { %2854 = vmatpush1.bf16.msra.mxu0 %v9369_v45  ;;  %v9453_v45 = vld [vmem:[#allocation2 + $0x850] ss:$8 sps:$4 sm:$0xff]  }
 0x2b5   :  { %2855 = vmatprep.subr.bf16.mxu0 %v9374_v46  ;;  %v9458_v46 = vld [vmem:[#allocation2 + $0x864] ss:$8 sps:$4 sm:$0xff]  }
 0x2b8   :  { %2856 = vmatpush1.bf16.msra.mxu0 %v9372_v47  ;;  %v9456_v47 = vld [vmem:[#allocation2 + $0x860] ss:$8 sps:$4 sm:$0xff]  }
 0x2b9   :  { %2857 = vmatprep.subr.bf16.mxu0 %v9377_v48  ;;  %v9461_v48 = vld [vmem:[#allocation2 + $0x874] ss:$8 sps:$4 sm:$0xff]  }
 0x2bc   :  { %2858 = vmatpush1.bf16.msra.mxu0 %v9375_v49  ;;  %v9459_v49 = vld [vmem:[#allocation2 + $0x870] ss:$8 sps:$4 sm:$0xff]  }
 0x2bd   :  { %2859 = vmatprep.subr.bf16.mxu0 %v9380_v50  ;;  %v9464_v50 = vld [vmem:[#allocation2 + $0x884] ss:$8 sps:$4 sm:$0xff]  }
 0x2c0   :  { %2860 = vmatpush1.bf16.msra.mxu0 %v9378_v51  ;;  %v9462_v51 = vld [vmem:[#allocation2 + $0x880] ss:$8 sps:$4 sm:$0xff]  }
 0x2c1   :  { %2861 = vmatprep.subr.bf16.mxu0 %v9383_v52  ;;  %v9467_v52 = vld [vmem:[#allocation2 + $0x894] ss:$8 sps:$4 sm:$0xff]  }
 0x2c4   :  { %2862 = vmatpush1.bf16.msra.mxu0 %v9381_v53  ;;  %v9465_v53 = vld [vmem:[#allocation2 + $0x890] ss:$8 sps:$4 sm:$0xff]  }
 0x2c5   :  { %2863 = vmatprep.subr.bf16.mxu0 %v9386_v54  ;;  %v9470_v54 = vld [vmem:[#allocation2 + $0x8a4] ss:$8 sps:$4 sm:$0xff]  }
 0x2c8   :  { %2864 = vmatpush1.bf16.msra.mxu0 %v9384_v55  ;;  %v9468_v55 = vld [vmem:[#allocation2 + $0x8a0] ss:$8 sps:$4 sm:$0xff]  }
 0x2c9   :  { %2865 = vmatprep.subr.bf16.mxu0 %v9389_v56  ;;  %v9473_v56 = vld [vmem:[#allocation2 + $0x8b4] ss:$8 sps:$4 sm:$0xff]  }
 0x2cc   :  { %2866 = vmatpush1.bf16.msra.mxu0 %v9387_v57  ;;  %v9471_v57 = vld [vmem:[#allocation2 + $0x8b0] ss:$8 sps:$4 sm:$0xff]  }
 0x2cd   :  { %2876 = vmatprep.subr.bf16.mxu0 %v9392_v59  ;;  %v9474_v59 = vld [vmem:[#allocation2 + $0x8c0] ss:$8 sps:$4 sm:$0xff]  }
 0x2cf   :  { %2868 = vmatmul.mubr.bf16.vlgmr.msra.gmra.mrb[0].mxu0 %v273_v61  ;;  %v9477_v61 = vld [vmem:[#allocation2 + $0x8d0] ss:$8 sps:$4 sm:$0xff]  }
 0x2d0   :  { %2877 = vmatpush1.bf16.msra.mxu0 %v9390_v62  ;;  %2908 = vmatprep.mubr.bf16.mxu0 %v276_v63  ;;  %v9482_v62 = vld [vmem:[#allocation2 + $0x8e4] ss:$8 sps:$4 sm:$0xff]   ;;  %v9480_v63 = vld [vmem:[#allocation2 + $0x8e0] ss:$8 sps:$4 sm:$0xff]  }
 0x2d1   :  { %2878 = vmatprep.subr.bf16.mxu0 %v9395_v0  ;;  %v9485_v0 = vld [vmem:[#allocation2 + $0x8f4] ss:$8 sps:$4 sm:$0xff]  }
 0x2d4   :  { %2879 = vmatpush1.bf16.msra.mxu0 %v9393_v1  ;;  %v9483_v1 = vld [vmem:[#allocation2 + $0x8f0] ss:$8 sps:$4 sm:$0xff]  }
 0x2d5   :  { %2880 = vmatprep.subr.bf16.mxu0 %v9398_v2  ;;  %v253_v2 = vld [vmem:[%s11037_s5 + $0x80] sm:$0xff] }
 0x2d8   :  { %2881 = vmatpush1.bf16.msra.mxu0 %v9396_v3  ;;  %v9488_v3 = vld [vmem:[#allocation2 + $0x904] ss:$8 sps:$4 sm:$0xff]  }
 0x2d9   :  { %2882 = vmatprep.subr.bf16.mxu0 %v9401_v4  ;;  %v256_v4 = vld [vmem:[%s11037_s5 + $0x98] sm:$0xff] }
 0x2dc   :  { %2883 = vmatpush1.bf16.msra.mxu0 %v9399_v5  ;;  %v277_v5 = vpack.c.bf16 %v253_v2, %v253_v2  ;;  %v9647_v2 = vld [vmem:[#allocation7 + $0xa0] ss:$16 sps:$4 sm:$0xff]  }
 0x2dd   :  { %2884 = vmatprep.subr.bf16.mxu0 %v9404_v6  ;;  %v9486_v6 = vld [vmem:[#allocation2 + $0x900] ss:$8 sps:$4 sm:$0xff]  }
 0x2e0   :  { %2885 = vmatpush1.bf16.msra.mxu0 %v9402_v7  ;;  %v280_v7 = vpack.c.bf16 %v256_v4, %v256_v4  ;;  %v9552_v4 = vld [vmem:[#allocation2 + $0xa60] ss:$8 sps:$4 sm:$0xff]  }
 0x2e1   :  { %2886 = vmatprep.subr.bf16.mxu0 %v9407_v8  ;;  %v9491_v8 = vld [vmem:[#allocation2 + $0x914] ss:$8 sps:$4 sm:$0xff]  }
 0x2e4   :  { %2887 = vmatpush1.bf16.msra.mxu0 %v9405_v9  ;;  %v9489_v9 = vld [vmem:[#allocation2 + $0x910] ss:$8 sps:$4 sm:$0xff]  }
 0x2e5   :  { %2888 = vmatprep.subr.bf16.mxu0 %v9410_v10  ;;  %v9494_v10 = vld [vmem:[#allocation2 + $0x924] ss:$8 sps:$4 sm:$0xff]  }
 0x2e8   :  { %2889 = vmatpush1.bf16.msra.mxu0 %v9408_v11  ;;  %v9492_v11 = vld [vmem:[#allocation2 + $0x920] ss:$8 sps:$4 sm:$0xff]  }
 0x2e9   :  { %2890 = vmatprep.subr.bf16.mxu0 %v9413_v12  ;;  %v9497_v12 = vld [vmem:[#allocation2 + $0x934] ss:$8 sps:$4 sm:$0xff]  }
 0x2ec   :  { %2891 = vmatpush1.bf16.msra.mxu0 %v9411_v13  ;;  %v9495_v13 = vld [vmem:[#allocation2 + $0x930] ss:$8 sps:$4 sm:$0xff]  }
 0x2ed   :  { %2892 = vmatprep.subr.bf16.mxu0 %v9416_v14  ;;  %v9500_v14 = vld [vmem:[#allocation2 + $0x944] ss:$8 sps:$4 sm:$0xff]  }
 0x2f0   :  { %2893 = vmatpush1.bf16.msra.mxu0 %v9414_v15  ;;  %v9498_v15 = vld [vmem:[#allocation2 + $0x940] ss:$8 sps:$4 sm:$0xff]  }
 0x2f1   :  { %2894 = vmatprep.subr.bf16.mxu0 %v9419_v16  ;;  %v9503_v16 = vld [vmem:[#allocation2 + $0x954] ss:$8 sps:$4 sm:$0xff]  }
 0x2f4   :  { %2895 = vmatpush1.bf16.msra.mxu0 %v9417_v17  ;;  %v9501_v17 = vld [vmem:[#allocation2 + $0x950] ss:$8 sps:$4 sm:$0xff]  }
 0x2f5   :  { %2896 = vmatprep.subr.bf16.mxu0 %v9422_v18  ;;  %v9506_v18 = vld [vmem:[#allocation2 + $0x964] ss:$8 sps:$4 sm:$0xff]  }
 0x2f8   :  { %2897 = vmatpush1.bf16.msra.mxu0 %v9420_v19  ;;  %v9504_v19 = vld [vmem:[#allocation2 + $0x960] ss:$8 sps:$4 sm:$0xff]  }
 0x2f9   :  { %2898 = vmatprep.subr.bf16.mxu0 %v9425_v20  ;;  %v9509_v20 = vld [vmem:[#allocation2 + $0x974] ss:$8 sps:$4 sm:$0xff]  }
 0x2fc   :  { %2899 = vmatpush1.bf16.msra.mxu0 %v9423_v21  ;;  %v9507_v21 = vld [vmem:[#allocation2 + $0x970] ss:$8 sps:$4 sm:$0xff]  }
 0x2fd   :  { %2900 = vmatprep.subr.bf16.mxu0 %v9428_v22  ;;  %v9512_v22 = vld [vmem:[#allocation2 + $0x984] ss:$8 sps:$4 sm:$0xff]  }
 0x300   :  { %2901 = vmatpush1.bf16.msra.mxu0 %v9426_v23  ;;  %v9510_v23 = vld [vmem:[#allocation2 + $0x980] ss:$8 sps:$4 sm:$0xff]  }
 0x301   :  { %2902 = vmatprep.subr.bf16.mxu0 %v9431_v24  ;;  %v9515_v24 = vld [vmem:[#allocation2 + $0x994] ss:$8 sps:$4 sm:$0xff]  }
 0x304   :  { %2903 = vmatpush1.bf16.msra.mxu0 %v9429_v25  ;;  %v9513_v25 = vld [vmem:[#allocation2 + $0x990] ss:$8 sps:$4 sm:$0xff]  }
 0x305   :  { %2904 = vmatprep.subr.bf16.mxu0 %v9434_v26  ;;  %v9518_v26 = vld [vmem:[#allocation2 + $0x9a4] ss:$8 sps:$4 sm:$0xff]  }
 0x308   :  { %2905 = vmatpush1.bf16.msra.mxu0 %v9432_v27  ;;  %v9516_v27 = vld [vmem:[#allocation2 + $0x9a0] ss:$8 sps:$4 sm:$0xff]  }
 0x309   :  { %2906 = vmatprep.subr.bf16.mxu0 %v9437_v28  ;;  %v9521_v28 = vld [vmem:[#allocation2 + $0x9b4] ss:$8 sps:$4 sm:$0xff]  }
 0x30c   :  { %2907 = vmatpush1.bf16.msra.mxu0 %v9435_v29  ;;  %v9519_v29 = vld [vmem:[#allocation2 + $0x9b0] ss:$8 sps:$4 sm:$0xff]  }
 0x30d   :  { %2917 = vmatprep.subr.bf16.mxu0 %v9440_v31  ;;  %v9522_v31 = vld [vmem:[#allocation2 + $0x9c0] ss:$8 sps:$4 sm:$0xff]  }
 0x30f   :  { %2909 = vmatmul.mubr.bf16.vlgmr.msra.gmra.mrb[0].mxu0 %v275_v33  ;;  %v9525_v33 = vld [vmem:[#allocation2 + $0x9d0] ss:$8 sps:$4 sm:$0xff]  }
 0x310   :  { %2918 = vmatpush1.bf16.msra.mxu0 %v9438_v34  ;;  %2949 = vmatprep.mubr.bf16.mxu0 %v278_v35  ;;  %v9530_v34 = vld [vmem:[#allocation2 + $0x9e4] ss:$8 sps:$4 sm:$0xff]   ;;  %v9528_v35 = vld [vmem:[#allocation2 + $0x9e0] ss:$8 sps:$4 sm:$0xff]  }
 0x311   :  { %2919 = vmatprep.subr.bf16.mxu0 %v9443_v36  ;;  %v9533_v36 = vld [vmem:[#allocation2 + $0x9f4] ss:$8 sps:$4 sm:$0xff]  }
 0x314   :  { %2920 = vmatpush1.bf16.msra.mxu0 %v9441_v37  ;;  %v9531_v37 = vld [vmem:[#allocation2 + $0x9f0] ss:$8 sps:$4 sm:$0xff]  }
 0x315   :  { %2921 = vmatprep.subr.bf16.mxu0 %v9446_v38  ;;  %v255_v38 = vld [vmem:[%s11037_s5 + $0x90] sm:$0xff] }
 0x318   :  { %2922 = vmatpush1.bf16.msra.mxu0 %v9444_v39  ;;  %v9536_v39 = vld [vmem:[#allocation2 + $0xa04] ss:$8 sps:$4 sm:$0xff]  }
 0x319   :  { %2923 = vmatprep.subr.bf16.mxu0 %v9449_v40  ;;  %v258_v40 = vld [vmem:[%s11037_s5 + $0xa8] sm:$0xff] }
 0x31c   :  { %2924 = vmatpush1.bf16.msra.mxu0 %v9447_v41  ;;  %v279_v41 = vpack.c.bf16 %v255_v38, %v255_v38  ;;  %v257_v38 = vld [vmem:[%s11037_s5 + $0xa0] sm:$0xff] }
 0x31d   :  { %2925 = vmatprep.subr.bf16.mxu0 %v9452_v42  ;;  %v9534_v42 = vld [vmem:[#allocation2 + $0xa00] ss:$8 sps:$4 sm:$0xff]  }
 0x320   :  { %2926 = vmatpush1.bf16.msra.mxu0 %v9450_v43  ;;  %v282_v43 = vpack.c.bf16 %v258_v40, %v258_v40  ;;  %v260_v40 = vld [vmem:[%s11037_s5 + $0xb8] sm:$0xff] }
 0x321   :  { %2927 = vmatprep.subr.bf16.mxu0 %v9455_v44  ;;  %v9539_v44 = vld [vmem:[#allocation2 + $0xa14] ss:$8 sps:$4 sm:$0xff]  }
 0x324   :  { %2928 = vmatpush1.bf16.msra.mxu0 %v9453_v45  ;;  %v9630_v45 = vld [vmem:[#allocation7 + $0x4] ss:$16 sps:$4 sm:$0xff]  }
 0x325   :  { %2929 = vmatprep.subr.bf16.mxu0 %v9458_v46  ;;  %v9632_v46 = vld [vmem:[#allocation7] ss:$16 sps:$4 sm:$0xff]   ;;  %3497 = vmatprep.subr.bf16.mxu1 %v9630_v45  ;;  %v9585_v45 = vld [vmem:[#allocation2 + $0xb10] ss:$8 sps:$4 sm:$0xff]  }
 0x326   :  { %3498 = vmatpush1.bf16.msra.mxu1 %v9632_v46  ;;  %v9590_v46 = vld [vmem:[#allocation2 + $0xb24] ss:$8 sps:$4 sm:$0xff]  }
 0x328   :  { %2930 = vmatpush1.bf16.msra.mxu0 %v9456_v47  ;;  %v9633_v47 = vld [vmem:[#allocation7 + $0x24] ss:$16 sps:$4 sm:$0xff]  }
 0x329   :  { %2931 = vmatprep.subr.bf16.mxu0 %v9461_v48  ;;  %v9537_v48 = vld [vmem:[#allocation2 + $0xa10] ss:$8 sps:$4 sm:$0xff]   ;;  %3499 = vmatprep.subr.bf16.mxu1 %v9633_v47  ;;  %v9588_v47 = vld [vmem:[#allocation2 + $0xb20] ss:$8 sps:$4 sm:$0xff]  }
 0x32c   :  { %2932 = vmatpush1.bf16.msra.mxu0 %v9459_v49  ;;  %v9542_v49 = vld [vmem:[#allocation2 + $0xa24] ss:$8 sps:$4 sm:$0xff]  }
 0x32d   :  { %2933 = vmatprep.subr.bf16.mxu0 %v9464_v50  ;;  %v9635_v50 = vld [vmem:[#allocation7 + $0x20] ss:$16 sps:$4 sm:$0xff]  }
 0x32e   :  { %3500 = vmatpush1.bf16.msra.mxu1 %v9635_v50  ;;  %v9596_v50 = vld [vmem:[#allocation2 + $0xb44] ss:$8 sps:$4 sm:$0xff]  }
 0x330   :  { %2934 = vmatpush1.bf16.msra.mxu0 %v9462_v51  ;;  %v9636_v51 = vld [vmem:[#allocation7 + $0x44] ss:$16 sps:$4 sm:$0xff]  }
 0x331   :  { %2935 = vmatprep.subr.bf16.mxu0 %v9467_v52  ;;  %v9540_v52 = vld [vmem:[#allocation2 + $0xa20] ss:$8 sps:$4 sm:$0xff]   ;;  %3501 = vmatprep.subr.bf16.mxu1 %v9636_v51 }
 0x332   :  { %v9594_v51 = vld [vmem:[#allocation2 + $0xb40] ss:$8 sps:$4 sm:$0xff]  }
 0x334   :  { %2936 = vmatpush1.bf16.msra.mxu0 %v9465_v53  ;;  %v9545_v53 = vld [vmem:[#allocation2 + $0xa34] ss:$8 sps:$4 sm:$0xff]  }
 0x335   :  { %2937 = vmatprep.subr.bf16.mxu0 %v9470_v54  ;;  %v9638_v54 = vld [vmem:[#allocation7 + $0x40] ss:$16 sps:$4 sm:$0xff]  }
 0x336   :  { %3502 = vmatpush1.bf16.msra.mxu1 %v9638_v54  ;;  %v9602_v54 = vld [vmem:[#allocation2 + $0xb64] ss:$8 sps:$4 sm:$0xff]  }
 0x338   :  { %2938 = vmatpush1.bf16.msra.mxu0 %v9468_v55  ;;  %v9639_v55 = vld [vmem:[#allocation7 + $0x64] ss:$16 sps:$4 sm:$0xff]  }
 0x339   :  { %2939 = vmatprep.subr.bf16.mxu0 %v9473_v56  ;;  %v9543_v56 = vld [vmem:[#allocation2 + $0xa30] ss:$8 sps:$4 sm:$0xff]   ;;  %3503 = vmatprep.subr.bf16.mxu1 %v9639_v55  ;;  %v9600_v55 = vld [vmem:[#allocation2 + $0xb60] ss:$8 sps:$4 sm:$0xff]  }
 0x33c   :  { %2940 = vmatpush1.bf16.msra.mxu0 %v9471_v57  ;;  %v9548_v57 = vld [vmem:[#allocation2 + $0xa44] ss:$8 sps:$4 sm:$0xff]  }
 0x33d   :  { %2941 = vmatprep.subr.bf16.mxu0 %v9476_v58  ;;  %v9641_v58 = vld [vmem:[#allocation7 + $0x60] ss:$16 sps:$4 sm:$0xff]  }
 0x33e   :  { %3504 = vmatpush1.bf16.msra.mxu1 %v9641_v58  ;;  %v9608_v58 = vld [vmem:[#allocation2 + $0xb84] ss:$8 sps:$4 sm:$0xff]  }
 0x340   :  { %2942 = vmatpush1.bf16.msra.mxu0 %v9474_v59  ;;  %v9642_v59 = vld [vmem:[#allocation7 + $0x84] ss:$16 sps:$4 sm:$0xff]  }
 0x341   :  { %2943 = vmatprep.subr.bf16.mxu0 %v9479_v60  ;;  %v9546_v60 = vld [vmem:[#allocation2 + $0xa40] ss:$8 sps:$4 sm:$0xff]   ;;  %3505 = vmatprep.subr.bf16.mxu1 %v9642_v59 }
 0x342   :  { %v9606_v59 = vld [vmem:[#allocation2 + $0xb80] ss:$8 sps:$4 sm:$0xff]  }
 0x344   :  { %2944 = vmatpush1.bf16.msra.mxu0 %v9477_v61  ;;  %v9551_v61 = vld [vmem:[#allocation2 + $0xa54] ss:$8 sps:$4 sm:$0xff]  }
 0x345   :  { %2945 = vmatprep.subr.bf16.mxu0 %v9482_v62  ;;  %v9644_v62 = vld [vmem:[#allocation7 + $0x80] ss:$16 sps:$4 sm:$0xff]  }
 0x346   :  { %3506 = vmatpush1.bf16.msra.mxu1 %v9644_v62  ;;  %v9614_v62 = vld [vmem:[#allocation2 + $0xba4] ss:$8 sps:$4 sm:$0xff]  }
 0x348   :  { %2946 = vmatpush1.bf16.msra.mxu0 %v9480_v63  ;;  %v9645_v63 = vld [vmem:[#allocation7 + $0xa4] ss:$16 sps:$4 sm:$0xff]  }
 0x349   :  { %2947 = vmatprep.subr.bf16.mxu0 %v9485_v0  ;;  %v9549_v0 = vld [vmem:[#allocation2 + $0xa50] ss:$8 sps:$4 sm:$0xff]   ;;  %3507 = vmatprep.subr.bf16.mxu1 %v9645_v63  ;;  %v9612_v63 = vld [vmem:[#allocation2 + $0xba0] ss:$8 sps:$4 sm:$0xff]  }
 0x34a   :  { %3508 = vmatpush1.bf16.msra.mxu1 %v9647_v2  ;;  %v9620_v2 = vld [vmem:[#allocation2 + $0xbc4] ss:$8 sps:$4 sm:$0xff]  }
 0x34c   :  { %2948 = vmatpush1.bf16.msra.mxu0 %v9483_v1  ;;  %v9554_v1 = vld [vmem:[#allocation2 + $0xa64] ss:$8 sps:$4 sm:$0xff]  }
 0x34d   :  { %2958 = vmatprep.subr.bf16.mxu0 %v9488_v3  ;;  %v9648_v3 = vld [vmem:[#allocation7 + $0xc4] ss:$16 sps:$4 sm:$0xff]  }
 0x34e   :  { %3509 = vmatprep.subr.bf16.mxu1 %v9648_v3  ;;  %v9618_v3 = vld [vmem:[#allocation2 + $0xbc0] ss:$8 sps:$4 sm:$0xff]  }
 0x34f   :  { %2950 = vmatmul.mubr.bf16.vlgmr.msra.gmra.mrb[0].mxu0 %v277_v5  ;;  %v9557_v5 = vld [vmem:[#allocation2 + $0xa74] ss:$8 sps:$4 sm:$0xff]  }
 0x350   :  { %2959 = vmatpush1.bf16.msra.mxu0 %v9486_v6  ;;  %2990 = vmatprep.mubr.bf16.mxu0 %v280_v7  ;;  %v9650_v6 = vld [vmem:[#allocation7 + $0xc0] ss:$16 sps:$4 sm:$0xff]   ;;  %v9651_v7 = vld [vmem:[#allocation7 + $0xe4] ss:$16 sps:$4 sm:$0xff]  }
 0x351   :  { %2960 = vmatprep.subr.bf16.mxu0 %v9491_v8  ;;  %v9555_v8 = vld [vmem:[#allocation2 + $0xa70] ss:$8 sps:$4 sm:$0xff]   ;;  %3510 = vmatpush1.bf16.msra.mxu1 %v9650_v6  ;;  %v9626_v6 = vld [vmem:[#allocation2 + $0xbe4] ss:$8 sps:$4 sm:$0xff]  }
 0x352   :  { %3511 = vmatprep.subr.bf16.mxu1 %v9651_v7  ;;  %v9624_v7 = vld [vmem:[#allocation2 + $0xbe0] ss:$8 sps:$4 sm:$0xff]  }
 0x354   :  { %2961 = vmatpush1.bf16.msra.mxu0 %v9489_v9  ;;  %v9560_v9 = vld [vmem:[#allocation2 + $0xa84] ss:$8 sps:$4 sm:$0xff]  }
 0x355   :  { %2962 = vmatprep.subr.bf16.mxu0 %v9494_v10  ;;  %v9653_v10 = vld [vmem:[#allocation7 + $0xe0] ss:$16 sps:$4 sm:$0xff]  }
 0x356   :  { %3512 = vmatpush1.bf16.msra.mxu1 %v9653_v10  ;;  %v259_v10 = vld [vmem:[%s11037_s5 + $0xb0] sm:$0xff] }
 0x358   :  { %2963 = vmatpush1.bf16.msra.mxu0 %v9492_v11  ;;  %v9654_v11 = vld [vmem:[#allocation7 + $0x104] ss:$16 sps:$4 sm:$0xff]  }
 0x359   :  { %2964 = vmatprep.subr.bf16.mxu0 %v9497_v12  ;;  %v9558_v12 = vld [vmem:[#allocation2 + $0xa80] ss:$8 sps:$4 sm:$0xff]   ;;  %3513 = vmatprep.subr.bf16.mxu1 %v9654_v11  ;;  %v283_v11 = vpack.c.bf16 %v259_v10, %v259_v10  ;;  %v3651_v10 = vld [vmem:[#allocation12 + $0x60] sm:$0xff] }
 0x35c   :  { %2965 = vmatpush1.bf16.msra.mxu0 %v9495_v13  ;;  %v9563_v13 = vld [vmem:[#allocation2 + $0xa94] ss:$8 sps:$4 sm:$0xff]  }
 0x35d   :  { %2966 = vmatprep.subr.bf16.mxu0 %v9500_v14  ;;  %v9656_v14 = vld [vmem:[#allocation7 + $0x100] ss:$16 sps:$4 sm:$0xff]  }
 0x35e   :  { %3514 = vmatpush1.bf16.msra.mxu1 %v9656_v14  ;;  %v9675_v14 = vld [vmem:[#allocation7 + $0x1e4] ss:$16 sps:$4 sm:$0xff]  }
 0x360   :  { %2967 = vmatpush1.bf16.msra.mxu0 %v9498_v15  ;;  %v9657_v15 = vld [vmem:[#allocation7 + $0x124] ss:$16 sps:$4 sm:$0xff]  }
 0x361   :  { %2968 = vmatprep.subr.bf16.mxu0 %v9503_v16  ;;  %v9561_v16 = vld [vmem:[#allocation2 + $0xa90] ss:$8 sps:$4 sm:$0xff]   ;;  %3515 = vmatprep.subr.bf16.mxu1 %v9657_v15  ;;  %v9677_v15 = vld [vmem:[#allocation7 + $0x1e0] ss:$16 sps:$4 sm:$0xff]  }
 0x364   :  { %2969 = vmatpush1.bf16.msra.mxu0 %v9501_v17  ;;  %v9566_v17 = vld [vmem:[#allocation2 + $0xaa4] ss:$8 sps:$4 sm:$0xff]  }
 0x365   :  { %2970 = vmatprep.subr.bf16.mxu0 %v9506_v18  ;;  %v9659_v18 = vld [vmem:[#allocation7 + $0x120] ss:$16 sps:$4 sm:$0xff]  }
 0x366   :  { %3516 = vmatpush1.bf16.msra.mxu1 %v9659_v18 }
 0x368   :  { %2971 = vmatpush1.bf16.msra.mxu0 %v9504_v19  ;;  %v9660_v19 = vld [vmem:[#allocation7 + $0x144] ss:$16 sps:$4 sm:$0xff]  }
 0x369   :  { %2972 = vmatprep.subr.bf16.mxu0 %v9509_v20  ;;  %v9564_v20 = vld [vmem:[#allocation2 + $0xaa0] ss:$8 sps:$4 sm:$0xff]   ;;  %3517 = vmatprep.subr.bf16.mxu1 %v9660_v19 }
 0x36c   :  { %2973 = vmatpush1.bf16.msra.mxu0 %v9507_v21  ;;  %v9569_v21 = vld [vmem:[#allocation2 + $0xab4] ss:$8 sps:$4 sm:$0xff]  }
 0x36d   :  { %2974 = vmatprep.subr.bf16.mxu0 %v9512_v22  ;;  %v9662_v22 = vld [vmem:[#allocation7 + $0x140] ss:$16 sps:$4 sm:$0xff]  }
 0x36e   :  { %3518 = vmatpush1.bf16.msra.mxu1 %v9662_v22  ;;  %v3095_v22 = vld [vmem:[#allocation6] sm:$0x3] }
 0x370   :  { %2975 = vmatpush1.bf16.msra.mxu0 %v9510_v23  ;;  %v9663_v23 = vld [vmem:[#allocation7 + $0x164] ss:$16 sps:$4 sm:$0xff]  }
 0x371   :  { %2976 = vmatprep.subr.bf16.mxu0 %v9515_v24  ;;  %v9567_v24 = vld [vmem:[#allocation2 + $0xab0] ss:$8 sps:$4 sm:$0xff]   ;;  %3519 = vmatprep.subr.bf16.mxu1 %v9663_v23 }
 0x374   :  { %2977 = vmatpush1.bf16.msra.mxu0 %v9513_v25  ;;  %v9572_v25 = vld [vmem:[#allocation2 + $0xac4] ss:$8 sps:$4 sm:$0xff]  }
 0x375   :  { %2978 = vmatprep.subr.bf16.mxu0 %v9518_v26  ;;  %v9665_v26 = vld [vmem:[#allocation7 + $0x160] ss:$16 sps:$4 sm:$0xff]  }
 0x376   :  { %3520 = vmatpush1.bf16.msra.mxu1 %v9665_v26 }
 0x378   :  { %2979 = vmatpush1.bf16.msra.mxu0 %v9516_v27  ;;  %v9666_v27 = vld [vmem:[#allocation7 + $0x184] ss:$16 sps:$4 sm:$0xff]  }
 0x379   :  { %2980 = vmatprep.subr.bf16.mxu0 %v9521_v28  ;;  %v9570_v28 = vld [vmem:[#allocation2 + $0xac0] ss:$8 sps:$4 sm:$0xff]   ;;  %3521 = vmatprep.subr.bf16.mxu1 %v9666_v27 }
 0x37c   :  { %2981 = vmatpush1.bf16.msra.mxu0 %v9519_v29  ;;  %v9575_v29 = vld [vmem:[#allocation2 + $0xad4] ss:$8 sps:$4 sm:$0xff]  }
 0x37d   :  { %2982 = vmatprep.subr.bf16.mxu0 %v9524_v30  ;;  %v9668_v30 = vld [vmem:[#allocation7 + $0x180] ss:$16 sps:$4 sm:$0xff]  }
 0x37e   :  { %3522 = vmatpush1.bf16.msra.mxu1 %v9668_v30 }
 0x380   :  { %2983 = vmatpush1.bf16.msra.mxu0 %v9522_v31  ;;  %v9669_v31 = vld [vmem:[#allocation7 + $0x1a4] ss:$16 sps:$4 sm:$0xff]  }
 0x381   :  { %2984 = vmatprep.subr.bf16.mxu0 %v9527_v32  ;;  %v9573_v32 = vld [vmem:[#allocation2 + $0xad0] ss:$8 sps:$4 sm:$0xff]   ;;  %3523 = vmatprep.subr.bf16.mxu1 %v9669_v31 }
 0x384   :  { %2985 = vmatpush1.bf16.msra.mxu0 %v9525_v33  ;;  %v9578_v33 = vld [vmem:[#allocation2 + $0xae4] ss:$8 sps:$4 sm:$0xff]  }
 0x385   :  { %2986 = vmatprep.subr.bf16.mxu0 %v9530_v34  ;;  %v9671_v34 = vld [vmem:[#allocation7 + $0x1a0] ss:$16 sps:$4 sm:$0xff]  }
 0x386   :  { %3524 = vmatpush1.bf16.msra.mxu1 %v9671_v34 }
 0x388   :  { %2987 = vmatpush1.bf16.msra.mxu0 %v9528_v35  ;;  %v9576_v35 = vld [vmem:[#allocation2 + $0xae0] ss:$8 sps:$4 sm:$0xff]  }
 0x389   :  { %2988 = vmatprep.subr.bf16.mxu0 %v9533_v36  ;;  %v9581_v36 = vld [vmem:[#allocation2 + $0xaf4] ss:$8 sps:$4 sm:$0xff]  }
 0x38c   :  { %2989 = vmatpush1.bf16.msra.mxu0 %v9531_v37  ;;  %v9579_v37 = vld [vmem:[#allocation2 + $0xaf0] ss:$8 sps:$4 sm:$0xff]  }
 0x38d   :  { %2999 = vmatprep.subr.bf16.mxu0 %v9536_v39  ;;  %v9584_v39 = vld [vmem:[#allocation2 + $0xb04] ss:$8 sps:$4 sm:$0xff]  }
 0x38f   :  { %2991 = vmatmul.mubr.bf16.vlgmr.msra.gmra.mrb[0].mxu0 %v279_v41  ;;  %v281_v41 = vpack.c.bf16 %v257_v38, %v257_v38  ;;  %v9678_v38 = vld [vmem:[#allocation7 + $0x8] ss:$16 sps:$4 sm:$0xff]  }
 0x390   :  { %3000 = vmatpush1.bf16.msra.mxu0 %v9534_v42  ;;  %3031 = vmatprep.mubr.bf16.mxu0 %v282_v43  ;;  %v9582_v42 = vld [vmem:[#allocation2 + $0xb00] ss:$8 sps:$4 sm:$0xff]   ;;  %v284_v43 = vpack.c.bf16 %v260_v40, %v260_v40 }
 0x391   :  { %3001 = vmatprep.subr.bf16.mxu0 %v9539_v44  ;;  %v9587_v44 = vld [vmem:[#allocation2 + $0xb14] ss:$8 sps:$4 sm:$0xff]   ;;  %v9683_v40 = vld [vmem:[#allocation7 + $0x2c] ss:$16 sps:$4 sm:$0xff]  }
 0x394   :  { %3002 = vmatpush1.bf16.msra.mxu0 %v9537_v48  ;;  %v9593_v48 = vld [vmem:[#allocation2 + $0xb34] ss:$8 sps:$4 sm:$0xff]  }
 0x395   :  { %3003 = vmatprep.subr.bf16.mxu0 %v9542_v49  ;;  %v9591_v49 = vld [vmem:[#allocation2 + $0xb30] ss:$8 sps:$4 sm:$0xff]  }
 0x398   :  { %3004 = vmatpush1.bf16.msra.mxu0 %v9540_v52  ;;  %v9599_v52 = vld [vmem:[#allocation2 + $0xb54] ss:$8 sps:$4 sm:$0xff]  }
 0x399   :  { %3005 = vmatprep.subr.bf16.mxu0 %v9545_v53  ;;  %v9597_v53 = vld [vmem:[#allocation2 + $0xb50] ss:$8 sps:$4 sm:$0xff]  }
 0x39c   :  { %3006 = vmatpush1.bf16.msra.mxu0 %v9543_v56  ;;  %v9605_v56 = vld [vmem:[#allocation2 + $0xb74] ss:$8 sps:$4 sm:$0xff]  }
 0x39d   :  { %3007 = vmatprep.subr.bf16.mxu0 %v9548_v57  ;;  %v9603_v57 = vld [vmem:[#allocation2 + $0xb70] ss:$8 sps:$4 sm:$0xff]  }
 0x3a0   :  { %3008 = vmatpush1.bf16.msra.mxu0 %v9546_v60  ;;  %v9611_v60 = vld [vmem:[#allocation2 + $0xb94] ss:$8 sps:$4 sm:$0xff]  }
 0x3a1   :  { %3009 = vmatprep.subr.bf16.mxu0 %v9551_v61  ;;  %v9609_v61 = vld [vmem:[#allocation2 + $0xb90] ss:$8 sps:$4 sm:$0xff]  }
 0x3a4   :  { %3010 = vmatpush1.bf16.msra.mxu0 %v9549_v0  ;;  %v9617_v0 = vld [vmem:[#allocation2 + $0xbb4] ss:$8 sps:$4 sm:$0xff]  }
 0x3a5   :  { %3011 = vmatprep.subr.bf16.mxu0 %v9554_v1  ;;  %v9615_v1 = vld [vmem:[#allocation2 + $0xbb0] ss:$8 sps:$4 sm:$0xff]  }
 0x3a8   :  { %3012 = vmatpush1.bf16.msra.mxu0 %v9552_v4  ;;  %v9623_v4 = vld [vmem:[#allocation2 + $0xbd4] ss:$8 sps:$4 sm:$0xff]  }
 0x3a9   :  { %3013 = vmatprep.subr.bf16.mxu0 %v9557_v5  ;;  %v9621_v5 = vld [vmem:[#allocation2 + $0xbd0] ss:$8 sps:$4 sm:$0xff]  }
 0x3ac   :  { %3014 = vmatpush1.bf16.msra.mxu0 %v9555_v8  ;;  %v9629_v8 = vld [vmem:[#allocation2 + $0xbf4] ss:$8 sps:$4 sm:$0xff]  }
 0x3ad   :  { %3015 = vmatprep.subr.bf16.mxu0 %v9560_v9  ;;  %v9627_v9 = vld [vmem:[#allocation2 + $0xbf0] ss:$8 sps:$4 sm:$0xff]  }
 0x3b0   :  { %3016 = vmatpush1.bf16.msra.mxu0 %v9558_v12  ;;  %v9672_v12 = vld [vmem:[#allocation7 + $0x1c4] ss:$16 sps:$4 sm:$0xff]  }
 0x3b1   :  { %3017 = vmatprep.subr.bf16.mxu0 %v9563_v13  ;;  %v9674_v13 = vld [vmem:[#allocation7 + $0x1c0] ss:$16 sps:$4 sm:$0xff]   ;;  %3525 = vmatprep.subr.bf16.mxu1 %v9672_v12 }
 0x3b2   :  { %3526 = vmatpush1.bf16.msra.mxu1 %v9674_v13  ;;  %v3655_v13 = vld [vmem:[#allocation12 + $0x80] sm:$0xff] }
 0x3b3   :  { %3527 = vmatprep.subr.bf16.mxu1 %v9675_v14  ;;  %v3659_v14 = vld [vmem:[#allocation12 + $0xa0] sm:$0xff] }
 0x3b4   :  { %3018 = vmatpush1.bf16.msra.mxu0 %v9561_v16  ;;  %v9680_v16 = vld [vmem:[#allocation7 + $0xc] ss:$16 sps:$4 sm:$0xff]  }
 0x3b5   :  { %3019 = vmatprep.subr.bf16.mxu0 %v9566_v17  ;;  %v3083_v17 = vlaneseq }
 0x3b6   :  { %3528 = vmatpush1.bf16.msra.mxu1 %v9677_v15 }
 0x3b7   :  { %3538 = vmatprep.subr.bf16.mxu1 %v9680_v16  ;;  %v10870_v18 = vshrl.u32 %v3083_v17, 7  ;;  %v8374_v16 = vcombine.high %v3655_v13, %v3659_v14  ;;  %v3663_v17 = vld [vmem:[#allocation12 + $0xc0] sm:$0xff] }
 0x3b8   :  { %3020 = vmatpush1.bf16.msra.mxu0 %v9564_v20  ;;  %v3081_v20 = vld [vmem:[#allocation4] sm:$0x3] }
 0x3b9   :  { %3021 = vmatprep.subr.bf16.mxu0 %v9569_v21  ;;  %v10873_v19 = vsub.s32 0, %v10870_v18  ;;  %v10876_v21 = vsub.s32 1, %v10870_v18 }
 0x3bb   :  { %v3086_v23 = vrot.slane %v3081_v20, %v10873_v19  ;;  %v3104_v27 = vrot.slane %v3095_v22, %v10876_v21 }
 0x3bc   :  { %3022 = vmatpush1.bf16.msra.mxu0 %v9567_v24  ;;  %v3090_v24 = vrot.slane %v3081_v20, %v10876_v21  ;;  %v3667_v20 = vld [vmem:[#allocation12 + $0xe0] sm:$0xff] }
 0x3bd   :  { %3023 = vmatprep.subr.bf16.mxu0 %v9572_v25  ;;  %v3100_v25 = vrot.slane %v3095_v22, %v10873_v19  ;;  %v8373_v22 = vcombine.low %v3655_v13, %v3659_v14  ;;  %v10894_v13 = vld [vmem:[#allocation9] sm:$0xf]  ;;  %v10896_v14 = vld [vmem:[#allocation10] sm:$0xf] }
 0x3c0   :  { %3024 = vmatpush1.bf16.msra.mxu0 %v9570_v28 }
 0x3c1   :  { %3025 = vmatprep.subr.bf16.mxu0 %v9575_v29 }
 0x3c4   :  { %3026 = vmatpush1.bf16.msra.mxu0 %v9573_v32 }
 0x3c5   :  { %3027 = vmatprep.subr.bf16.mxu0 %v9578_v33 }
 0x3c8   :  { %3028 = vmatpush1.bf16.msra.mxu0 %v9576_v35 }
 0x3c9   :  { %3029 = vmatprep.subr.bf16.mxu0 %v9581_v36 }
 0x3cc   :  { %3030 = vmatpush1.bf16.msra.mxu0 %v9579_v37 }
 0x3cd   :  { %3040 = vmatprep.subr.bf16.mxu0 %v9584_v39 }
 0x3cf   :  { %3032 = vmatmul.mubr.bf16.vlgmr.msra.gmra.mrb[0].mxu0 %v281_v41  ;;  %v9681_v41 = vld [vmem:[#allocation7 + $0x28] ss:$16 sps:$4 sm:$0xff]  }
 0x3d0   :  { %3041 = vmatpush1.bf16.msra.mxu0 %v9582_v42  ;;  %3072 = vmatprep.mubr.bf16.mxu0 %v284_v43  ;;  %v9686_v42 = vld [vmem:[#allocation7 + $0x4c] ss:$16 sps:$4 sm:$0xff]   ;;  %v9684_v43 = vld [vmem:[#allocation7 + $0x48] ss:$16 sps:$4 sm:$0xff]  }
 0x3d1   :  { %3042 = vmatprep.subr.bf16.mxu0 %v9587_v44  ;;  %v9689_v44 = vld [vmem:[#allocation7 + $0x6c] ss:$16 sps:$4 sm:$0xff]  }
 0x3d4   :  { %3043 = vmatpush1.bf16.msra.mxu0 %v9585_v45  ;;  %v9687_v45 = vld [vmem:[#allocation7 + $0x68] ss:$16 sps:$4 sm:$0xff]  }
 0x3d5   :  { %3044 = vmatprep.subr.bf16.mxu0 %v9590_v46  ;;  %v9692_v46 = vld [vmem:[#allocation7 + $0x8c] ss:$16 sps:$4 sm:$0xff]  }
 0x3d8   :  { %3045 = vmatpush1.bf16.msra.mxu0 %v9588_v47  ;;  %v9690_v47 = vld [vmem:[#allocation7 + $0x88] ss:$16 sps:$4 sm:$0xff]  }
 0x3d9   :  { %3046 = vmatprep.subr.bf16.mxu0 %v9593_v48  ;;  %v9695_v48 = vld [vmem:[#allocation7 + $0xac] ss:$16 sps:$4 sm:$0xff]  }
 0x3dc   :  { %3047 = vmatpush1.bf16.msra.mxu0 %v9591_v49  ;;  %v9693_v49 = vld [vmem:[#allocation7 + $0xa8] ss:$16 sps:$4 sm:$0xff]  }
 0x3dd   :  { %3048 = vmatprep.subr.bf16.mxu0 %v9596_v50  ;;  %v9698_v50 = vld [vmem:[#allocation7 + $0xcc] ss:$16 sps:$4 sm:$0xff]  }
 0x3e0   :  { %3049 = vmatpush1.bf16.msra.mxu0 %v9594_v51  ;;  %v9696_v51 = vld [vmem:[#allocation7 + $0xc8] ss:$16 sps:$4 sm:$0xff]  }
 0x3e1   :  { %3050 = vmatprep.subr.bf16.mxu0 %v9599_v52  ;;  %v9701_v52 = vld [vmem:[#allocation7 + $0xec] ss:$16 sps:$4 sm:$0xff]  }
 0x3e4   :  { %3051 = vmatpush1.bf16.msra.mxu0 %v9597_v53  ;;  %v9699_v53 = vld [vmem:[#allocation7 + $0xe8] ss:$16 sps:$4 sm:$0xff]  }
 0x3e5   :  { %3052 = vmatprep.subr.bf16.mxu0 %v9602_v54  ;;  %v9704_v54 = vld [vmem:[#allocation7 + $0x10c] ss:$16 sps:$4 sm:$0xff]  }
 0x3e8   :  { %3053 = vmatpush1.bf16.msra.mxu0 %v9600_v55  ;;  %v9702_v55 = vld [vmem:[#allocation7 + $0x108] ss:$16 sps:$4 sm:$0xff]  }
 0x3e9   :  { %3054 = vmatprep.subr.bf16.mxu0 %v9605_v56  ;;  %v9707_v56 = vld [vmem:[#allocation7 + $0x12c] ss:$16 sps:$4 sm:$0xff]  }
 0x3ec   :  { %3055 = vmatpush1.bf16.msra.mxu0 %v9603_v57  ;;  %v9705_v57 = vld [vmem:[#allocation7 + $0x128] ss:$16 sps:$4 sm:$0xff]  }
 0x3ed   :  { %3056 = vmatprep.subr.bf16.mxu0 %v9608_v58  ;;  %v9710_v58 = vld [vmem:[#allocation7 + $0x14c] ss:$16 sps:$4 sm:$0xff]  }
 0x3f0   :  { %3057 = vmatpush1.bf16.msra.mxu0 %v9606_v59  ;;  %v9708_v59 = vld [vmem:[#allocation7 + $0x148] ss:$16 sps:$4 sm:$0xff]  }
 0x3f1   :  { %3058 = vmatprep.subr.bf16.mxu0 %v9611_v60  ;;  %v9713_v60 = vld [vmem:[#allocation7 + $0x16c] ss:$16 sps:$4 sm:$0xff]  }
 0x3f4   :  { %3059 = vmatpush1.bf16.msra.mxu0 %v9609_v61  ;;  %v9711_v61 = vld [vmem:[#allocation7 + $0x168] ss:$16 sps:$4 sm:$0xff]  }
 0x3f5   :  { %3060 = vmatprep.subr.bf16.mxu0 %v9614_v62  ;;  %v9716_v62 = vld [vmem:[#allocation7 + $0x18c] ss:$16 sps:$4 sm:$0xff]  }
 0x3f8   :  { %3061 = vmatpush1.bf16.msra.mxu0 %v9612_v63  ;;  %v9714_v63 = vld [vmem:[#allocation7 + $0x188] ss:$16 sps:$4 sm:$0xff]  }
 0x3f9   :  { %3062 = vmatprep.subr.bf16.mxu0 %v9617_v0  ;;  %v9719_v0 = vld [vmem:[#allocation7 + $0x1ac] ss:$16 sps:$4 sm:$0xff]  }
 0x3fc   :  { %3063 = vmatpush1.bf16.msra.mxu0 %v9615_v1  ;;  %v9717_v1 = vld [vmem:[#allocation7 + $0x1a8] ss:$16 sps:$4 sm:$0xff]  }
 0x3fd   :  { %3064 = vmatprep.subr.bf16.mxu0 %v9620_v2  ;;  %v9722_v2 = vld [vmem:[#allocation7 + $0x1cc] ss:$16 sps:$4 sm:$0xff]  }
 0x400   :  { %3065 = vmatpush1.bf16.msra.mxu0 %v9618_v3  ;;  %v9720_v3 = vld [vmem:[#allocation7 + $0x1c8] ss:$16 sps:$4 sm:$0xff]  }
 0x401   :  { %3066 = vmatprep.subr.bf16.mxu0 %v9623_v4  ;;  %v9725_v4 = vld [vmem:[#allocation7 + $0x1ec] ss:$16 sps:$4 sm:$0xff]  }
 0x404   :  { %3067 = vmatpush1.bf16.msra.mxu0 %v9621_v5  ;;  %v3639_v5 = vld [vmem:[#allocation12] sm:$0xff] }
 0x405   :  { %3068 = vmatprep.subr.bf16.mxu0 %v9626_v6  ;;  %v3643_v6 = vld [vmem:[#allocation12 + $0x20] sm:$0xff] }
 0x408   :  { %3069 = vmatpush1.bf16.msra.mxu0 %v9624_v7  ;;  %v9723_v7 = vld [vmem:[#allocation7 + $0x1e8] ss:$16 sps:$4 sm:$0xff]  }
 0x409   :  { %3070 = vmatprep.subr.bf16.mxu0 %v9629_v8  ;;  %v8358_v8 = vcombine.high %v3639_v5, %v3643_v6 }
 0x40c   :  { %3071 = vmatpush1.bf16.msra.mxu0 %v9627_v9  ;;  %v3647_v9 = vld [vmem:[#allocation12 + $0x40] sm:$0xff] }
 0x40d   :  { %v8366_v12 = vcombine.high %v3647_v9, %v3651_v10  ;;  %v8365_v15 = vcombine.low %v3647_v9, %v3651_v10 }
 0x40f   :  { %3073 = vmatmul.mubr.bf16.vlgmr.msra.gmra.mrb[0].mxu0 %v283_v11  ;;  %v8357_v11 = vcombine.low %v3639_v5, %v3643_v6 }
 0x4e2   :  { %v3074_v26 = vpop.f32.mrb[0].mxu0 }
 0x4e3   :  { %v3093_v28 = vmul.f32 %v3086_v23, %v3074_v26  ;;  %v3076_v29 = vpop.f32.mrb[1].mxu0  ;;  %v8382_v23 = vcombine.high %v3663_v17, %v3667_v20  ;;  %v8381_v26 = vcombine.low %v3663_v17, %v3667_v20  ;;  %v3610_v17 = vrot.slane %v10896_v14, %v10873_v19 }
 0x4e4   :  { %v3094_v30 = vmul.f32 %v3090_v24, %v3076_v29  ;;  %v3078_v31 = vpop.f32.mrb[2].mxu0  ;;  %v3671_v24 = vld [vmem:[#allocation12 + $0x100] sm:$0xff] }
 0x4e5   :  { %v3107_v32 = vadd.f32 %v3100_v25, %v3093_v28  ;;  %v3079_v33 = vpop.f32.mrb[3].mxu0  ;;  %v3675_v25 = vld [vmem:[#allocation12 + $0x120] sm:$0xff] }
 0x4e6   :  { %v3108_v34 = vadd.f32 %v3104_v27, %v3094_v30  ;;  %v8390_v27 = vcombine.high %v3671_v24, %v3675_v25  ;;  %v3679_v28 = vld [vmem:[#allocation12 + $0x140] sm:$0xff]  ;;  %v8389_v30 = vcombine.low %v3671_v24, %v3675_v25 }
 0x4e7   :  { %v3109_v35 = vmax.f32 %v3107_v32, 0.0  ;;  %v3683_v29 = vld [vmem:[#allocation12 + $0x160] sm:$0xff] }
 0x4e8   :  { %v3110_v36 = vmax.f32 %v3108_v34, 0.0  ;;  %v8398_v31 = vcombine.high %v3679_v28, %v3683_v29  ;;  %v3687_v32 = vld [vmem:[#allocation12 + $0x180] sm:$0xff]  ;;  %v8397_v34 = vcombine.low %v3679_v28, %v3683_v29 }
 0x4e9   :  { %v10882_v39 = vpack.c.bf16 %v3109_v35, %v3109_v35  ;;  %v3691_v33 = vld [vmem:[#allocation12 + $0x1a0] sm:$0xff] }
 0x4ea   :  { %v3112_v37 = vpack.c.bf16 %v3110_v36, %v3110_v36  ;;  %v8406_v35 = vcombine.high %v3687_v32, %v3691_v33  ;;  %v3695_v36 = vld [vmem:[#allocation12 + $0x1c0] sm:$0xff] }
 0x4ec   :  { %3529 = vmatprep.mubr.bf16.mxu1 %v3112_v37 }
 0x4ed   :  { %3530 = vmatmul.mubr.bf16.vlgmr.msra.gmra.mrb[0].mxu1 %v10882_v39 }
 0x4ee   :  { %3539 = vmatpush1.bf16.msra.mxu1 %v9678_v38  ;;  %3570 = vmatprep.mubr.bf16.mxu1 %v3112_v37  ;;  %v3699_v37 = vld [vmem:[#allocation12 + $0x1e0] sm:$0xff]  ;;  %v8405_v38 = vcombine.low %v3687_v32, %v3691_v33 }
 0x4ef   :  { %3540 = vmatprep.subr.bf16.mxu1 %v9683_v40  ;;  %v3703_v40 = vld [vmem:[#allocation12 + $0x200] sm:$0xff] }
 0x4f0   :  { %v3775_v32 = vld [vmem:[#allocation12 + $0x440] sm:$0xff] }
 0x4f1   :  { %v3779_v33 = vld [vmem:[#allocation12 + $0x460] sm:$0xff] }
 0x4f2   :  { %3541 = vmatpush1.bf16.msra.mxu1 %v9681_v41  ;;  %v3707_v41 = vld [vmem:[#allocation12 + $0x220] sm:$0xff] }
 0x4f3   :  { %3542 = vmatprep.subr.bf16.mxu1 %v9686_v42  ;;  %v8413_v42 = vcombine.low %v3695_v36, %v3699_v37 }
 0x4f6   :  { %3543 = vmatpush1.bf16.msra.mxu1 %v9684_v43  ;;  %v8422_v43 = vcombine.high %v3703_v40, %v3707_v41 }
 0x4f7   :  { %3544 = vmatprep.subr.bf16.mxu1 %v9689_v44  ;;  %v3711_v44 = vld [vmem:[#allocation12 + $0x240] sm:$0xff] }
 0x4fa   :  { %3545 = vmatpush1.bf16.msra.mxu1 %v9687_v45  ;;  %v3715_v45 = vld [vmem:[#allocation12 + $0x260] sm:$0xff] }
 0x4fb   :  { %3546 = vmatprep.subr.bf16.mxu1 %v9692_v46  ;;  %v10886_v46 = vld [vmem:[#allocation12 + $0x400] sm:$0xff] }
 0x4fe   :  { %3547 = vmatpush1.bf16.msra.mxu1 %v9690_v47  ;;  %v10888_v47 = vld [vmem:[#allocation12 + $0x420] sm:$0xff] }
 0x4ff   :  { %3548 = vmatprep.subr.bf16.mxu1 %v9695_v48  ;;  %v8421_v48 = vcombine.low %v3703_v40, %v3707_v41  ;;  %v3791_v41 = vld [vmem:[#allocation12 + $0x4c0] sm:$0xff] }
 0x502   :  { %3549 = vmatpush1.bf16.msra.mxu1 %v9693_v49  ;;  %v8485_v49 = vcombine.low %v10886_v46, %v10888_v47 }
 0x503   :  { %3550 = vmatprep.subr.bf16.mxu1 %v9698_v50  ;;  %v8430_v50 = vcombine.high %v3711_v44, %v3715_v45 }
 0x506   :  { %3551 = vmatpush1.bf16.msra.mxu1 %v9696_v51  ;;  %v3719_v51 = vld [vmem:[#allocation12 + $0x280] sm:$0xff] }
 0x507   :  { %3552 = vmatprep.subr.bf16.mxu1 %v9701_v52  ;;  %v3723_v52 = vld [vmem:[#allocation12 + $0x2a0] sm:$0xff] }
 0x50a   :  { %3553 = vmatpush1.bf16.msra.mxu1 %v9699_v53  ;;  %v8429_v53 = vcombine.low %v3711_v44, %v3715_v45  ;;  %v3799_v45 = vld [vmem:[#allocation12 + $0x500] sm:$0xff] }
 0x50b   :  { %3554 = vmatprep.subr.bf16.mxu1 %v9704_v54  ;;  %v8438_v54 = vcombine.high %v3719_v51, %v3723_v52 }
 0x50e   :  { %3555 = vmatpush1.bf16.msra.mxu1 %v9702_v55  ;;  %v3727_v55 = vld [vmem:[#allocation12 + $0x2c0] sm:$0xff] }
 0x50f   :  { %3556 = vmatprep.subr.bf16.mxu1 %v9707_v56  ;;  %v3731_v56 = vld [vmem:[#allocation12 + $0x2e0] sm:$0xff] }
 0x512   :  { %3557 = vmatpush1.bf16.msra.mxu1 %v9705_v57  ;;  %v8437_v57 = vcombine.low %v3719_v51, %v3723_v52  ;;  %v3807_v52 = vld [vmem:[#allocation12 + $0x540] sm:$0xff] }
 0x513   :  { %3558 = vmatprep.subr.bf16.mxu1 %v9710_v58  ;;  %v8446_v58 = vcombine.high %v3727_v55, %v3731_v56 }
 0x516   :  { %3559 = vmatpush1.bf16.msra.mxu1 %v9708_v59  ;;  %v3735_v59 = vld [vmem:[#allocation12 + $0x300] sm:$0xff] }
 0x517   :  { %3560 = vmatprep.subr.bf16.mxu1 %v9713_v60  ;;  %v3739_v60 = vld [vmem:[#allocation12 + $0x320] sm:$0xff] }
 0x51a   :  { %3561 = vmatpush1.bf16.msra.mxu1 %v9711_v61  ;;  %v8445_v61 = vcombine.low %v3727_v55, %v3731_v56 }
 0x51b   :  { %3562 = vmatprep.subr.bf16.mxu1 %v9716_v62  ;;  %v8454_v62 = vcombine.high %v3735_v59, %v3739_v60 }
 0x51e   :  { %3563 = vmatpush1.bf16.msra.mxu1 %v9714_v63  ;;  %v3743_v63 = vld [vmem:[#allocation12 + $0x340] sm:$0xff] }
 0x51f   :  { %3564 = vmatprep.subr.bf16.mxu1 %v9719_v0  ;;  %v3747_v0 = vld [vmem:[#allocation12 + $0x360] sm:$0xff] }
 0x520   :  { %v8461_v5 = vcombine.low %v3743_v63, %v3747_v0 }
 0x522   :  { %3565 = vmatpush1.bf16.msra.mxu1 %v9717_v1  ;;  %v8453_v1 = vcombine.low %v3735_v59, %v3739_v60 }
 0x523   :  { %3566 = vmatprep.subr.bf16.mxu1 %v9722_v2  ;;  %v8462_v2 = vcombine.high %v3743_v63, %v3747_v0 }
 0x526   :  { %3567 = vmatpush1.bf16.msra.mxu1 %v9720_v3  ;;  %v3751_v3 = vld [vmem:[#allocation12 + $0x380] sm:$0xff] }
 0x527   :  { %3568 = vmatprep.subr.bf16.mxu1 %v9725_v4  ;;  %v3755_v4 = vld [vmem:[#allocation12 + $0x3a0] sm:$0xff] }
 0x528   :  { %v8470_v6 = vcombine.high %v3751_v3, %v3755_v4  ;;  %v8469_v9 = vcombine.low %v3751_v3, %v3755_v4 }
 0x52a   :  { %3569 = vmatpush1.bf16.msra.mxu1 %v9723_v7  ;;  %v3759_v7 = vld [vmem:[#allocation12 + $0x3c0] sm:$0xff] }
 0x52b   :  { %5175 = vmatprep.subr.bf16.mxu1 %v8358_v8  ;;  %v3763_v8 = vld [vmem:[#allocation12 + $0x3e0] sm:$0xff] }
 0x52c   :  { %v8478_v10 = vcombine.high %v3759_v7, %v3763_v8 }
 0x52d   :  { %3571 = vmatmul.mubr.bf16.vlgmr.msra.gmra.mrb[4].mxu1 %v10882_v39  ;;  %v8414_v39 = vcombine.high %v3695_v36, %v3699_v37  ;;  %v8494_v36 = vcombine.high %v3775_v32, %v3779_v33  ;;  %v3783_v37 = vld [vmem:[#allocation12 + $0x480] sm:$0xff] }
 0x52e   :  { %5176 = vmatpush1.bf16.msra.mxu1 %v8357_v11  ;;  %v8477_v11 = vcombine.low %v3759_v7, %v3763_v8 }
 0x52f   :  { %5177 = vmatprep.subr.bf16.mxu1 %v8366_v12  ;;  %v8486_v12 = vcombine.high %v10886_v46, %v10888_v47 }
 0x532   :  { %5178 = vmatpush1.bf16.msra.mxu1 %v8365_v15  ;;  %v3584_v15 = vrot.slane %v10894_v13, %v10873_v19 }
 0x533   :  { %5179 = vmatprep.subr.bf16.mxu1 %v8374_v16  ;;  %v3588_v16 = vrot.slane %v10894_v13, %v10876_v21 }
 0x536   :  { %5180 = vmatpush1.bf16.msra.mxu1 %v8373_v22  ;;  %v3614_v22 = vrot.slane %v10896_v14, %v10876_v21 }
 0x537   :  { %5181 = vmatprep.subr.bf16.mxu1 %v8382_v23 }
 0x53a   :  { %5182 = vmatpush1.bf16.msra.mxu1 %v8381_v26 }
 0x53b   :  { %5183 = vmatprep.subr.bf16.mxu1 %v8390_v27 }
 0x53e   :  { %5184 = vmatpush1.bf16.msra.mxu1 %v8389_v30 }
 0x53f   :  { %5185 = vmatprep.subr.bf16.mxu1 %v8398_v31 }
 0x542   :  { %5186 = vmatpush1.bf16.msra.mxu1 %v8397_v34 }
 0x543   :  { %5187 = vmatprep.subr.bf16.mxu1 %v8406_v35 }
 0x546   :  { %5188 = vmatpush1.bf16.msra.mxu1 %v8405_v38  ;;  %v3787_v38 = vld [vmem:[#allocation12 + $0x4a0] sm:$0xff] }
 0x547   :  { %5189 = vmatprep.subr.bf16.mxu1 %v8414_v39  ;;  %v8493_v39 = vcombine.low %v3775_v32, %v3779_v33  ;;  %v8502_v40 = vcombine.high %v3783_v37, %v3787_v38 }
 0x54a   :  { %5190 = vmatpush1.bf16.msra.mxu1 %v8413_v42  ;;  %v3795_v42 = vld [vmem:[#allocation12 + $0x4e0] sm:$0xff] }
 0x54b   :  { %5191 = vmatprep.subr.bf16.mxu1 %v8422_v43  ;;  %v8501_v43 = vcombine.low %v3783_v37, %v3787_v38  ;;  %v8510_v44 = vcombine.high %v3791_v41, %v3795_v42  ;;  %v3891_v37 = vld [vmem:[#allocation12 + $0x7e0] sm:$0xff] }
 0x54e   :  { %5192 = vmatpush1.bf16.msra.mxu1 %v8421_v48  ;;  %v3803_v48 = vld [vmem:[#allocation12 + $0x520] sm:$0xff] }
 0x54f   :  { %5193 = vmatprep.subr.bf16.mxu1 %v8430_v50  ;;  %v8509_v50 = vcombine.low %v3791_v41, %v3795_v42  ;;  %v8518_v51 = vcombine.high %v3799_v45, %v3803_v48  ;;  %v8517_v46 = vcombine.low %v3799_v45, %v3803_v48 }
 0x552   :  { %5194 = vmatpush1.bf16.msra.mxu1 %v8429_v53  ;;  %v3811_v53 = vld [vmem:[#allocation12 + $0x560] sm:$0xff] }
 0x553   :  { %5195 = vmatprep.subr.bf16.mxu1 %v8438_v54  ;;  %v8526_v47 = vcombine.high %v3807_v52, %v3811_v53  ;;  %v3819_v54 = vld [vmem:[#allocation12 + $0x5a0] sm:$0xff]  ;;  %v8525_v55 = vcombine.low %v3807_v52, %v3811_v53 }
 0x556   :  { %5196 = vmatpush1.bf16.msra.mxu1 %v8437_v57  ;;  %v3823_v57 = vld [vmem:[#allocation12 + $0x5c0] sm:$0xff] }
 0x557   :  { %5197 = vmatprep.subr.bf16.mxu1 %v8446_v58  ;;  %v3827_v58 = vld [vmem:[#allocation12 + $0x5e0] sm:$0xff] }
 0x558   :  { %v8542_v60 = vcombine.high %v3823_v57, %v3827_v58  ;;  %v8541_v63 = vcombine.low %v3823_v57, %v3827_v58 }
 0x55a   :  { %5198 = vmatpush1.bf16.msra.mxu1 %v8445_v61  ;;  %v3831_v61 = vld [vmem:[#allocation12 + $0x600] sm:$0xff] }
 0x55b   :  { %5199 = vmatprep.subr.bf16.mxu1 %v8454_v62  ;;  %v3835_v62 = vld [vmem:[#allocation12 + $0x620] sm:$0xff] }
 0x55c   :  { %v8550_v0 = vcombine.high %v3831_v61, %v3835_v62  ;;  %v8549_v3 = vcombine.low %v3831_v61, %v3835_v62  ;;  %v3660_v61 = vld [vmem:[#allocation12 + $0xa8] sm:$0xff] }
 0x55e   :  { %5200 = vmatpush1.bf16.msra.mxu1 %v8453_v1  ;;  %v3839_v1 = vld [vmem:[#allocation12 + $0x640] sm:$0xff] }
 0x55f   :  { %5201 = vmatprep.subr.bf16.mxu1 %v8462_v2  ;;  %v3843_v2 = vld [vmem:[#allocation12 + $0x660] sm:$0xff] }
 0x560   :  { %v8558_v4 = vcombine.high %v3839_v1, %v3843_v2  ;;  %v8557_v7 = vcombine.low %v3839_v1, %v3843_v2  ;;  %v3668_v1 = vld [vmem:[#allocation12 + $0xe8] sm:$0xff] }
 0x562   :  { %5202 = vmatpush1.bf16.msra.mxu1 %v8461_v5  ;;  %v3847_v5 = vld [vmem:[#allocation12 + $0x680] sm:$0xff] }
 0x563   :  { %5203 = vmatprep.subr.bf16.mxu1 %v8470_v6  ;;  %v3851_v6 = vld [vmem:[#allocation12 + $0x6a0] sm:$0xff] }
 0x564   :  { %v8566_v8 = vcombine.high %v3847_v5, %v3851_v6 }
 0x566   :  { %5204 = vmatpush1.bf16.msra.mxu1 %v8469_v9  ;;  %v3855_v9 = vld [vmem:[#allocation12 + $0x6c0] sm:$0xff] }
 0x567   :  { %5205 = vmatprep.subr.bf16.mxu1 %v8478_v10  ;;  %v3859_v10 = vld [vmem:[#allocation12 + $0x6e0] sm:$0xff] }
 0x56a   :  { %5206 = vmatpush1.bf16.msra.mxu1 %v8477_v11  ;;  %v8565_v11 = vcombine.low %v3847_v5, %v3851_v6  ;;  %v3676_v5 = vld [vmem:[#allocation12 + $0x128] sm:$0xff] }
 0x56b   :  { %5216 = vmatprep.subr.bf16.mxu1 %v8486_v12  ;;  %v8574_v12 = vcombine.high %v3855_v9, %v3859_v10 }
 0x5c0   :  { %v3531_v20 = vpop.f32.mrb[0].mxu1 }
 0x5c1   :  { %v3601_v23 = vmul.f32 %v3584_v15, %v3531_v20  ;;  %v3533_v24 = vpop.f32.mrb[1].mxu1  ;;  %v3863_v15 = vld [vmem:[#allocation12 + $0x700] sm:$0xff] }
 0x5c2   :  { %v3602_v25 = vmul.f32 %v3588_v16, %v3533_v24  ;;  %v3535_v26 = vpop.f32.mrb[2].mxu1  ;;  %v3867_v16 = vld [vmem:[#allocation12 + $0x720] sm:$0xff] }
 0x5c3   :  { %v3627_v27 = vadd.f32 %v3610_v17, %v3601_v23  ;;  %v3536_v28 = vpop.f32.mrb[3].mxu1  ;;  %v8573_v17 = vcombine.low %v3855_v9, %v3859_v10  ;;  %v8582_v20 = vcombine.high %v3863_v15, %v3867_v16  ;;  %v3875_v23 = vld [vmem:[#allocation12 + $0x760] sm:$0xff]  ;;  %v8581_v24 = vcombine.low %v3863_v15, %v3867_v16  ;;  %v3684_v9 = vld [vmem:[#allocation12 + $0x168] sm:$0xff] }
 0x5c4   :  { %v3628_v29 = vadd.f32 %v3614_v22, %v3602_v25  ;;  %v3871_v22 = vld [vmem:[#allocation12 + $0x740] sm:$0xff]  ;;  %v10916_v26 = vsub.s32 2, %v10870_v18  ;;  %v3692_v15 = vld [vmem:[#allocation12 + $0x1a8] sm:$0xff] }
 0x5c5   :  { %v3631_v30 = vmax.f32 %v3627_v27, 0.0  ;;  %v8590_v25 = vcombine.high %v3871_v22, %v3875_v23  ;;  %v10919_v27 = vsub.s32 3, %v10870_v18  ;;  %v3879_v28 = vld [vmem:[#allocation12 + $0x780] sm:$0xff] }
 0x5c6   :  { %v3632_v31 = vmax.f32 %v3628_v29, 0.0  ;;  %v3883_v29 = vld [vmem:[#allocation12 + $0x7a0] sm:$0xff]  ;;  %v3618_v38 = vrot.slane %v10896_v14, %v10916_v26 }
 0x5c7   :  { %v10908_v35 = vpack.c.bf16 %v3631_v30, %v3631_v30  ;;  %v8589_v30 = vcombine.low %v3871_v22, %v3875_v23  ;;  %v8598_v32 = vcombine.high %v3879_v28, %v3883_v29  ;;  %v3596_v33 = vrot.slane %v10894_v13, %v10919_v27  ;;  %v3700_v22 = vld [vmem:[#allocation12 + $0x1e8] sm:$0xff] }
 0x5c8   :  { %v10906_v34 = vpack.c.bf16 %v3632_v31, %v3632_v31  ;;  %v3592_v31 = vrot.slane %v10894_v13, %v10916_v26  ;;  %v8597_v41 = vcombine.low %v3879_v28, %v3883_v29  ;;  %v3708_v28 = vld [vmem:[#allocation12 + $0x228] sm:$0xff] }
 0x5ca   :  { %5207 = vmatprep.mubr.bf16.mxu1 %v10906_v34 }
 0x5cb   :  { %5208 = vmatmul.mubr.bf16.vlgmr.msra.gmra.mrb[8].mxu1 %v10908_v35 }
 0x5cc   :  { %5217 = vmatpush1.bf16.msra.mxu1 %v8485_v49  ;;  %v3815_v49 = vld [vmem:[#allocation12 + $0x580] sm:$0xff] }
 0x5cd   :  { %5218 = vmatprep.subr.bf16.mxu1 %v8494_v36  ;;  %v8534_v56 = vcombine.high %v3815_v49, %v3819_v54  ;;  %v8533_v59 = vcombine.low %v3815_v49, %v3819_v54  ;;  %v3887_v36 = vld [vmem:[#allocation12 + $0x7c0] sm:$0xff] }
 0x5d0   :  { %5219 = vmatpush1.bf16.msra.mxu1 %v8493_v39 }
 0x5d1   :  { %5220 = vmatprep.subr.bf16.mxu1 %v8502_v40  ;;  %v3622_v40 = vrot.slane %v10896_v14, %v10919_v27  ;;  %v3652_v14 = vld [vmem:[#allocation12 + $0x68] sm:$0xff] }
 0x5d4   :  { %5221 = vmatpush1.bf16.msra.mxu1 %v8501_v43 }
 0x5d5   :  { %5222 = vmatprep.subr.bf16.mxu1 %v8510_v44  ;;  %v8606_v44 = vcombine.high %v3887_v36, %v3891_v37 }
 0x5d8   :  { %5223 = vmatpush1.bf16.msra.mxu1 %v8509_v50  ;;  %v3640_v50 = vld [vmem:[#allocation12 + $0x8] sm:$0xff] }
 0x5d9   :  { %5224 = vmatprep.subr.bf16.mxu1 %v8518_v51  ;;  %v3644_v51 = vld [vmem:[#allocation12 + $0x28] sm:$0xff] }
 0x5da   :  { %v8360_v49 = vcombine.high %v3640_v50, %v3644_v51  ;;  %v8359_v57 = vcombine.low %v3640_v50, %v3644_v51  ;;  %v9734_v50 = vld [vmem:[#allocation16 + $0x4c] ss:$16 sps:$4 sm:$0xff]  }
 0x5dc   :  { %5225 = vmatpush1.bf16.msra.mxu1 %v8517_v46  ;;  %v8605_v46 = vcombine.low %v3887_v36, %v3891_v37  ;;  %v9726_v37 = vld [vmem:[#allocation16 + $0x8] ss:$16 sps:$4 sm:$0xff]  }
 0x5dd   :  { %5226 = vmatprep.subr.bf16.mxu1 %v8526_v47 }
 0x5e0   :  { %5227 = vmatpush1.bf16.msra.mxu1 %v8525_v55  ;;  %v3648_v55 = vld [vmem:[#allocation12 + $0x48] sm:$0xff] }
 0x5e1   :  { %5228 = vmatprep.subr.bf16.mxu1 %v8534_v56  ;;  %v8367_v62 = vcombine.low %v3648_v55, %v3652_v14 }
 0x5e4   :  { %5229 = vmatpush1.bf16.msra.mxu1 %v8533_v59  ;;  %v8368_v59 = vcombine.high %v3648_v55, %v3652_v14  ;;  %v3744_v14 = vld [vmem:[#allocation12 + $0x348] sm:$0xff] }
 0x5e5   :  { %5230 = vmatprep.subr.bf16.mxu1 %v8542_v60  ;;  %v3656_v60 = vld [vmem:[#allocation12 + $0x88] sm:$0xff] }
 0x5e6   :  { %v8375_v2 = vcombine.low %v3656_v60, %v3660_v61 }
 0x5e8   :  { %5231 = vmatpush1.bf16.msra.mxu1 %v8541_v63  ;;  %v8376_v63 = vcombine.high %v3656_v60, %v3660_v61  ;;  %v9738_v61 = vld [vmem:[#allocation16 + $0x88] ss:$16 sps:$4 sm:$0xff]  }
 0x5e9   :  { %5232 = vmatprep.subr.bf16.mxu1 %v8550_v0  ;;  %v3664_v0 = vld [vmem:[#allocation12 + $0xc8] sm:$0xff] }
 0x5ea   :  { %v8383_v6 = vcombine.low %v3664_v0, %v3668_v1 }
 0x5ec   :  { %5233 = vmatpush1.bf16.msra.mxu1 %v8549_v3  ;;  %v8384_v3 = vcombine.high %v3664_v0, %v3668_v1  ;;  %v3756_v0 = vld [vmem:[#allocation12 + $0x3a8] sm:$0xff] }
 0x5ed   :  { %5234 = vmatprep.subr.bf16.mxu1 %v8558_v4  ;;  %v3672_v4 = vld [vmem:[#allocation12 + $0x108] sm:$0xff] }
 0x5ee   :  { %v8391_v10 = vcombine.low %v3672_v4, %v3676_v5  ;;  %v9743_v1 = vld [vmem:[#allocation16 + $0xac] ss:$16 sps:$4 sm:$0xff]  }
 0x5f0   :  { %5235 = vmatpush1.bf16.msra.mxu1 %v8557_v7  ;;  %v8392_v7 = vcombine.high %v3672_v4, %v3676_v5  ;;  %v3760_v5 = vld [vmem:[#allocation12 + $0x3c8] sm:$0xff] }
 0x5f1   :  { %5236 = vmatprep.subr.bf16.mxu1 %v8566_v8  ;;  %v3680_v8 = vld [vmem:[#allocation12 + $0x148] sm:$0xff] }
 0x5f2   :  { %v8399_v16 = vcombine.low %v3680_v8, %v3684_v9 }
 0x5f4   :  { %5237 = vmatpush1.bf16.msra.mxu1 %v8565_v11  ;;  %v8400_v11 = vcombine.high %v3680_v8, %v3684_v9  ;;  %v9744_v9 = vld [vmem:[#allocation16 + $0xc8] ss:$16 sps:$4 sm:$0xff]  }
 0x5f5   :  { %5238 = vmatprep.subr.bf16.mxu1 %v8574_v12  ;;  %v3688_v12 = vld [vmem:[#allocation12 + $0x188] sm:$0xff] }
 0x5f6   :  { %v8407_v23 = vcombine.low %v3688_v12, %v3692_v15 }
 0x5f8   :  { %5239 = vmatpush1.bf16.msra.mxu1 %v8573_v17  ;;  %v8408_v17 = vcombine.high %v3688_v12, %v3692_v15  ;;  %v3772_v12 = vld [vmem:[#allocation12 + $0x428] sm:$0xff] }
 0x5f9   :  { %5240 = vmatprep.subr.bf16.mxu1 %v8582_v20  ;;  %v3696_v20 = vld [vmem:[#allocation12 + $0x1c8] sm:$0xff] }
 0x5fa   :  { %v8415_v29 = vcombine.low %v3696_v20, %v3700_v22  ;;  %v9749_v15 = vld [vmem:[#allocation16 + $0xec] ss:$16 sps:$4 sm:$0xff]  }
 0x5fc   :  { %5241 = vmatpush1.bf16.msra.mxu1 %v8581_v24  ;;  %v8416_v24 = vcombine.high %v3696_v20, %v3700_v22  ;;  %v3776_v22 = vld [vmem:[#allocation12 + $0x448] sm:$0xff] }
 0x5fd   :  { %5242 = vmatprep.subr.bf16.mxu1 %v8590_v25  ;;  %v3704_v25 = vld [vmem:[#allocation12 + $0x208] sm:$0xff] }
 0x5fe   :  { %v8423_v36 = vcombine.low %v3704_v25, %v3708_v28 }
 0x600   :  { %v3572_v39 = vpop.f32.mrb[4].mxu1  ;;  %5243 = vmatpush1.bf16.msra.mxu1 %v8589_v30  ;;  %v8424_v30 = vcombine.high %v3704_v25, %v3708_v28  ;;  %v9750_v28 = vld [vmem:[#allocation16 + $0x108] ss:$16 sps:$4 sm:$0xff]  }
 0x601   :  { %v3603_v42 = vmul.f32 %v3592_v31, %v3572_v39  ;;  %v3574_v43 = vpop.f32.mrb[5].mxu1  ;;  %5244 = vmatprep.subr.bf16.mxu1 %v8598_v32  ;;  %v3712_v31 = vld [vmem:[#allocation12 + $0x248] sm:$0xff] }
 0x602   :  { %v3604_v45 = vmul.f32 %v3596_v33, %v3574_v43  ;;  %v3576_v48 = vpop.f32.mrb[6].mxu1  ;;  %v3716_v32 = vld [vmem:[#allocation12 + $0x268] sm:$0xff] }
 0x603   :  { %v3629_v13 = vadd.f32 %v3618_v38, %v3603_v42  ;;  %v3577_v52 = vpop.f32.mrb[7].mxu1  ;;  %v9728_v33 = vld [vmem:[#allocation16 + $0xc] ss:$16 sps:$4 sm:$0xff]   ;;  %v8432_v38 = vcombine.high %v3712_v31, %v3716_v32  ;;  %v8431_v42 = vcombine.low %v3712_v31, %v3716_v32  ;;  %v9729_v43 = vld [vmem:[#allocation16 + $0x28] ss:$16 sps:$4 sm:$0xff]  }
 0x604   :  { %v3630_v53 = vadd.f32 %v3622_v40, %v3604_v45  ;;  %5245 = vmatpush1.bf16.msra.mxu1 %v8597_v41  ;;  %7319 = vmatprep.subr.bf16.mxu0 %v9728_v33  ;;  %v3720_v39 = vld [vmem:[#allocation12 + $0x288] sm:$0xff] }
 0x605   :  { %v3633_v47 = vmax.f32 %v3629_v13, 0.0  ;;  %5246 = vmatprep.subr.bf16.mxu1 %v8606_v44  ;;  %v3724_v40 = vld [vmem:[#allocation12 + $0x2a8] sm:$0xff]  ;;  %7320 = vmatpush1.bf16.msra.mxu0 %v9726_v37 }
 0x606   :  { %v3634_v54 = vmax.f32 %v3630_v53, 0.0  ;;  %v9731_v41 = vld [vmem:[#allocation16 + $0x2c] ss:$16 sps:$4 sm:$0xff]   ;;  %v8440_v44 = vcombine.high %v3720_v39, %v3724_v40  ;;  %v8439_v51 = vcombine.low %v3720_v39, %v3724_v40  ;;  %v9732_v13 = vld [vmem:[#allocation16 + $0x48] ss:$16 sps:$4 sm:$0xff]  }
 0x607   :  { %v10931_v58 = vpack.c.bf16 %v3633_v47, %v3633_v47  ;;  %7321 = vmatprep.subr.bf16.mxu0 %v9731_v41  ;;  %v3728_v45 = vld [vmem:[#allocation12 + $0x2c8] sm:$0xff] }
 0x608   :  { %v10929_v56 = vpack.c.bf16 %v3634_v54, %v3634_v54  ;;  %5247 = vmatpush1.bf16.msra.mxu1 %v8605_v46  ;;  %v3732_v48 = vld [vmem:[#allocation12 + $0x2e8] sm:$0xff] }
 0x609   :  { %5257 = vmatprep.subr.bf16.mxu1 %v8360_v49  ;;  %7322 = vmatpush1.bf16.msra.mxu0 %v9729_v43  ;;  %v8448_v52 = vcombine.high %v3728_v45, %v3732_v48  ;;  %v3736_v53 = vld [vmem:[#allocation12 + $0x308] sm:$0xff]  ;;  %v8447_v49 = vcombine.low %v3728_v45, %v3732_v48 }
 0x60a   :  { %5248 = vmatprep.mubr.bf16.mxu1 %v10929_v56  ;;  %7323 = vmatprep.subr.bf16.mxu0 %v9734_v50  ;;  %v3740_v46 = vld [vmem:[#allocation12 + $0x328] sm:$0xff] }
 0x60b   :  { %5249 = vmatmul.mubr.bf16.vlgmr.msra.gmra.mrb[8].mxu1 %v10931_v58  ;;  %v9737_v47 = vld [vmem:[#allocation16 + $0x6c] ss:$16 sps:$4 sm:$0xff]   ;;  %v9735_v54 = vld [vmem:[#allocation16 + $0x68] ss:$16 sps:$4 sm:$0xff]   ;;  %v8456_v55 = vcombine.high %v3736_v53, %v3740_v46  ;;  %v8455_v60 = vcombine.low %v3736_v53, %v3740_v46 }
 0x60c   :  { %5258 = vmatpush1.bf16.msra.mxu1 %v8359_v57  ;;  %5289 = vmatprep.mubr.bf16.mxu1 %v10906_v34  ;;  %v3748_v57 = vld [vmem:[#allocation12 + $0x368] sm:$0xff] }
 0x60d   :  { %5259 = vmatprep.subr.bf16.mxu1 %v8368_v59  ;;  %7324 = vmatpush1.bf16.msra.mxu0 %v9732_v13  ;;  %v9740_v59 = vld [vmem:[#allocation16 + $0x8c] ss:$16 sps:$4 sm:$0xff]  }
 0x60e   :  { %7325 = vmatprep.subr.bf16.mxu0 %v9737_v47  ;;  %v3788_v31 = vld [vmem:[#allocation12 + $0x4a8] sm:$0xff] }
 0x60f   :  { %v9755_v32 = vld [vmem:[#allocation16 + $0x12c] ss:$16 sps:$4 sm:$0xff]  }
 0x610   :  { %5260 = vmatpush1.bf16.msra.mxu1 %v8367_v62  ;;  %v8464_v62 = vcombine.high %v3744_v14, %v3748_v57  ;;  %v3796_v39 = vld [vmem:[#allocation12 + $0x4e8] sm:$0xff] }
 0x611   :  { %5261 = vmatprep.subr.bf16.mxu1 %v8376_v63  ;;  %7326 = vmatpush1.bf16.msra.mxu0 %v9735_v54  ;;  %v3752_v63 = vld [vmem:[#allocation12 + $0x388] sm:$0xff] }
 0x612   :  { %7327 = vmatprep.subr.bf16.mxu0 %v9740_v59  ;;  %v8472_v4 = vcombine.high %v3752_v63, %v3756_v0  ;;  %v8471_v8 = vcombine.low %v3752_v63, %v3756_v0  ;;  %v9758_v40 = vld [vmem:[#allocation16 + $0x14c] ss:$16 sps:$4 sm:$0xff]  }
 0x613   :  { %v3804_v45 = vld [vmem:[#allocation12 + $0x528] sm:$0xff] }
 0x614   :  { %5262 = vmatpush1.bf16.msra.mxu1 %v8375_v2  ;;  %v8463_v2 = vcombine.low %v3744_v14, %v3748_v57  ;;  %v9761_v48 = vld [vmem:[#allocation16 + $0x16c] ss:$16 sps:$4 sm:$0xff]  }
 0x615   :  { %5263 = vmatprep.subr.bf16.mxu1 %v8384_v3  ;;  %7328 = vmatpush1.bf16.msra.mxu0 %v9738_v61  ;;  %v9741_v3 = vld [vmem:[#allocation16 + $0xa8] ss:$16 sps:$4 sm:$0xff]   ;;  %v9764_v46 = vld [vmem:[#allocation16 + $0x18c] ss:$16 sps:$4 sm:$0xff]  }
 0x616   :  { %7329 = vmatprep.subr.bf16.mxu0 %v9743_v1  ;;  %v3812_v53 = vld [vmem:[#allocation12 + $0x568] sm:$0xff] }
 0x617   :  { %v3820_v14 = vld [vmem:[#allocation12 + $0x5a8] sm:$0xff] }
 0x618   :  { %5264 = vmatpush1.bf16.msra.mxu1 %v8383_v6  ;;  %v3764_v6 = vld [vmem:[#allocation12 + $0x3e8] sm:$0xff] }
 0x619   :  { %5265 = vmatprep.subr.bf16.mxu1 %v8392_v7  ;;  %7330 = vmatpush1.bf16.msra.mxu0 %v9741_v3  ;;  %v9746_v7 = vld [vmem:[#allocation16 + $0xcc] ss:$16 sps:$4 sm:$0xff]  }
 0x61a   :  { %7331 = vmatprep.subr.bf16.mxu0 %v9746_v7  ;;  %v9767_v57 = vld [vmem:[#allocation16 + $0x1ac] ss:$16 sps:$4 sm:$0xff]  }
 0x61b   :  { %v3828_v63 = vld [vmem:[#allocation12 + $0x5e8] sm:$0xff] }
 0x61c   :  { %5266 = vmatpush1.bf16.msra.mxu1 %v8391_v10  ;;  %v8480_v10 = vcombine.high %v3760_v5, %v3764_v6  ;;  %v9770_v0 = vld [vmem:[#allocation16 + $0x1cc] ss:$16 sps:$4 sm:$0xff]  }
 0x61d   :  { %5267 = vmatprep.subr.bf16.mxu1 %v8400_v11  ;;  %v3768_v11 = vld [vmem:[#allocation12 + $0x408] sm:$0xff]  ;;  %7332 = vmatpush1.bf16.msra.mxu0 %v9744_v9 }
 0x61e   :  { %v8488_v20 = vcombine.high %v3768_v11, %v3772_v12  ;;  %7333 = vmatprep.subr.bf16.mxu0 %v9749_v15  ;;  %v8487_v25 = vcombine.low %v3768_v11, %v3772_v12  ;;  %v3844_v11 = vld [vmem:[#allocation12 + $0x668] sm:$0xff] }
 0x620   :  { %5268 = vmatpush1.bf16.msra.mxu1 %v8399_v16  ;;  %v8479_v16 = vcombine.low %v3760_v5, %v3764_v6  ;;  %v3836_v5 = vld [vmem:[#allocation12 + $0x628] sm:$0xff] }
 0x621   :  { %5269 = vmatprep.subr.bf16.mxu1 %v8408_v17  ;;  %v9747_v17 = vld [vmem:[#allocation16 + $0xe8] ss:$16 sps:$4 sm:$0xff]   ;;  %v9773_v6 = vld [vmem:[#allocation16 + $0x1ec] ss:$16 sps:$4 sm:$0xff]  }
 0x622   :  { %7334 = vmatpush1.bf16.msra.mxu0 %v9747_v17  ;;  %v3852_v17 = vld [vmem:[#allocation12 + $0x6a8] sm:$0xff] }
 0x624   :  { %5270 = vmatpush1.bf16.msra.mxu1 %v8407_v23  ;;  %v3780_v23 = vld [vmem:[#allocation12 + $0x468] sm:$0xff] }
 0x625   :  { %5271 = vmatprep.subr.bf16.mxu1 %v8416_v24  ;;  %v9752_v24 = vld [vmem:[#allocation16 + $0x10c] ss:$16 sps:$4 sm:$0xff]   ;;  %v8495_v33 = vcombine.low %v3776_v22, %v3780_v23 }
 0x626   :  { %7335 = vmatprep.subr.bf16.mxu0 %v9752_v24  ;;  %v3860_v24 = vld [vmem:[#allocation12 + $0x6e8] sm:$0xff] }
 0x627   :  { %7336 = vmatpush1.bf16.msra.mxu0 %v9750_v28 }
 0x628   :  { %5272 = vmatpush1.bf16.msra.mxu1 %v8415_v29  ;;  %v8496_v29 = vcombine.high %v3776_v22, %v3780_v23  ;;  %7337 = vmatprep.subr.bf16.mxu0 %v9755_v32  ;;  %v3856_v23 = vld [vmem:[#allocation12 + $0x6c8] sm:$0xff] }
 0x629   :  { %5273 = vmatprep.subr.bf16.mxu1 %v8424_v30  ;;  %v3784_v30 = vld [vmem:[#allocation12 + $0x488] sm:$0xff]  ;;  %v8576_v28 = vcombine.high %v3856_v23, %v3860_v24 }
 0x62a   :  { %v8504_v37 = vcombine.high %v3784_v30, %v3788_v31  ;;  %v8503_v41 = vcombine.low %v3784_v30, %v3788_v31  ;;  %v3868_v30 = vld [vmem:[#allocation12 + $0x728] sm:$0xff]  ;;  %v8575_v31 = vcombine.low %v3856_v23, %v3860_v24  ;;  %v3713_v24 = vld [vmem:[#allocation12 + $0x250] sm:$0xff] }
 0x62c   :  { %5274 = vmatpush1.bf16.msra.mxu1 %v8423_v36  ;;  %v9753_v36 = vld [vmem:[#allocation16 + $0x128] ss:$16 sps:$4 sm:$0xff]  }
 0x62d   :  { %5275 = vmatprep.subr.bf16.mxu1 %v8432_v38  ;;  %v3792_v38 = vld [vmem:[#allocation12 + $0x4c8] sm:$0xff]  ;;  %7338 = vmatpush1.bf16.msra.mxu0 %v9753_v36 }
 0x62e   :  { %v8512_v43 = vcombine.high %v3792_v38, %v3796_v39  ;;  %7339 = vmatprep.subr.bf16.mxu0 %v9758_v40  ;;  %v8511_v50 = vcombine.low %v3792_v38, %v3796_v39  ;;  %v3876_v36 = vld [vmem:[#allocation12 + $0x768] sm:$0xff] }
 0x62f   :  { %v3880_v39 = vld [vmem:[#allocation12 + $0x788] sm:$0xff] }
 0x630   :  { %5276 = vmatpush1.bf16.msra.mxu1 %v8431_v42  ;;  %v9756_v42 = vld [vmem:[#allocation16 + $0x148] ss:$16 sps:$4 sm:$0xff]  }
 0x631   :  { %5277 = vmatprep.subr.bf16.mxu1 %v8440_v44  ;;  %v3800_v44 = vld [vmem:[#allocation12 + $0x508] sm:$0xff]  ;;  %7340 = vmatpush1.bf16.msra.mxu0 %v9756_v42 }
 0x632   :  { %v8520_v13 = vcombine.high %v3800_v44, %v3804_v45  ;;  %7341 = vmatprep.subr.bf16.mxu0 %v9761_v48  ;;  %v8519_v47 = vcombine.low %v3800_v44, %v3804_v45  ;;  %v3884_v40 = vld [vmem:[#allocation12 + $0x7a8] sm:$0xff] }
 0x633   :  { %v8600_v42 = vcombine.high %v3880_v39, %v3884_v40  ;;  %v3892_v44 = vld [vmem:[#allocation12 + $0x7e8] sm:$0xff]  ;;  %v8599_v45 = vcombine.low %v3880_v39, %v3884_v40 }
 0x634   :  { %5278 = vmatpush1.bf16.msra.mxu1 %v8439_v51  ;;  %v9759_v51 = vld [vmem:[#allocation16 + $0x168] ss:$16 sps:$4 sm:$0xff]  }
 0x635   :  { %5279 = vmatprep.subr.bf16.mxu1 %v8448_v52  ;;  %v3808_v52 = vld [vmem:[#allocation12 + $0x548] sm:$0xff]  ;;  %7342 = vmatpush1.bf16.msra.mxu0 %v9759_v51  ;;  %v3645_v51 = vld [vmem:[#allocation12 + $0x30] sm:$0xff] }
 0x636   :  { %v8528_v54 = vcombine.high %v3808_v52, %v3812_v53  ;;  %7343 = vmatprep.subr.bf16.mxu0 %v9764_v46  ;;  %v8527_v59 = vcombine.low %v3808_v52, %v3812_v53  ;;  %v3649_v53 = vld [vmem:[#allocation12 + $0x50] sm:$0xff] }
 0x637   :  { %v3653_v46 = vld [vmem:[#allocation12 + $0x70] sm:$0xff] }
 0x638   :  { %5280 = vmatpush1.bf16.msra.mxu1 %v8447_v49  ;;  %v9762_v49 = vld [vmem:[#allocation16 + $0x188] ss:$16 sps:$4 sm:$0xff]  }
 0x639   :  { %5281 = vmatprep.subr.bf16.mxu1 %v8456_v55  ;;  %v3816_v55 = vld [vmem:[#allocation12 + $0x588] sm:$0xff]  ;;  %7344 = vmatpush1.bf16.msra.mxu0 %v9762_v49  ;;  %v8370_v49 = vcombine.high %v3649_v53, %v3653_v46 }
 0x63a   :  { %v8536_v61 = vcombine.high %v3816_v55, %v3820_v14  ;;  %7345 = vmatprep.subr.bf16.mxu0 %v9767_v57  ;;  %v8535_v1 = vcombine.low %v3816_v55, %v3820_v14  ;;  %v3661_v55 = vld [vmem:[#allocation12 + $0xb0] sm:$0xff]  ;;  %v8369_v14 = vcombine.low %v3649_v53, %v3653_v46 }
 0x63c   :  { %5282 = vmatpush1.bf16.msra.mxu1 %v8455_v60  ;;  %v9765_v60 = vld [vmem:[#allocation16 + $0x1a8] ss:$16 sps:$4 sm:$0xff]  }
 0x63d   :  { %5283 = vmatprep.subr.bf16.mxu1 %v8464_v62  ;;  %v3824_v62 = vld [vmem:[#allocation12 + $0x5c8] sm:$0xff]  ;;  %7346 = vmatpush1.bf16.msra.mxu0 %v9765_v60  ;;  %v3669_v60 = vld [vmem:[#allocation12 + $0xf0] sm:$0xff] }
 0x63e   :  { %v8544_v3 = vcombine.high %v3824_v62, %v3828_v63  ;;  %7347 = vmatprep.subr.bf16.mxu0 %v9770_v0  ;;  %v8543_v7 = vcombine.low %v3824_v62, %v3828_v63  ;;  %v3673_v63 = vld [vmem:[#allocation12 + $0x110] sm:$0xff] }
 0x63f   :  { %v3677_v0 = vld [vmem:[#allocation12 + $0x130] sm:$0xff] }
 0x640   :  { %5284 = vmatpush1.bf16.msra.mxu1 %v8463_v2  ;;  %v9768_v2 = vld [vmem:[#allocation16 + $0x1c8] ss:$16 sps:$4 sm:$0xff]  }
 0x641   :  { %5285 = vmatprep.subr.bf16.mxu1 %v8472_v4  ;;  %v3832_v4 = vld [vmem:[#allocation12 + $0x608] sm:$0xff]  ;;  %7348 = vmatpush1.bf16.msra.mxu0 %v9768_v2  ;;  %v8394_v2 = vcombine.high %v3673_v63, %v3677_v0 }
 0x642   :  { %v8552_v9 = vcombine.high %v3832_v4, %v3836_v5  ;;  %7349 = vmatprep.subr.bf16.mxu0 %v9773_v6  ;;  %v8551_v12 = vcombine.low %v3832_v4, %v3836_v5  ;;  %v3685_v4 = vld [vmem:[#allocation12 + $0x170] sm:$0xff]  ;;  %v8393_v5 = vcombine.low %v3673_v63, %v3677_v0 }
 0x644   :  { %5286 = vmatpush1.bf16.msra.mxu1 %v8471_v8  ;;  %v9771_v8 = vld [vmem:[#allocation16 + $0x1e8] ss:$16 sps:$4 sm:$0xff]  }
 0x645   :  { %5287 = vmatprep.subr.bf16.mxu1 %v8480_v10  ;;  %v3840_v10 = vld [vmem:[#allocation12 + $0x648] sm:$0xff]  ;;  %7350 = vmatpush1.bf16.msra.mxu0 %v9771_v8  ;;  %v3693_v8 = vld [vmem:[#allocation12 + $0x1b0] sm:$0xff] }
 0x646   :  { %v8560_v15 = vcombine.high %v3840_v10, %v3844_v11 }
 0x648   :  { %5288 = vmatpush1.bf16.msra.mxu1 %v8479_v16  ;;  %v3848_v16 = vld [vmem:[#allocation12 + $0x688] sm:$0xff] }
 0x649   :  { %5298 = vmatprep.subr.bf16.mxu1 %v8488_v20  ;;  %v8559_v20 = vcombine.low %v3840_v10, %v3844_v11  ;;  %v8568_v22 = vcombine.high %v3848_v16, %v3852_v17  ;;  %v3697_v11 = vld [vmem:[#allocation12 + $0x1d0] sm:$0xff] }
 0x64b   :  { %5290 = vmatmul.mubr.bf16.vlgmr.msra.gmra.mrb[12].mxu1 %v10908_v35 }
 0x64c   :  { %5299 = vmatpush1.bf16.msra.mxu1 %v8487_v25  ;;  %5330 = vmatprep.mubr.bf16.mxu1 %v10929_v56  ;;  %v8567_v25 = vcombine.low %v3848_v16, %v3852_v17  ;;  %v3705_v17 = vld [vmem:[#allocation12 + $0x210] sm:$0xff] }
 0x64d   :  { %5300 = vmatprep.subr.bf16.mxu1 %v8496_v29  ;;  %v3864_v29 = vld [vmem:[#allocation12 + $0x708] sm:$0xff] }
 0x64e   :  { %v8584_v32 = vcombine.high %v3864_v29, %v3868_v30 }
 0x650   :  { %5301 = vmatpush1.bf16.msra.mxu1 %v8495_v33  ;;  %v3872_v33 = vld [vmem:[#allocation12 + $0x748] sm:$0xff] }
 0x651   :  { %5302 = vmatprep.subr.bf16.mxu1 %v8504_v37  ;;  %v8583_v37 = vcombine.low %v3864_v29, %v3868_v30  ;;  %v8592_v38 = vcombine.high %v3872_v33, %v3876_v36 }
 0x654   :  { %5303 = vmatpush1.bf16.msra.mxu1 %v8503_v41  ;;  %v8591_v41 = vcombine.low %v3872_v33, %v3876_v36 }
 0x655   :  { %5304 = vmatprep.subr.bf16.mxu1 %v8512_v43  ;;  %v3888_v43 = vld [vmem:[#allocation12 + $0x7c8] sm:$0xff] }
 0x656   :  { %v8608_v48 = vcombine.high %v3888_v43, %v3892_v44 }
 0x658   :  { %5305 = vmatpush1.bf16.msra.mxu1 %v8511_v50  ;;  %v3641_v50 = vld [vmem:[#allocation12 + $0x10] sm:$0xff] }
 0x659   :  { %5306 = vmatprep.subr.bf16.mxu1 %v8520_v13  ;;  %v8607_v13 = vcombine.low %v3888_v43, %v3892_v44  ;;  %v8362_v52 = vcombine.high %v3641_v50, %v3645_v51 }
 0x65c   :  { %5307 = vmatpush1.bf16.msra.mxu1 %v8519_v47  ;;  %v8361_v47 = vcombine.low %v3641_v50, %v3645_v51 }
 0x65d   :  { %5308 = vmatprep.subr.bf16.mxu1 %v8528_v54  ;;  %v3657_v54 = vld [vmem:[#allocation12 + $0x90] sm:$0xff] }
 0x65e   :  { %v8378_v57 = vcombine.high %v3657_v54, %v3661_v55 }
 0x660   :  { %5309 = vmatpush1.bf16.msra.mxu1 %v8527_v59  ;;  %v3665_v59 = vld [vmem:[#allocation12 + $0xd0] sm:$0xff] }
 0x661   :  { %5310 = vmatprep.subr.bf16.mxu1 %v8536_v61  ;;  %v8377_v61 = vcombine.low %v3657_v54, %v3661_v55  ;;  %v8386_v62 = vcombine.high %v3665_v59, %v3669_v60 }
 0x664   :  { %5311 = vmatpush1.bf16.msra.mxu1 %v8535_v1  ;;  %v8385_v1 = vcombine.low %v3665_v59, %v3669_v60 }
 0x665   :  { %5312 = vmatprep.subr.bf16.mxu1 %v8544_v3  ;;  %v3681_v3 = vld [vmem:[#allocation12 + $0x150] sm:$0xff] }
 0x666   :  { %v8402_v6 = vcombine.high %v3681_v3, %v3685_v4 }
 0x668   :  { %5313 = vmatpush1.bf16.msra.mxu1 %v8543_v7  ;;  %v3689_v7 = vld [vmem:[#allocation12 + $0x190] sm:$0xff] }
 0x669   :  { %5314 = vmatprep.subr.bf16.mxu1 %v8552_v9  ;;  %v8401_v9 = vcombine.low %v3681_v3, %v3685_v4  ;;  %v8410_v10 = vcombine.high %v3689_v7, %v3693_v8 }
 0x66c   :  { %5315 = vmatpush1.bf16.msra.mxu1 %v8551_v12  ;;  %v3701_v12 = vld [vmem:[#allocation12 + $0x1f0] sm:$0xff] }
 0x66d   :  { %5316 = vmatprep.subr.bf16.mxu1 %v8560_v15  ;;  %v8409_v15 = vcombine.low %v3689_v7, %v3693_v8  ;;  %v8418_v16 = vcombine.high %v3697_v11, %v3701_v12 }
 0x670   :  { %5317 = vmatpush1.bf16.msra.mxu1 %v8559_v20  ;;  %v3709_v20 = vld [vmem:[#allocation12 + $0x230] sm:$0xff] }
 0x671   :  { %5318 = vmatprep.subr.bf16.mxu1 %v8568_v22  ;;  %v8417_v22 = vcombine.low %v3697_v11, %v3701_v12  ;;  %v8426_v23 = vcombine.high %v3705_v17, %v3709_v20  ;;  %v8425_v29 = vcombine.low %v3705_v17, %v3709_v20  ;;  %v10942_v20 = vld [vmem:[#allocation13] sm:$0xff] }
 0x674   :  { %5319 = vmatpush1.bf16.msra.mxu1 %v8567_v25  ;;  %v3717_v25 = vld [vmem:[#allocation12 + $0x270] sm:$0xff] }
 0x675   :  { %5320 = vmatprep.subr.bf16.mxu1 %v8576_v28  ;;  %v9776_v28 = vld [vmem:[#allocation16 + $0x20c] ss:$16 sps:$4 sm:$0xff]   ;;  %v8434_v30 = vcombine.high %v3713_v24, %v3717_v25  ;;  %v8433_v33 = vcombine.low %v3713_v24, %v3717_v25  ;;  %v3817_v24 = vld [vmem:[#allocation12 + $0x590] sm:$0xff] }
 0x676   :  { %7360 = vmatprep.subr.bf16.mxu0 %v9776_v28  ;;  %v3821_v25 = vld [vmem:[#allocation12 + $0x5b0] sm:$0xff]  ;;  %v5508_v28 = vrot.slane %v10942_v20, %v10873_v19 }
 0x678   :  { %5321 = vmatpush1.bf16.msra.mxu1 %v8575_v31  ;;  %v3721_v31 = vld [vmem:[#allocation12 + $0x290] sm:$0xff] }
 0x679   :  { %5322 = vmatprep.subr.bf16.mxu1 %v8584_v32  ;;  %v3725_v32 = vld [vmem:[#allocation12 + $0x2b0] sm:$0xff] }
 0x67a   :  { %v8442_v36 = vcombine.high %v3721_v31, %v3725_v32  ;;  %v8441_v39 = vcombine.low %v3721_v31, %v3725_v32  ;;  %v8538_v32 = vcombine.high %v3817_v24, %v3821_v25 }
 0x67c   :  { %5323 = vmatpush1.bf16.msra.mxu1 %v8583_v37  ;;  %v3729_v37 = vld [vmem:[#allocation12 + $0x2d0] sm:$0xff] }
 0x67d   :  { %5324 = vmatprep.subr.bf16.mxu1 %v8592_v38  ;;  %v3733_v38 = vld [vmem:[#allocation12 + $0x2f0] sm:$0xff] }
 0x67e   :  { %v8450_v40 = vcombine.high %v3729_v37, %v3733_v38  ;;  %v8449_v43 = vcombine.low %v3729_v37, %v3733_v38  ;;  %v3825_v37 = vld [vmem:[#allocation12 + $0x5d0] sm:$0xff] }
 0x67f   :  { %v3829_v38 = vld [vmem:[#allocation12 + $0x5f0] sm:$0xff] }
 0x680   :  { %5325 = vmatpush1.bf16.msra.mxu1 %v8591_v41  ;;  %v3737_v41 = vld [vmem:[#allocation12 + $0x310] sm:$0xff] }
 0x681   :  { %5326 = vmatprep.subr.bf16.mxu1 %v8600_v42  ;;  %v3741_v42 = vld [vmem:[#allocation12 + $0x330] sm:$0xff] }
 0x682   :  { %v8458_v44 = vcombine.high %v3737_v41, %v3741_v42  ;;  %v8457_v50 = vcombine.low %v3737_v41, %v3741_v42 }
 0x684   :  { %5327 = vmatpush1.bf16.msra.mxu1 %v8599_v45  ;;  %v3745_v45 = vld [vmem:[#allocation12 + $0x350] sm:$0xff] }
 0x685   :  { %5328 = vmatprep.subr.bf16.mxu1 %v8608_v48  ;;  %v3749_v48 = vld [vmem:[#allocation12 + $0x370] sm:$0xff] }
 0x686   :  { %v8466_v51 = vcombine.high %v3745_v45, %v3749_v48  ;;  %v8465_v53 = vcombine.low %v3745_v45, %v3749_v48  ;;  %v8546_v48 = vcombine.high %v3825_v37, %v3829_v38 }
 0x688   :  { %5329 = vmatpush1.bf16.msra.mxu1 %v8607_v13  ;;  %v3753_v13 = vld [vmem:[#allocation12 + $0x390] sm:$0xff] }
 0x689   :  { %5339 = vmatprep.subr.bf16.mxu1 %v8362_v52  ;;  %v3757_v52 = vld [vmem:[#allocation12 + $0x3b0] sm:$0xff] }
 0x68a   :  { %v8474_v46 = vcombine.high %v3753_v13, %v3757_v52  ;;  %v8473_v54 = vcombine.low %v3753_v13, %v3757_v52  ;;  %v3837_v13 = vld [vmem:[#allocation12 + $0x630] sm:$0xff] }
 0x68b   :  { %5331 = vmatmul.mubr.bf16.vlgmr.msra.gmra.mrb[12].mxu1 %v10931_v58 }
 0x68c   :  { %5340 = vmatpush1.bf16.msra.mxu1 %v8361_v47  ;;  %5371 = vmatprep.mubr.bf16.mxu1 %v10906_v34  ;;  %v3761_v47 = vld [vmem:[#allocation12 + $0x3d0] sm:$0xff] }
 0x68d   :  { %5341 = vmatprep.subr.bf16.mxu1 %v8370_v49  ;;  %v3765_v49 = vld [vmem:[#allocation12 + $0x3f0] sm:$0xff] }
 0x68e   :  { %v8482_v55 = vcombine.high %v3761_v47, %v3765_v49  ;;  %v8481_v59 = vcombine.low %v3761_v47, %v3765_v49 }
 0x690   :  { %5342 = vmatpush1.bf16.msra.mxu1 %v8369_v14  ;;  %v3769_v14 = vld [vmem:[#allocation12 + $0x410] sm:$0xff] }
 0x691   :  { %5343 = vmatprep.subr.bf16.mxu1 %v8378_v57  ;;  %v3773_v57 = vld [vmem:[#allocation12 + $0x430] sm:$0xff] }
 0x692   :  { %v8490_v60 = vcombine.high %v3769_v14, %v3773_v57  ;;  %v8489_v63 = vcombine.low %v3769_v14, %v3773_v57  ;;  %v9774_v14 = vld [vmem:[#allocation16 + $0x208] ss:$16 sps:$4 sm:$0xff]  }
 0x694   :  { %5344 = vmatpush1.bf16.msra.mxu1 %v8377_v61  ;;  %v3777_v61 = vld [vmem:[#allocation12 + $0x450] sm:$0xff] }
 0x695   :  { %5345 = vmatprep.subr.bf16.mxu1 %v8386_v62  ;;  %v3781_v62 = vld [vmem:[#allocation12 + $0x470] sm:$0xff] }
 0x696   :  { %v8498_v0 = vcombine.high %v3777_v61, %v3781_v62  ;;  %v8497_v3 = vcombine.low %v3777_v61, %v3781_v62  ;;  %v3849_v62 = vld [vmem:[#allocation12 + $0x690] sm:$0xff] }
 0x698   :  { %5346 = vmatpush1.bf16.msra.mxu1 %v8385_v1  ;;  %v3785_v1 = vld [vmem:[#allocation12 + $0x490] sm:$0xff] }
 0x699   :  { %5347 = vmatprep.subr.bf16.mxu1 %v8394_v2  ;;  %v3789_v2 = vld [vmem:[#allocation12 + $0x4b0] sm:$0xff] }
 0x69a   :  { %v8506_v4 = vcombine.high %v3785_v1, %v3789_v2  ;;  %v8505_v7 = vcombine.low %v3785_v1, %v3789_v2  ;;  %v9782_v1 = vld [vmem:[#allocation16 + $0x24c] ss:$16 sps:$4 sm:$0xff]  }
 0x69c   :  { %5348 = vmatpush1.bf16.msra.mxu1 %v8393_v5  ;;  %v3793_v5 = vld [vmem:[#allocation12 + $0x4d0] sm:$0xff] }
 0x69d   :  { %5349 = vmatprep.subr.bf16.mxu1 %v8402_v6  ;;  %v3797_v6 = vld [vmem:[#allocation12 + $0x4f0] sm:$0xff] }
 0x69e   :  { %v8514_v8 = vcombine.high %v3793_v5, %v3797_v6  ;;  %v8513_v11 = vcombine.low %v3793_v5, %v3797_v6  ;;  %v3861_v5 = vld [vmem:[#allocation12 + $0x6f0] sm:$0xff]  ;;  %v9780_v6 = vld [vmem:[#allocation16 + $0x248] ss:$16 sps:$4 sm:$0xff]  }
 0x6a0   :  { %5350 = vmatpush1.bf16.msra.mxu1 %v8401_v9  ;;  %v3801_v9 = vld [vmem:[#allocation12 + $0x510] sm:$0xff] }
 0x6a1   :  { %5351 = vmatprep.subr.bf16.mxu1 %v8410_v10  ;;  %v3805_v10 = vld [vmem:[#allocation12 + $0x530] sm:$0xff] }
 0x6a2   :  { %v8522_v12 = vcombine.high %v3801_v9, %v3805_v10  ;;  %v8521_v17 = vcombine.low %v3801_v9, %v3805_v10  ;;  %v3865_v10 = vld [vmem:[#allocation12 + $0x710] sm:$0xff] }
 0x6a4   :  { %5352 = vmatpush1.bf16.msra.mxu1 %v8409_v15  ;;  %v3809_v15 = vld [vmem:[#allocation12 + $0x550] sm:$0xff] }
 0x6a5   :  { %5353 = vmatprep.subr.bf16.mxu1 %v8418_v16  ;;  %v3813_v16 = vld [vmem:[#allocation12 + $0x570] sm:$0xff] }
 0x6a8   :  { %5354 = vmatpush1.bf16.msra.mxu1 %v8417_v22  ;;  %v8530_v22 = vcombine.high %v3809_v15, %v3813_v16 }
 0x6a9   :  { %5355 = vmatprep.subr.bf16.mxu1 %v8426_v23  ;;  %v10944_v23 = vld [vmem:[#allocation15] sm:$0xff] }
 0x6aa   :  { %v5558_v31 = vrot.slane %v10944_v23, %v10873_v19 }
 0x6ac   :  { %5356 = vmatpush1.bf16.msra.mxu1 %v8425_v29  ;;  %v5512_v29 = vrot.slane %v10942_v20, %v10876_v21 }
 0x6ad   :  { %5357 = vmatprep.subr.bf16.mxu1 %v8434_v30  ;;  %v8529_v30 = vcombine.low %v3809_v15, %v3813_v16  ;;  %v9788_v15 = vld [vmem:[#allocation16 + $0x28c] ss:$16 sps:$4 sm:$0xff]  }
 0x6b0   :  { %5358 = vmatpush1.bf16.msra.mxu1 %v8433_v33 }
 0x6b1   :  { %5359 = vmatprep.subr.bf16.mxu1 %v8442_v36  ;;  %v5562_v36 = vrot.slane %v10944_v23, %v10876_v21 }
 0x6b4   :  { %5360 = vmatpush1.bf16.msra.mxu1 %v8441_v39 }
 0x6b5   :  { %5361 = vmatprep.subr.bf16.mxu1 %v8450_v40 }
 0x6b8   :  { %5362 = vmatpush1.bf16.msra.mxu1 %v8449_v43  ;;  %v8537_v43 = vcombine.low %v3817_v24, %v3821_v25  ;;  %v3877_v24 = vld [vmem:[#allocation12 + $0x770] sm:$0xff]  ;;  %v9786_v25 = vld [vmem:[#allocation16 + $0x288] ss:$16 sps:$4 sm:$0xff]  }
 0x6b9   :  { %5363 = vmatprep.subr.bf16.mxu1 %v8458_v44 }
 0x6bc   :  { %5364 = vmatpush1.bf16.msra.mxu1 %v8457_v50 }
 0x6bd   :  { %5365 = vmatprep.subr.bf16.mxu1 %v8466_v51  ;;  %v3833_v51 = vld [vmem:[#allocation12 + $0x610] sm:$0xff] }
 0x6be   :  { %v8554_v47 = vcombine.high %v3833_v51, %v3837_v13 }
 0x6c0   :  { %5366 = vmatpush1.bf16.msra.mxu1 %v8465_v53 }
 0x6c1   :  { %5367 = vmatprep.subr.bf16.mxu1 %v8474_v46  ;;  %v8545_v46 = vcombine.low %v3825_v37, %v3829_v38 }
 0x6c4   :  { %5368 = vmatpush1.bf16.msra.mxu1 %v8473_v54  ;;  %v3841_v54 = vld [vmem:[#allocation12 + $0x650] sm:$0xff] }
 0x6c5   :  { %5369 = vmatprep.subr.bf16.mxu1 %v8482_v55  ;;  %v3845_v55 = vld [vmem:[#allocation12 + $0x670] sm:$0xff] }
 0x6c6   :  { %v8562_v61 = vcombine.high %v3841_v54, %v3845_v55  ;;  %v8561_v2 = vcombine.low %v3841_v54, %v3845_v55  ;;  %v9803_v54 = vld [vmem:[#allocation16 + $0x32c] ss:$16 sps:$4 sm:$0xff]  }
 0x6c8   :  { %5370 = vmatpush1.bf16.msra.mxu1 %v8481_v59  ;;  %v9779_v59 = vld [vmem:[#allocation16 + $0x22c] ss:$16 sps:$4 sm:$0xff]  }
 0x6c9   :  { %5380 = vmatprep.subr.bf16.mxu1 %v8490_v60  ;;  %v8553_v60 = vcombine.low %v3833_v51, %v3837_v13  ;;  %v9800_v51 = vld [vmem:[#allocation16 + $0x30c] ss:$16 sps:$4 sm:$0xff]  }
 0x6cb   :  { %5372 = vmatmul.mubr.bf16.vlgmr.msra.gmra.mrb[16].mxu1 %v10908_v35 }
 0x6cc   :  { %5381 = vmatpush1.bf16.msra.mxu1 %v8489_v63  ;;  %5412 = vmatprep.mubr.bf16.mxu1 %v10929_v56  ;;  %v3853_v63 = vld [vmem:[#allocation12 + $0x6b0] sm:$0xff] }
 0x6cd   :  { %5382 = vmatprep.subr.bf16.mxu1 %v8498_v0  ;;  %v9777_v0 = vld [vmem:[#allocation16 + $0x228] ss:$16 sps:$4 sm:$0xff]  }
 0x6d0   :  { %5383 = vmatpush1.bf16.msra.mxu1 %v8497_v3  ;;  %v8570_v3 = vcombine.high %v3849_v62, %v3853_v63 }
 0x6d1   :  { %5384 = vmatprep.subr.bf16.mxu1 %v8506_v4  ;;  %v3857_v4 = vld [vmem:[#allocation12 + $0x6d0] sm:$0xff] }
 0x6d2   :  { %v8578_v9 = vcombine.high %v3857_v4, %v3861_v5  ;;  %v8577_v16 = vcombine.low %v3857_v4, %v3861_v5  ;;  %v9809_v4 = vld [vmem:[#allocation16 + $0x36c] ss:$16 sps:$4 sm:$0xff]  }
 0x6d4   :  { %5385 = vmatpush1.bf16.msra.mxu1 %v8505_v7  ;;  %v9785_v7 = vld [vmem:[#allocation16 + $0x26c] ss:$16 sps:$4 sm:$0xff]  }
 0x6d5   :  { %5386 = vmatprep.subr.bf16.mxu1 %v8514_v8  ;;  %v8569_v8 = vcombine.low %v3849_v62, %v3853_v63  ;;  %v9806_v62 = vld [vmem:[#allocation16 + $0x34c] ss:$16 sps:$4 sm:$0xff]  }
 0x6d8   :  { %5387 = vmatpush1.bf16.msra.mxu1 %v8513_v11  ;;  %v3869_v11 = vld [vmem:[#allocation12 + $0x730] sm:$0xff] }
 0x6d9   :  { %5388 = vmatprep.subr.bf16.mxu1 %v8522_v12  ;;  %v9783_v12 = vld [vmem:[#allocation16 + $0x268] ss:$16 sps:$4 sm:$0xff]  }
 0x6dc   :  { %5389 = vmatpush1.bf16.msra.mxu1 %v8521_v17  ;;  %v8586_v17 = vcombine.high %v3865_v10, %v3869_v11 }
 0x6dd   :  { %5390 = vmatprep.subr.bf16.mxu1 %v8530_v22  ;;  %v3873_v22 = vld [vmem:[#allocation12 + $0x750] sm:$0xff] }
 0x6de   :  { %v5250_v33 = vpop.f32.mrb[8].mxu1  ;;  %v8593_v37 = vcombine.low %v3873_v22, %v3877_v24 }
 0x6df   :  { %v5545_v39 = vmul.f32 %v5508_v28, %v5250_v33  ;;  %v5252_v40 = vpop.f32.mrb[9].mxu1  ;;  %v9791_v28 = vld [vmem:[#allocation16 + $0x2ac] ss:$16 sps:$4 sm:$0xff]   ;;  %v9789_v33 = vld [vmem:[#allocation16 + $0x2a8] ss:$16 sps:$4 sm:$0xff]  }
 0x6e0   :  { %v5546_v41 = vmul.f32 %v5512_v29, %v5252_v40  ;;  %v5254_v42 = vpop.f32.mrb[10].mxu1  ;;  %5391 = vmatpush1.bf16.msra.mxu1 %v8529_v30  ;;  %v8585_v29 = vcombine.low %v3865_v10, %v3869_v11  ;;  %v8594_v30 = vcombine.high %v3873_v22, %v3877_v24  ;;  %v3893_v40 = vld [vmem:[#allocation12 + $0x7f0] sm:$0xff]  ;;  %v9812_v10 = vld [vmem:[#allocation16 + $0x38c] ss:$16 sps:$4 sm:$0xff]  }
 0x6e1   :  { %v5595_v44 = vadd.f32 %v5558_v31, %v5545_v39  ;;  %v5255_v45 = vpop.f32.mrb[11].mxu1  ;;  %5392 = vmatprep.subr.bf16.mxu1 %v8538_v32  ;;  %v3881_v31 = vld [vmem:[#allocation12 + $0x790] sm:$0xff]  ;;  %v9797_v42 = vld [vmem:[#allocation16 + $0x2ec] ss:$16 sps:$4 sm:$0xff]  }
 0x6e2   :  { %v5596_v50 = vadd.f32 %v5562_v36, %v5546_v41  ;;  %v3885_v32 = vld [vmem:[#allocation12 + $0x7b0] sm:$0xff]  ;;  %v9794_v36 = vld [vmem:[#allocation16 + $0x2cc] ss:$16 sps:$4 sm:$0xff]   ;;  %v9792_v41 = vld [vmem:[#allocation16 + $0x2c8] ss:$16 sps:$4 sm:$0xff]  }
 0x6e3   :  { %v5603_v52 = vmax.f32 %v5595_v44, 0.0  ;;  %v8602_v38 = vcombine.high %v3881_v31, %v3885_v32  ;;  %v3889_v39 = vld [vmem:[#allocation12 + $0x7d0] sm:$0xff]  ;;  %v3642_v45 = vld [vmem:[#allocation12 + $0x18] sm:$0xff] }
 0x6e4   :  { %v5604_v53 = vmax.f32 %v5596_v50, 0.0  ;;  %5393 = vmatpush1.bf16.msra.mxu1 %v8537_v43  ;;  %v8601_v43 = vcombine.low %v3881_v31, %v3885_v32  ;;  %v8610_v44 = vcombine.high %v3889_v39, %v3893_v40  ;;  %v9795_v50 = vld [vmem:[#allocation16 + $0x2e8] ss:$16 sps:$4 sm:$0xff]   ;;  %v8609_v13 = vcombine.low %v3889_v39, %v3893_v40 }
 0x6e5   :  { %5394 = vmatprep.subr.bf16.mxu1 %v8546_v48  ;;  %v10956_v57 = vpack.c.bf16 %v5603_v52, %v5603_v52  ;;  %v3646_v48 = vld [vmem:[#allocation12 + $0x38] sm:$0xff] }
 0x6e6   :  { %v10954_v49 = vpack.c.bf16 %v5604_v53, %v5604_v53  ;;  %v8364_v52 = vcombine.high %v3642_v45, %v3646_v48  ;;  %v3650_v53 = vld [vmem:[#allocation12 + $0x58] sm:$0xff]  ;;  %v8363_v55 = vcombine.low %v3642_v45, %v3646_v48 }
 0x6e7   :  { %v3714_v48 = vld [vmem:[#allocation12 + $0x258] sm:$0xff] }
 0x6e8   :  { %5395 = vmatpush1.bf16.msra.mxu1 %v8545_v46  ;;  %7351 = vmatprep.mubr.bf16.mxu0 %v10954_v49  ;;  %v3654_v46 = vld [vmem:[#allocation12 + $0x78] sm:$0xff] }
 0x6e9   :  { %7352 = vmatmul.mubr.bf16.vlgmr.msra.gmra.mrb[4].mxu0 %v10956_v57  ;;  %5396 = vmatprep.subr.bf16.mxu1 %v8554_v47  ;;  %v9798_v47 = vld [vmem:[#allocation16 + $0x308] ss:$16 sps:$4 sm:$0xff]   ;;  %v8371_v63 = vcombine.low %v3650_v53, %v3654_v46 }
 0x6ea   :  { %7361 = vmatpush1.bf16.msra.mxu0 %v9774_v14  ;;  %v8372_v14 = vcombine.high %v3650_v53, %v3654_v46  ;;  %v3722_v53 = vld [vmem:[#allocation12 + $0x298] sm:$0xff] }
 0x6eb   :  { %7362 = vmatprep.subr.bf16.mxu0 %v9779_v59  ;;  %v3658_v59 = vld [vmem:[#allocation12 + $0x98] sm:$0xff] }
 0x6ec   :  { %5397 = vmatpush1.bf16.msra.mxu1 %v8553_v60  ;;  %v3662_v60 = vld [vmem:[#allocation12 + $0xb8] sm:$0xff] }
 0x6ed   :  { %5398 = vmatprep.subr.bf16.mxu1 %v8562_v61  ;;  %v9801_v61 = vld [vmem:[#allocation16 + $0x328] ss:$16 sps:$4 sm:$0xff]   ;;  %v8379_v5 = vcombine.low %v3658_v59, %v3662_v60 }
 0x6ee   :  { %7363 = vmatpush1.bf16.msra.mxu0 %v9777_v0  ;;  %v8380_v0 = vcombine.high %v3658_v59, %v3662_v60  ;;  %v3726_v46 = vld [vmem:[#allocation12 + $0x2b8] sm:$0xff] }
 0x6ef   :  { %7364 = vmatprep.subr.bf16.mxu0 %v9782_v1  ;;  %v3666_v1 = vld [vmem:[#allocation12 + $0xd8] sm:$0xff]  ;;  %v8443_v59 = vcombine.low %v3722_v53, %v3726_v46 }
 0x6f0   :  { %5399 = vmatpush1.bf16.msra.mxu1 %v8561_v2  ;;  %v3670_v2 = vld [vmem:[#allocation12 + $0xf8] sm:$0xff] }
 0x6f1   :  { %5400 = vmatprep.subr.bf16.mxu1 %v8570_v3  ;;  %v9804_v3 = vld [vmem:[#allocation16 + $0x348] ss:$16 sps:$4 sm:$0xff]  }
 0x6f2   :  { %7365 = vmatpush1.bf16.msra.mxu0 %v9780_v6  ;;  %v8388_v6 = vcombine.high %v3666_v1, %v3670_v2 }
 0x6f3   :  { %7366 = vmatprep.subr.bf16.mxu0 %v9785_v7  ;;  %v3674_v7 = vld [vmem:[#allocation12 + $0x118] sm:$0xff] }
 0x6f4   :  { %5401 = vmatpush1.bf16.msra.mxu1 %v8569_v8  ;;  %v3678_v8 = vld [vmem:[#allocation12 + $0x138] sm:$0xff] }
 0x6f5   :  { %5402 = vmatprep.subr.bf16.mxu1 %v8578_v9  ;;  %v9807_v9 = vld [vmem:[#allocation16 + $0x368] ss:$16 sps:$4 sm:$0xff]   ;;  %v8396_v11 = vcombine.high %v3674_v7, %v3678_v8  ;;  %v8395_v22 = vcombine.low %v3674_v7, %v3678_v8 }
 0x6f6   :  { %7367 = vmatpush1.bf16.msra.mxu0 %v9783_v12  ;;  %v3682_v12 = vld [vmem:[#allocation12 + $0x158] sm:$0xff] }
 0x6f7   :  { %7368 = vmatprep.subr.bf16.mxu0 %v9788_v15  ;;  %v3686_v15 = vld [vmem:[#allocation12 + $0x178] sm:$0xff] }
 0x6f8   :  { %5403 = vmatpush1.bf16.msra.mxu1 %v8577_v16  ;;  %v9810_v16 = vld [vmem:[#allocation16 + $0x388] ss:$16 sps:$4 sm:$0xff]   ;;  %v8404_v24 = vcombine.high %v3682_v12, %v3686_v15  ;;  %v8403_v31 = vcombine.low %v3682_v12, %v3686_v15 }
 0x6f9   :  { %5404 = vmatprep.subr.bf16.mxu1 %v8586_v17  ;;  %v9815_v17 = vld [vmem:[#allocation16 + $0x3ac] ss:$16 sps:$4 sm:$0xff]  }
 0x6fa   :  { %7369 = vmatpush1.bf16.msra.mxu0 %v9786_v25  ;;  %v3690_v25 = vld [vmem:[#allocation12 + $0x198] sm:$0xff] }
 0x6fb   :  { %7370 = vmatprep.subr.bf16.mxu0 %v9791_v28  ;;  %v3694_v28 = vld [vmem:[#allocation12 + $0x1b8] sm:$0xff] }
 0x6fc   :  { %5405 = vmatpush1.bf16.msra.mxu1 %v8585_v29  ;;  %v9813_v29 = vld [vmem:[#allocation16 + $0x3a8] ss:$16 sps:$4 sm:$0xff]   ;;  %v8412_v32 = vcombine.high %v3690_v25, %v3694_v28  ;;  %v8411_v39 = vcombine.low %v3690_v25, %v3694_v28 }
 0x6fd   :  { %5406 = vmatprep.subr.bf16.mxu1 %v8594_v30  ;;  %v9818_v30 = vld [vmem:[#allocation16 + $0x3cc] ss:$16 sps:$4 sm:$0xff]  }
 0x6fe   :  { %7371 = vmatpush1.bf16.msra.mxu0 %v9789_v33  ;;  %v3698_v33 = vld [vmem:[#allocation12 + $0x1d8] sm:$0xff] }
 0x6ff   :  { %7372 = vmatprep.subr.bf16.mxu0 %v9794_v36  ;;  %v3702_v36 = vld [vmem:[#allocation12 + $0x1f8] sm:$0xff] }
 0x700   :  { %5407 = vmatpush1.bf16.msra.mxu1 %v8593_v37  ;;  %v9816_v37 = vld [vmem:[#allocation16 + $0x3c8] ss:$16 sps:$4 sm:$0xff]   ;;  %v8420_v40 = vcombine.high %v3698_v33, %v3702_v36 }
 0x701   :  { %5408 = vmatprep.subr.bf16.mxu1 %v8602_v38  ;;  %v9821_v38 = vld [vmem:[#allocation16 + $0x3ec] ss:$16 sps:$4 sm:$0xff]  }
 0x702   :  { %7373 = vmatpush1.bf16.msra.mxu0 %v9792_v41  ;;  %v3706_v41 = vld [vmem:[#allocation12 + $0x218] sm:$0xff] }
 0x703   :  { %7374 = vmatprep.subr.bf16.mxu0 %v9797_v42  ;;  %v3710_v42 = vld [vmem:[#allocation12 + $0x238] sm:$0xff] }
 0x704   :  { %5409 = vmatpush1.bf16.msra.mxu1 %v8601_v43  ;;  %v9819_v43 = vld [vmem:[#allocation16 + $0x3e8] ss:$16 sps:$4 sm:$0xff]   ;;  %v8428_v45 = vcombine.high %v3706_v41, %v3710_v42 }
 0x705   :  { %5410 = vmatprep.subr.bf16.mxu1 %v8610_v44  ;;  %v8419_v44 = vcombine.low %v3698_v33, %v3702_v36  ;;  %v3770_v12 = vld [vmem:[#allocation12 + $0x418] sm:$0xff] }
 0x706   :  { %7375 = vmatpush1.bf16.msra.mxu0 %v9795_v50  ;;  %v3718_v50 = vld [vmem:[#allocation12 + $0x278] sm:$0xff] }
 0x707   :  { %7376 = vmatprep.subr.bf16.mxu0 %v9800_v51  ;;  %v9848_v51 = vld [vmem:[#allocation16 + $0x40c] ss:$16 sps:$4 sm:$0xff]  }
 0x708   :  { %5411 = vmatpush1.bf16.msra.mxu1 %v8609_v13  ;;  %v8427_v13 = vcombine.low %v3706_v41, %v3710_v42  ;;  %v3774_v15 = vld [vmem:[#allocation12 + $0x438] sm:$0xff] }
 0x709   :  { %5421 = vmatprep.subr.bf16.mxu1 %v8364_v52  ;;  %v8436_v52 = vcombine.high %v3714_v48, %v3718_v50  ;;  %v8491_v25 = vcombine.low %v3770_v12, %v3774_v15  ;;  %v3794_v33 = vld [vmem:[#allocation12 + $0x4d8] sm:$0xff] }
 0x70a   :  { %7377 = vmatpush1.bf16.msra.mxu0 %v9798_v47  ;;  %v8435_v47 = vcombine.low %v3714_v48, %v3718_v50  ;;  %v3798_v36 = vld [vmem:[#allocation12 + $0x4f8] sm:$0xff]  ;;  %v5516_v50 = vrot.slane %v10942_v20, %v10916_v26 }
 0x70b   :  { %5413 = vmatmul.mubr.bf16.vlgmr.msra.gmra.mrb[16].mxu1 %v10931_v58  ;;  %7378 = vmatprep.subr.bf16.mxu0 %v9803_v54  ;;  %v8444_v54 = vcombine.high %v3722_v53, %v3726_v46  ;;  %v8515_v41 = vcombine.low %v3794_v33, %v3798_v36  ;;  %v3822_v48 = vld [vmem:[#allocation12 + $0x5b8] sm:$0xff] }
 0x70c   :  { %5422 = vmatpush1.bf16.msra.mxu1 %v8363_v55  ;;  %5453 = vmatprep.mubr.bf16.mxu1 %v10906_v34  ;;  %v8387_v34 = vcombine.low %v3666_v1, %v3670_v2  ;;  %v3730_v55 = vld [vmem:[#allocation12 + $0x2d8] sm:$0xff] }
 0x70d   :  { %5423 = vmatprep.subr.bf16.mxu1 %v8372_v14  ;;  %v3734_v14 = vld [vmem:[#allocation12 + $0x2f8] sm:$0xff] }
 0x70e   :  { %7379 = vmatpush1.bf16.msra.mxu0 %v9801_v61  ;;  %v8452_v60 = vcombine.high %v3730_v55, %v3734_v14  ;;  %v3738_v61 = vld [vmem:[#allocation12 + $0x318] sm:$0xff] }
 0x70f   :  { %7380 = vmatprep.subr.bf16.mxu0 %v9806_v62  ;;  %v3742_v62 = vld [vmem:[#allocation12 + $0x338] sm:$0xff] }
 0x710   :  { %5424 = vmatpush1.bf16.msra.mxu1 %v8371_v63  ;;  %v8451_v63 = vcombine.low %v3730_v55, %v3734_v14  ;;  %v3746_v1 = vld [vmem:[#allocation12 + $0x358] sm:$0xff] }
 0x711   :  { %5425 = vmatprep.subr.bf16.mxu1 %v8380_v0  ;;  %v8460_v0 = vcombine.high %v3738_v61, %v3742_v62  ;;  %v3750_v2 = vld [vmem:[#allocation12 + $0x378] sm:$0xff] }
 0x712   :  { %7381 = vmatpush1.bf16.msra.mxu0 %v9804_v3  ;;  %v8459_v3 = vcombine.low %v3738_v61, %v3742_v62  ;;  %v8467_v7 = vcombine.low %v3746_v1, %v3750_v2  ;;  %v3830_v55 = vld [vmem:[#allocation12 + $0x5f8] sm:$0xff] }
 0x713   :  { %7382 = vmatprep.subr.bf16.mxu0 %v9809_v4  ;;  %v8468_v4 = vcombine.high %v3746_v1, %v3750_v2  ;;  %v3834_v2 = vld [vmem:[#allocation12 + $0x618] sm:$0xff] }
 0x714   :  { %5426 = vmatpush1.bf16.msra.mxu1 %v8379_v5  ;;  %v3754_v5 = vld [vmem:[#allocation12 + $0x398] sm:$0xff] }
 0x715   :  { %5427 = vmatprep.subr.bf16.mxu1 %v8388_v6  ;;  %v3758_v6 = vld [vmem:[#allocation12 + $0x3b8] sm:$0xff] }
 0x716   :  { %7383 = vmatpush1.bf16.msra.mxu0 %v9807_v9  ;;  %v8476_v8 = vcombine.high %v3754_v5, %v3758_v6  ;;  %v3762_v9 = vld [vmem:[#allocation12 + $0x3d8] sm:$0xff] }
 0x717   :  { %7384 = vmatprep.subr.bf16.mxu0 %v9812_v10  ;;  %v3766_v10 = vld [vmem:[#allocation12 + $0x3f8] sm:$0xff] }
 0x718   :  { %5428 = vmatpush1.bf16.msra.mxu1 %v8387_v34  ;;  %v8475_v34 = vcombine.low %v3754_v5, %v3758_v6 }
 0x719   :  { %5429 = vmatprep.subr.bf16.mxu1 %v8396_v11  ;;  %v8484_v11 = vcombine.high %v3762_v9, %v3766_v10 }
 0x71a   :  { %7385 = vmatpush1.bf16.msra.mxu0 %v9810_v16  ;;  %v8483_v16 = vcombine.low %v3762_v9, %v3766_v10  ;;  %v3846_v9 = vld [vmem:[#allocation12 + $0x678] sm:$0xff] }
 0x71b   :  { %7386 = vmatprep.subr.bf16.mxu0 %v9815_v17  ;;  %v8492_v17 = vcombine.high %v3770_v12, %v3774_v15  ;;  %v9846_v10 = vld [vmem:[#allocation16 + $0x408] ss:$16 sps:$4 sm:$0xff]  }
 0x71c   :  { %5430 = vmatpush1.bf16.msra.mxu1 %v8395_v22  ;;  %v3778_v22 = vld [vmem:[#allocation12 + $0x458] sm:$0xff] }
 0x71d   :  { %5431 = vmatprep.subr.bf16.mxu1 %v8404_v24  ;;  %v3782_v24 = vld [vmem:[#allocation12 + $0x478] sm:$0xff] }
 0x71e   :  { %7387 = vmatpush1.bf16.msra.mxu0 %v9813_v29  ;;  %v8500_v28 = vcombine.high %v3778_v22, %v3782_v24  ;;  %v3786_v29 = vld [vmem:[#allocation12 + $0x498] sm:$0xff] }
 0x71f   :  { %7388 = vmatprep.subr.bf16.mxu0 %v9818_v30  ;;  %v3790_v30 = vld [vmem:[#allocation12 + $0x4b8] sm:$0xff] }
 0x720   :  { %5432 = vmatpush1.bf16.msra.mxu1 %v8403_v31  ;;  %v8499_v31 = vcombine.low %v3778_v22, %v3782_v24  ;;  %v9852_v22 = vld [vmem:[#allocation16 + $0x428] ss:$16 sps:$4 sm:$0xff]   ;;  %v9860_v24 = vld [vmem:[#allocation16 + $0x44c] ss:$16 sps:$4 sm:$0xff]  }
 0x721   :  { %5433 = vmatprep.subr.bf16.mxu1 %v8412_v32  ;;  %v8508_v32 = vcombine.high %v3786_v29, %v3790_v30 }
 0x722   :  { %7389 = vmatpush1.bf16.msra.mxu0 %v9816_v37  ;;  %v8507_v37 = vcombine.low %v3786_v29, %v3790_v30  ;;  %v3858_v29 = vld [vmem:[#allocation12 + $0x6d8] sm:$0xff] }
 0x723   :  { %7390 = vmatprep.subr.bf16.mxu0 %v9821_v38  ;;  %v8516_v38 = vcombine.high %v3794_v33, %v3798_v36  ;;  %v3862_v30 = vld [vmem:[#allocation12 + $0x6f8] sm:$0xff] }
 0x724   :  { %5434 = vmatpush1.bf16.msra.mxu1 %v8411_v39  ;;  %v3802_v39 = vld [vmem:[#allocation12 + $0x518] sm:$0xff]  ;;  %v8580_v36 = vcombine.high %v3858_v29, %v3862_v30 }
 0x725   :  { %5435 = vmatprep.subr.bf16.mxu1 %v8420_v40  ;;  %v3806_v40 = vld [vmem:[#allocation12 + $0x538] sm:$0xff] }
 0x726   :  { %7391 = vmatpush1.bf16.msra.mxu0 %v9819_v43  ;;  %v8524_v42 = vcombine.high %v3802_v39, %v3806_v40  ;;  %v3810_v43 = vld [vmem:[#allocation12 + $0x558] sm:$0xff] }
 0x727   :  { %7401 = vmatprep.subr.bf16.mxu0 %v9848_v51  ;;  %v5520_v51 = vrot.slane %v10942_v20, %v10919_v27 }
 0x728   :  { %5436 = vmatpush1.bf16.msra.mxu1 %v8419_v44  ;;  %v8523_v44 = vcombine.low %v3802_v39, %v3806_v40  ;;  %v9864_v39 = vld [vmem:[#allocation16 + $0x468] ss:$16 sps:$4 sm:$0xff]   ;;  %v9872_v40 = vld [vmem:[#allocation16 + $0x48c] ss:$16 sps:$4 sm:$0xff]  }
 0x729   :  { %5437 = vmatprep.subr.bf16.mxu1 %v8428_v45  ;;  %v3818_v45 = vld [vmem:[#allocation12 + $0x598] sm:$0xff] }
 0x72a   :  { %v8540_v53 = vcombine.high %v3818_v45, %v3822_v48  ;;  %v8539_v62 = vcombine.low %v3818_v45, %v3822_v48 }
 0x72c   :  { %5438 = vmatpush1.bf16.msra.mxu1 %v8427_v13 }
 0x72d   :  { %5439 = vmatprep.subr.bf16.mxu1 %v8436_v52  ;;  %v5566_v52 = vrot.slane %v10944_v23, %v10916_v26 }
 0x730   :  { %5440 = vmatpush1.bf16.msra.mxu1 %v8435_v47  ;;  %v5570_v47 = vrot.slane %v10944_v23, %v10919_v27 }
 0x731   :  { %5441 = vmatprep.subr.bf16.mxu1 %v8444_v54  ;;  %v3826_v54 = vld [vmem:[#allocation12 + $0x5d8] sm:$0xff] }
 0x732   :  { %v8547_v6 = vcombine.low %v3826_v54, %v3830_v55 }
 0x734   :  { %5442 = vmatpush1.bf16.msra.mxu1 %v8443_v59 }
 0x735   :  { %5443 = vmatprep.subr.bf16.mxu1 %v8452_v60 }
 0x738   :  { %5444 = vmatpush1.bf16.msra.mxu1 %v8451_v63 }
 0x739   :  { %5445 = vmatprep.subr.bf16.mxu1 %v8460_v0  ;;  %v8548_v0 = vcombine.high %v3826_v54, %v3830_v55  ;;  %v3894_v54 = vld [vmem:[#allocation12 + $0x7f8] sm:$0xff] }
 0x73a   :  { %v9882_v55 = vld [vmem:[#allocation16 + $0x4c8] ss:$16 sps:$4 sm:$0xff]  }
 0x73c   :  { %5446 = vmatpush1.bf16.msra.mxu1 %v8459_v3  ;;  %v3838_v3 = vld [vmem:[#allocation12 + $0x638] sm:$0xff] }
 0x73d   :  { %5447 = vmatprep.subr.bf16.mxu1 %v8468_v4  ;;  %v8556_v23 = vcombine.high %v3834_v2, %v3838_v3  ;;  %v8555_v12 = vcombine.low %v3834_v2, %v3838_v3  ;;  %v9822_v2 = vld [vmem:[#allocation16] ss:$16 sps:$4 sm:$0xff]   ;;  %v9827_v3 = vld [vmem:[#allocation16 + $0x24] ss:$16 sps:$4 sm:$0xff]  }
 0x740   :  { %5448 = vmatpush1.bf16.msra.mxu1 %v8467_v7 }
 0x741   :  { %5449 = vmatprep.subr.bf16.mxu1 %v8476_v8  ;;  %v3842_v8 = vld [vmem:[#allocation12 + $0x658] sm:$0xff] }
 0x742   :  { %v8564_v15 = vcombine.high %v3842_v8, %v3846_v9 }
 0x744   :  { %5450 = vmatpush1.bf16.msra.mxu1 %v8475_v34 }
 0x745   :  { %5451 = vmatprep.subr.bf16.mxu1 %v8484_v11  ;;  %v9854_v11 = vld [vmem:[#allocation16 + $0x42c] ss:$16 sps:$4 sm:$0xff]  }
 0x748   :  { %5452 = vmatpush1.bf16.msra.mxu1 %v8483_v16  ;;  %v3850_v16 = vld [vmem:[#allocation12 + $0x698] sm:$0xff] }
 0x749   :  { %5462 = vmatprep.subr.bf16.mxu1 %v8492_v17  ;;  %v3854_v17 = vld [vmem:[#allocation12 + $0x6b8] sm:$0xff] }
 0x74a   :  { %v8571_v33 = vcombine.low %v3850_v16, %v3854_v17 }
 0x74b   :  { %5454 = vmatmul.mubr.bf16.vlgmr.msra.gmra.mrb[20].mxu1 %v10908_v35  ;;  %v3814_v35 = vld [vmem:[#allocation12 + $0x578] sm:$0xff] }
 0x74c   :  { %5463 = vmatpush1.bf16.msra.mxu1 %v8491_v25  ;;  %5494 = vmatprep.mubr.bf16.mxu1 %v10929_v56  ;;  %v8532_v56 = vcombine.high %v3810_v43, %v3814_v35  ;;  %v8531_v13 = vcombine.low %v3810_v43, %v3814_v35  ;;  %v8563_v25 = vcombine.low %v3842_v8, %v3846_v9  ;;  %v3874_v43 = vld [vmem:[#allocation12 + $0x758] sm:$0xff] }
 0x74d   :  { %5464 = vmatprep.subr.bf16.mxu1 %v8500_v28  ;;  %v8572_v28 = vcombine.high %v3850_v16, %v3854_v17  ;;  %v3878_v35 = vld [vmem:[#allocation12 + $0x778] sm:$0xff]  ;;  %v9836_v16 = vld [vmem:[#allocation16 + $0x84] ss:$16 sps:$4 sm:$0xff]  }
 0x74e   :  { %v8596_v48 = vcombine.high %v3874_v43, %v3878_v35  ;;  %v9906_v8 = vld [vmem:[#allocation16 + $0x548] ss:$16 sps:$4 sm:$0xff]   ;;  %v9914_v9 = vld [vmem:[#allocation16 + $0x56c] ss:$16 sps:$4 sm:$0xff]  }
 0x74f   :  { %v9926_v17 = vld [vmem:[#allocation16 + $0x5ac] ss:$16 sps:$4 sm:$0xff]  }
 0x750   :  { %5465 = vmatpush1.bf16.msra.mxu1 %v8499_v31  ;;  %v9858_v31 = vld [vmem:[#allocation16 + $0x448] ss:$16 sps:$4 sm:$0xff]  }
 0x751   :  { %5466 = vmatprep.subr.bf16.mxu1 %v8508_v32  ;;  %v9866_v32 = vld [vmem:[#allocation16 + $0x46c] ss:$16 sps:$4 sm:$0xff]  }
 0x754   :  { %5467 = vmatpush1.bf16.msra.mxu1 %v8507_v37  ;;  %v3866_v37 = vld [vmem:[#allocation12 + $0x718] sm:$0xff] }
 0x755   :  { %5468 = vmatprep.subr.bf16.mxu1 %v8516_v38  ;;  %v3870_v38 = vld [vmem:[#allocation12 + $0x738] sm:$0xff] }
 0x756   :  { %v8587_v45 = vcombine.low %v3866_v37, %v3870_v38 }
 0x758   :  { %5469 = vmatpush1.bf16.msra.mxu1 %v8515_v41  ;;  %v8579_v41 = vcombine.low %v3858_v29, %v3862_v30  ;;  %v9837_v29 = vld [vmem:[#allocation16 + $0xa0] ss:$16 sps:$4 sm:$0xff]   ;;  %v9842_v30 = vld [vmem:[#allocation16 + $0xc4] ss:$16 sps:$4 sm:$0xff]  }
 0x759   :  { %5470 = vmatprep.subr.bf16.mxu1 %v8524_v42  ;;  %v8588_v42 = vcombine.high %v3866_v37, %v3870_v38  ;;  %v9936_v37 = vld [vmem:[#allocation16 + $0x5e8] ss:$16 sps:$4 sm:$0xff]   ;;  %v9843_v38 = vld [vmem:[#allocation16 + $0xe0] ss:$16 sps:$4 sm:$0xff]  }
 0x75c   :  { %5471 = vmatpush1.bf16.msra.mxu1 %v8523_v44  ;;  %v9870_v44 = vld [vmem:[#allocation16 + $0x488] ss:$16 sps:$4 sm:$0xff]  }
 0x75d   :  { %5472 = vmatprep.subr.bf16.mxu1 %v8532_v56  ;;  %v9878_v56 = vld [vmem:[#allocation16 + $0x4ac] ss:$16 sps:$4 sm:$0xff]  }
 0x75e   :  { %v5332_v46 = vpop.f32.mrb[12].mxu1 }
 0x75f   :  { %v5547_v14 = vmul.f32 %v5516_v50, %v5332_v46  ;;  %v5334_v59 = vpop.f32.mrb[13].mxu1  ;;  %v3882_v50 = vld [vmem:[#allocation12 + $0x798] sm:$0xff] }
 0x760   :  { %v5548_v60 = vmul.f32 %v5520_v51, %v5334_v59  ;;  %v5336_v61 = vpop.f32.mrb[14].mxu1  ;;  %5473 = vmatpush1.bf16.msra.mxu1 %v8531_v13  ;;  %v3886_v51 = vld [vmem:[#allocation12 + $0x7b8] sm:$0xff] }
 0x761   :  { %v5597_v63 = vadd.f32 %v5566_v52, %v5547_v14  ;;  %v5337_v20 = vpop.f32.mrb[15].mxu1  ;;  %5474 = vmatprep.subr.bf16.mxu1 %v8540_v53  ;;  %v9876_v13 = vld [vmem:[#allocation16 + $0x4a8] ss:$16 sps:$4 sm:$0xff]   ;;  %v9884_v52 = vld [vmem:[#allocation16 + $0x4cc] ss:$16 sps:$4 sm:$0xff]   ;;  %v8595_v53 = vcombine.low %v3874_v43, %v3878_v35  ;;  %v8604_v46 = vcombine.high %v3882_v50, %v3886_v51  ;;  %v8603_v59 = vcombine.low %v3882_v50, %v3886_v51 }
 0x762   :  { %v5598_v1 = vadd.f32 %v5570_v47, %v5548_v60  ;;  %v3890_v47 = vld [vmem:[#allocation12 + $0x7d8] sm:$0xff]  ;;  %v9824_v20 = vld [vmem:[#allocation16 + $0x4] ss:$16 sps:$4 sm:$0xff]   ;;  %v9855_v43 = vld [vmem:[#allocation16 + $0x120] ss:$16 sps:$4 sm:$0xff]  }
 0x763   :  { %v5605_v4 = vmax.f32 %v5597_v63, 0.0  ;;  %v9890_v14 = vld [vmem:[#allocation16 + $0x4ec] ss:$16 sps:$4 sm:$0xff]   ;;  %v8612_v60 = vcombine.high %v3890_v47, %v3894_v54  ;;  %v9888_v61 = vld [vmem:[#allocation16 + $0x4e8] ss:$16 sps:$4 sm:$0xff]   ;;  %v8611_v63 = vcombine.low %v3890_v47, %v3894_v54 }
 0x764   :  { %v5606_v5 = vmax.f32 %v5598_v1, 0.0  ;;  %5475 = vmatpush1.bf16.msra.mxu1 %v8539_v62  ;;  %v9896_v62 = vld [vmem:[#allocation16 + $0x50c] ss:$16 sps:$4 sm:$0xff]   ;;  %v9863_v35 = vld [vmem:[#allocation16 + $0x144] ss:$16 sps:$4 sm:$0xff]  }
 0x765   :  { %5476 = vmatprep.subr.bf16.mxu1 %v8548_v0  ;;  %v10974_v34 = vpack.c.bf16 %v5605_v4, %v5605_v4  ;;  %v9894_v0 = vld [vmem:[#allocation16 + $0x508] ss:$16 sps:$4 sm:$0xff]   ;;  %v9902_v1 = vld [vmem:[#allocation16 + $0x52c] ss:$16 sps:$4 sm:$0xff]   ;;  %v9873_v50 = vld [vmem:[#allocation16 + $0x180] ss:$16 sps:$4 sm:$0xff]  }
 0x766   :  { %v10972_v7 = vpack.c.bf16 %v5606_v5, %v5606_v5  ;;  %v9900_v4 = vld [vmem:[#allocation16 + $0x528] ss:$16 sps:$4 sm:$0xff]   ;;  %v9908_v5 = vld [vmem:[#allocation16 + $0x54c] ss:$16 sps:$4 sm:$0xff]   ;;  %v9881_v51 = vld [vmem:[#allocation16 + $0x1a4] ss:$16 sps:$4 sm:$0xff]  }
 0x767   :  { %v9891_v47 = vld [vmem:[#allocation16 + $0x1e0] ss:$16 sps:$4 sm:$0xff]   ;;  %v9899_v54 = vld [vmem:[#allocation16 + $0x204] ss:$16 sps:$4 sm:$0xff]  }
 0x768   :  { %5477 = vmatpush1.bf16.msra.mxu1 %v8547_v6  ;;  %7392 = vmatprep.mubr.bf16.mxu0 %v10972_v7  ;;  %v9825_v6 = vld [vmem:[#allocation16 + $0x20] ss:$16 sps:$4 sm:$0xff]  }
 0x769   :  { %7393 = vmatmul.mubr.bf16.vlgmr.msra.gmra.mrb[4].mxu0 %v10974_v34  ;;  %5478 = vmatprep.subr.bf16.mxu1 %v8556_v23  ;;  %v9830_v23 = vld [vmem:[#allocation16 + $0x44] ss:$16 sps:$4 sm:$0xff]  }
 0x76a   :  { %7402 = vmatpush1.bf16.msra.mxu0 %v9846_v10  ;;  %v9828_v10 = vld [vmem:[#allocation16 + $0x40] ss:$16 sps:$4 sm:$0xff]  }
 0x76b   :  { %7403 = vmatprep.subr.bf16.mxu0 %v9854_v11  ;;  %v9833_v11 = vld [vmem:[#allocation16 + $0x64] ss:$16 sps:$4 sm:$0xff]  }
 0x76c   :  { %5479 = vmatpush1.bf16.msra.mxu1 %v8555_v12  ;;  %v9912_v12 = vld [vmem:[#allocation16 + $0x568] ss:$16 sps:$4 sm:$0xff]  }
 0x76d   :  { %5480 = vmatprep.subr.bf16.mxu1 %v8564_v15  ;;  %v9831_v15 = vld [vmem:[#allocation16 + $0x60] ss:$16 sps:$4 sm:$0xff]  }
 0x76e   :  { %7404 = vmatpush1.bf16.msra.mxu0 %v9852_v22  ;;  %v9834_v22 = vld [vmem:[#allocation16 + $0x80] ss:$16 sps:$4 sm:$0xff]  }
 0x76f   :  { %7405 = vmatprep.subr.bf16.mxu0 %v9860_v24  ;;  %v9839_v24 = vld [vmem:[#allocation16 + $0xa4] ss:$16 sps:$4 sm:$0xff]  }
 0x770   :  { %5481 = vmatpush1.bf16.msra.mxu1 %v8563_v25  ;;  %v9924_v25 = vld [vmem:[#allocation16 + $0x5a8] ss:$16 sps:$4 sm:$0xff]  }
 0x771   :  { %5482 = vmatprep.subr.bf16.mxu1 %v8572_v28  ;;  %v9932_v28 = vld [vmem:[#allocation16 + $0x5cc] ss:$16 sps:$4 sm:$0xff]  }
 0x772   :  { %7406 = vmatpush1.bf16.msra.mxu0 %v9858_v31  ;;  %v9930_v31 = vld [vmem:[#allocation16 + $0x5c8] ss:$16 sps:$4 sm:$0xff]  }
 0x773   :  { %7407 = vmatprep.subr.bf16.mxu0 %v9866_v32  ;;  %v9938_v32 = vld [vmem:[#allocation16 + $0x5ec] ss:$16 sps:$4 sm:$0xff]  }
 0x774   :  { %5483 = vmatpush1.bf16.msra.mxu1 %v8571_v33  ;;  %v9840_v33 = vld [vmem:[#allocation16 + $0xc0] ss:$16 sps:$4 sm:$0xff]  }
 0x775   :  { %5484 = vmatprep.subr.bf16.mxu1 %v8580_v36  ;;  %v9845_v36 = vld [vmem:[#allocation16 + $0xe4] ss:$16 sps:$4 sm:$0xff]  }
 0x776   :  { %7408 = vmatpush1.bf16.msra.mxu0 %v9864_v39  ;;  %v9851_v39 = vld [vmem:[#allocation16 + $0x104] ss:$16 sps:$4 sm:$0xff]  }
 0x777   :  { %7409 = vmatprep.subr.bf16.mxu0 %v9872_v40  ;;  %v9992_v40 = vld [vmem:[#allocation16 + $0x60c] ss:$16 sps:$4 sm:$0xff]  }
 0x778   :  { %5485 = vmatpush1.bf16.msra.mxu1 %v8579_v41  ;;  %v9849_v41 = vld [vmem:[#allocation16 + $0x100] ss:$16 sps:$4 sm:$0xff]  }
 0x779   :  { %5486 = vmatprep.subr.bf16.mxu1 %v8588_v42  ;;  %v9857_v42 = vld [vmem:[#allocation16 + $0x124] ss:$16 sps:$4 sm:$0xff]  }
 0x77a   :  { %7410 = vmatpush1.bf16.msra.mxu0 %v9870_v44  ;;  %v9861_v44 = vld [vmem:[#allocation16 + $0x140] ss:$16 sps:$4 sm:$0xff]  }
 0x77b   :  { %7411 = vmatprep.subr.bf16.mxu0 %v9878_v56  ;;  %v9869_v56 = vld [vmem:[#allocation16 + $0x164] ss:$16 sps:$4 sm:$0xff]  }
 0x77c   :  { %5487 = vmatpush1.bf16.msra.mxu1 %v8587_v45  ;;  %v9867_v45 = vld [vmem:[#allocation16 + $0x160] ss:$16 sps:$4 sm:$0xff]  }
 0x77d   :  { %5488 = vmatprep.subr.bf16.mxu1 %v8596_v48  ;;  %v9875_v48 = vld [vmem:[#allocation16 + $0x184] ss:$16 sps:$4 sm:$0xff]  }
 0x77e   :  { %7412 = vmatpush1.bf16.msra.mxu0 %v9876_v13  ;;  %v9879_v13 = vld [vmem:[#allocation16 + $0x1a0] ss:$16 sps:$4 sm:$0xff]  }
 0x77f   :  { %7413 = vmatprep.subr.bf16.mxu0 %v9884_v52  ;;  %v9887_v52 = vld [vmem:[#allocation16 + $0x1c4] ss:$16 sps:$4 sm:$0xff]  }
 0x780   :  { %5489 = vmatpush1.bf16.msra.mxu1 %v8595_v53  ;;  %v9885_v53 = vld [vmem:[#allocation16 + $0x1c0] ss:$16 sps:$4 sm:$0xff]  }
 0x781   :  { %5490 = vmatprep.subr.bf16.mxu1 %v8604_v46  ;;  %v9893_v46 = vld [vmem:[#allocation16 + $0x1e4] ss:$16 sps:$4 sm:$0xff]  }
 0x782   :  { %7414 = vmatpush1.bf16.msra.mxu0 %v9882_v55  ;;  %v9897_v55 = vld [vmem:[#allocation16 + $0x200] ss:$16 sps:$4 sm:$0xff]  }
 0x783   :  { %7415 = vmatprep.subr.bf16.mxu0 %v9890_v14  ;;  %v9905_v14 = vld [vmem:[#allocation16 + $0x224] ss:$16 sps:$4 sm:$0xff]  }
 0x784   :  { %5491 = vmatpush1.bf16.msra.mxu1 %v8603_v59  ;;  %v9903_v59 = vld [vmem:[#allocation16 + $0x220] ss:$16 sps:$4 sm:$0xff]  }
 0x785   :  { %5492 = vmatprep.subr.bf16.mxu1 %v8612_v60  ;;  %v9911_v60 = vld [vmem:[#allocation16 + $0x244] ss:$16 sps:$4 sm:$0xff]  }
 0x786   :  { %7416 = vmatpush1.bf16.msra.mxu0 %v9888_v61  ;;  %v9909_v61 = vld [vmem:[#allocation16 + $0x240] ss:$16 sps:$4 sm:$0xff]  }
 0x787   :  { %7417 = vmatprep.subr.bf16.mxu0 %v9896_v62  ;;  %v9917_v62 = vld [vmem:[#allocation16 + $0x264] ss:$16 sps:$4 sm:$0xff]  }
 0x788   :  { %5493 = vmatpush1.bf16.msra.mxu1 %v8611_v63  ;;  %v9915_v63 = vld [vmem:[#allocation16 + $0x260] ss:$16 sps:$4 sm:$0xff]  }
 0x789   :  { %7155 = vmatprep.subr.bf16.mxu1 %v9824_v20  ;;  %v9923_v20 = vld [vmem:[#allocation16 + $0x284] ss:$16 sps:$4 sm:$0xff]  }
 0x78a   :  { %7418 = vmatpush1.bf16.msra.mxu0 %v9894_v0  ;;  %v5523_v0 = vsub.s32 4, %v10870_v18 }
 0x78b   :  { %5495 = vmatmul.mubr.bf16.vlgmr.msra.gmra.mrb[20].mxu1 %v10931_v58  ;;  %7419 = vmatprep.subr.bf16.mxu0 %v9902_v1  ;;  %v9920_v58 = vld [vmem:[#allocation16 + $0x58c] ss:$16 sps:$4 sm:$0xff]   ;;  %v9921_v1 = vld [vmem:[#allocation16 + $0x280] ss:$16 sps:$4 sm:$0xff]  }
 0x78c   :  { %7156 = vmatpush1.bf16.msra.mxu1 %v9822_v2  ;;  %7187 = vmatprep.mubr.bf16.mxu1 %v10954_v49  ;;  %v9918_v49 = vld [vmem:[#allocation16 + $0x588] ss:$16 sps:$4 sm:$0xff]   ;;  %v9929_v2 = vld [vmem:[#allocation16 + $0x2a4] ss:$16 sps:$4 sm:$0xff]  }
 0x78d   :  { %7157 = vmatprep.subr.bf16.mxu1 %v9827_v3 }
 0x78e   :  { %7420 = vmatpush1.bf16.msra.mxu0 %v9900_v4 }
 0x78f   :  { %7421 = vmatprep.subr.bf16.mxu0 %v9908_v5  ;;  %v9927_v5 = vld [vmem:[#allocation16 + $0x2a0] ss:$16 sps:$4 sm:$0xff]  }
 0x790   :  { %7158 = vmatpush1.bf16.msra.mxu1 %v9825_v6  ;;  %v10988_v6 = vld [vmem:[#allocation15] sm:$0xff] }
 0x791   :  { %7159 = vmatprep.subr.bf16.mxu1 %v9830_v23  ;;  %v5574_v23 = vrot.slane %v10988_v6, %v5523_v0 }
 0x792   :  { %7422 = vmatpush1.bf16.msra.mxu0 %v9906_v8  ;;  %v9935_v8 = vld [vmem:[#allocation16 + $0x2c4] ss:$16 sps:$4 sm:$0xff]  }
 0x793   :  { %7423 = vmatprep.subr.bf16.mxu0 %v9914_v9 }
 0x794   :  { %7160 = vmatpush1.bf16.msra.mxu1 %v9828_v10 }
 0x795   :  { %7161 = vmatprep.subr.bf16.mxu1 %v9833_v11 }
 0x796   :  { %7424 = vmatpush1.bf16.msra.mxu0 %v9912_v12 }
 0x797   :  { %7425 = vmatprep.subr.bf16.mxu0 %v9920_v58 }
 0x798   :  { %7162 = vmatpush1.bf16.msra.mxu1 %v9831_v15 }
 0x799   :  { %7163 = vmatprep.subr.bf16.mxu1 %v9836_v16  ;;  %v9933_v16 = vld [vmem:[#allocation16 + $0x2c0] ss:$16 sps:$4 sm:$0xff]  }
 0x79a   :  { %7426 = vmatpush1.bf16.msra.mxu0 %v9918_v49 }
 0x79b   :  { %7427 = vmatprep.subr.bf16.mxu0 %v9926_v17 }
 0x79c   :  { %7164 = vmatpush1.bf16.msra.mxu1 %v9834_v22  ;;  %v9941_v22 = vld [vmem:[#allocation16 + $0x2e4] ss:$16 sps:$4 sm:$0xff]  }
 0x79d   :  { %7165 = vmatprep.subr.bf16.mxu1 %v9839_v24 }
 0x79e   :  { %7428 = vmatpush1.bf16.msra.mxu0 %v9924_v25 }
 0x79f   :  { %7429 = vmatprep.subr.bf16.mxu0 %v9932_v28 }
 0x7a0   :  { %7166 = vmatpush1.bf16.msra.mxu1 %v9837_v29  ;;  %v9939_v29 = vld [vmem:[#allocation16 + $0x2e0] ss:$16 sps:$4 sm:$0xff]  }
 0x7a1   :  { %7167 = vmatprep.subr.bf16.mxu1 %v9842_v30  ;;  %v9944_v30 = vld [vmem:[#allocation16 + $0x304] ss:$16 sps:$4 sm:$0xff]  }
 0x7a2   :  { %7430 = vmatpush1.bf16.msra.mxu0 %v9930_v31 }
 0x7a3   :  { %7431 = vmatprep.subr.bf16.mxu0 %v9938_v32  ;;  %v9990_v32 = vld [vmem:[#allocation16 + $0x608] ss:$16 sps:$4 sm:$0xff]  }
 0x7a4   :  { %7168 = vmatpush1.bf16.msra.mxu1 %v9840_v33 }
 0x7a5   :  { %7169 = vmatprep.subr.bf16.mxu1 %v9845_v36  ;;  %v9998_v36 = vld [vmem:[#allocation16 + $0x62c] ss:$16 sps:$4 sm:$0xff]  }
 0x7a6   :  { %7432 = vmatpush1.bf16.msra.mxu0 %v9936_v37  ;;  %v9942_v37 = vld [vmem:[#allocation16 + $0x300] ss:$16 sps:$4 sm:$0xff]  }
 0x7a7   :  { %7442 = vmatprep.subr.bf16.mxu0 %v9992_v40  ;;  %v10004_v40 = vld [vmem:[#allocation16 + $0x64c] ss:$16 sps:$4 sm:$0xff]  }
 0x7a8   :  { %7170 = vmatpush1.bf16.msra.mxu1 %v9843_v38  ;;  %v9947_v38 = vld [vmem:[#allocation16 + $0x324] ss:$16 sps:$4 sm:$0xff]  }
 0x7a9   :  { %7171 = vmatprep.subr.bf16.mxu1 %v9851_v39  ;;  %v9996_v39 = vld [vmem:[#allocation16 + $0x628] ss:$16 sps:$4 sm:$0xff]  }
 0x7ac   :  { %7172 = vmatpush1.bf16.msra.mxu1 %v9849_v41  ;;  %v9945_v41 = vld [vmem:[#allocation16 + $0x320] ss:$16 sps:$4 sm:$0xff]  }
 0x7ad   :  { %7173 = vmatprep.subr.bf16.mxu1 %v9857_v42  ;;  %v9950_v42 = vld [vmem:[#allocation16 + $0x344] ss:$16 sps:$4 sm:$0xff]  }
 0x7b0   :  { %7174 = vmatpush1.bf16.msra.mxu1 %v9855_v43  ;;  %v10002_v43 = vld [vmem:[#allocation16 + $0x648] ss:$16 sps:$4 sm:$0xff]  }
 0x7b1   :  { %7175 = vmatprep.subr.bf16.mxu1 %v9863_v35  ;;  %v10010_v35 = vld [vmem:[#allocation16 + $0x66c] ss:$16 sps:$4 sm:$0xff]  }
 0x7b4   :  { %7176 = vmatpush1.bf16.msra.mxu1 %v9861_v44  ;;  %v9948_v44 = vld [vmem:[#allocation16 + $0x340] ss:$16 sps:$4 sm:$0xff]  }
 0x7b5   :  { %7177 = vmatprep.subr.bf16.mxu1 %v9869_v56  ;;  %v9953_v56 = vld [vmem:[#allocation16 + $0x364] ss:$16 sps:$4 sm:$0xff]  }
 0x7b8   :  { %7178 = vmatpush1.bf16.msra.mxu1 %v9867_v45  ;;  %v10008_v45 = vld [vmem:[#allocation16 + $0x668] ss:$16 sps:$4 sm:$0xff]  }
 0x7b9   :  { %7179 = vmatprep.subr.bf16.mxu1 %v9875_v48  ;;  %v10016_v48 = vld [vmem:[#allocation16 + $0x68c] ss:$16 sps:$4 sm:$0xff]  }
 0x7bc   :  { %7180 = vmatpush1.bf16.msra.mxu1 %v9873_v50  ;;  %v9951_v50 = vld [vmem:[#allocation16 + $0x360] ss:$16 sps:$4 sm:$0xff]  }
 0x7bd   :  { %7181 = vmatprep.subr.bf16.mxu1 %v9881_v51  ;;  %v9956_v51 = vld [vmem:[#allocation16 + $0x384] ss:$16 sps:$4 sm:$0xff]  }
 0x7c0   :  { %7182 = vmatpush1.bf16.msra.mxu1 %v9879_v13  ;;  %v10014_v13 = vld [vmem:[#allocation16 + $0x688] ss:$16 sps:$4 sm:$0xff]  }
 0x7c1   :  { %7183 = vmatprep.subr.bf16.mxu1 %v9887_v52  ;;  %v10022_v52 = vld [vmem:[#allocation16 + $0x6ac] ss:$16 sps:$4 sm:$0xff]  }
 0x7c4   :  { %7184 = vmatpush1.bf16.msra.mxu1 %v9885_v53  ;;  %v9954_v53 = vld [vmem:[#allocation16 + $0x380] ss:$16 sps:$4 sm:$0xff]  }
 0x7c5   :  { %7185 = vmatprep.subr.bf16.mxu1 %v9893_v46  ;;  %v9959_v46 = vld [vmem:[#allocation16 + $0x3a4] ss:$16 sps:$4 sm:$0xff]  }
 0x7c8   :  { %7186 = vmatpush1.bf16.msra.mxu1 %v9891_v47  ;;  %v10020_v47 = vld [vmem:[#allocation16 + $0x6a8] ss:$16 sps:$4 sm:$0xff]  }
 0x7c9   :  { %7196 = vmatprep.subr.bf16.mxu1 %v9899_v54  ;;  %v10028_v54 = vld [vmem:[#allocation16 + $0x6cc] ss:$16 sps:$4 sm:$0xff]  }
 0x7cb   :  { %7188 = vmatmul.mubr.bf16.vlgmr.msra.gmra.mrb[24].mxu1 %v10956_v57  ;;  %v5527_v57 = vsub.s32 5, %v10870_v18 }
 0x7cc   :  { %7197 = vmatpush1.bf16.msra.mxu1 %v9897_v55  ;;  %7228 = vmatprep.mubr.bf16.mxu1 %v10972_v7  ;;  %v10984_v7 = vld [vmem:[#allocation13] sm:$0xff] }
 0x7cd   :  { %7198 = vmatprep.subr.bf16.mxu1 %v9905_v14  ;;  %v5524_v3 = vrot.slane %v10984_v7, %v5523_v0  ;;  %v5528_v4 = vrot.slane %v10984_v7, %v5527_v57  ;;  %v5578_v10 = vrot.slane %v10988_v6, %v5527_v57  ;;  %v9957_v55 = vld [vmem:[#allocation16 + $0x3a0] ss:$16 sps:$4 sm:$0xff]   ;;  %v9962_v14 = vld [vmem:[#allocation16 + $0x3c4] ss:$16 sps:$4 sm:$0xff]   ;;  %v10038_v57 = vld [vmem:[#allocation16 + $0x708] ss:$16 sps:$4 sm:$0xff]  }
 0x7ce   :  { %v9963_v0 = vld [vmem:[#allocation16 + $0x3e0] ss:$16 sps:$4 sm:$0xff]  }
 0x7d0   :  { %7199 = vmatpush1.bf16.msra.mxu1 %v9903_v59  ;;  %v10026_v59 = vld [vmem:[#allocation16 + $0x6c8] ss:$16 sps:$4 sm:$0xff]  }
 0x7d1   :  { %7200 = vmatprep.subr.bf16.mxu1 %v9911_v60  ;;  %v10034_v60 = vld [vmem:[#allocation16 + $0x6ec] ss:$16 sps:$4 sm:$0xff]  }
 0x7d4   :  { %7201 = vmatpush1.bf16.msra.mxu1 %v9909_v61  ;;  %v9960_v61 = vld [vmem:[#allocation16 + $0x3c0] ss:$16 sps:$4 sm:$0xff]  }
 0x7d5   :  { %7202 = vmatprep.subr.bf16.mxu1 %v9917_v62  ;;  %v9965_v62 = vld [vmem:[#allocation16 + $0x3e4] ss:$16 sps:$4 sm:$0xff]  }
 0x7d8   :  { %7203 = vmatpush1.bf16.msra.mxu1 %v9915_v63  ;;  %v10032_v63 = vld [vmem:[#allocation16 + $0x6e8] ss:$16 sps:$4 sm:$0xff]  }
 0x7d9   :  { %7204 = vmatprep.subr.bf16.mxu1 %v9923_v20  ;;  %v10040_v20 = vld [vmem:[#allocation16 + $0x70c] ss:$16 sps:$4 sm:$0xff]  }
 0x7dc   :  { %7205 = vmatpush1.bf16.msra.mxu1 %v9921_v1  ;;  %v9968_v1 = vld [vmem:[#allocation16 + $0x404] ss:$16 sps:$4 sm:$0xff]  }
 0x7dd   :  { %7206 = vmatprep.subr.bf16.mxu1 %v9929_v2  ;;  %v10046_v2 = vld [vmem:[#allocation16 + $0x72c] ss:$16 sps:$4 sm:$0xff]  }
 0x7de   :  { %v5414_v9 = vpop.f32.mrb[16].mxu1 }
 0x7df   :  { %v5549_v11 = vmul.f32 %v5524_v3, %v5414_v9  ;;  %v5416_v12 = vpop.f32.mrb[17].mxu1  ;;  %v9966_v3 = vld [vmem:[#allocation16 + $0x400] ss:$16 sps:$4 sm:$0xff]   ;;  %v9974_v9 = vld [vmem:[#allocation16 + $0x444] ss:$16 sps:$4 sm:$0xff]  }
 0x7e0   :  { %v5550_v58 = vmul.f32 %v5528_v4, %v5416_v12  ;;  %v5418_v15 = vpop.f32.mrb[18].mxu1  ;;  %7207 = vmatpush1.bf16.msra.mxu1 %v9927_v5  ;;  %v9971_v4 = vld [vmem:[#allocation16 + $0x424] ss:$16 sps:$4 sm:$0xff]   ;;  %v10044_v5 = vld [vmem:[#allocation16 + $0x728] ss:$16 sps:$4 sm:$0xff]  }
 0x7e1   :  { %v5599_v49 = vadd.f32 %v5574_v23, %v5549_v11  ;;  %v5419_v17 = vpop.f32.mrb[19].mxu1  ;;  %7208 = vmatprep.subr.bf16.mxu1 %v9935_v8  ;;  %v10052_v23 = vld [vmem:[#allocation16 + $0x74c] ss:$16 sps:$4 sm:$0xff]   ;;  %v9969_v8 = vld [vmem:[#allocation16 + $0x420] ss:$16 sps:$4 sm:$0xff]  }
 0x7e2   :  { %v5600_v24 = vadd.f32 %v5578_v10, %v5550_v58  ;;  %v10050_v10 = vld [vmem:[#allocation16 + $0x748] ss:$16 sps:$4 sm:$0xff]   ;;  %v10058_v11 = vld [vmem:[#allocation16 + $0x76c] ss:$16 sps:$4 sm:$0xff]   ;;  %v9972_v12 = vld [vmem:[#allocation16 + $0x440] ss:$16 sps:$4 sm:$0xff]  }
 0x7e3   :  { %v5607_v25 = vmax.f32 %v5599_v49, 0.0  ;;  %v9977_v58 = vld [vmem:[#allocation16 + $0x464] ss:$16 sps:$4 sm:$0xff]   ;;  %v10056_v15 = vld [vmem:[#allocation16 + $0x768] ss:$16 sps:$4 sm:$0xff]  }
 0x7e4   :  { %v5608_v28 = vmax.f32 %v5600_v24, 0.0  ;;  %7209 = vmatpush1.bf16.msra.mxu1 %v9933_v16  ;;  %v9975_v16 = vld [vmem:[#allocation16 + $0x460] ss:$16 sps:$4 sm:$0xff]   ;;  %v9980_v49 = vld [vmem:[#allocation16 + $0x484] ss:$16 sps:$4 sm:$0xff]  }
 0x7e5   :  { %7210 = vmatprep.subr.bf16.mxu1 %v9941_v22  ;;  %v10994_v33 = vpack.c.bf16 %v5607_v25, %v5607_v25  ;;  %v10062_v17 = vld [vmem:[#allocation16 + $0x788] ss:$16 sps:$4 sm:$0xff]   ;;  %v10070_v22 = vld [vmem:[#allocation16 + $0x7ac] ss:$16 sps:$4 sm:$0xff]   ;;  %v9978_v24 = vld [vmem:[#allocation16 + $0x480] ss:$16 sps:$4 sm:$0xff]  }
 0x7e6   :  { %v10992_v31 = vpack.c.bf16 %v5608_v28, %v5608_v28  ;;  %v9983_v25 = vld [vmem:[#allocation16 + $0x4a4] ss:$16 sps:$4 sm:$0xff]   ;;  %v10068_v28 = vld [vmem:[#allocation16 + $0x7a8] ss:$16 sps:$4 sm:$0xff]  }
 0x7e8   :  { %7211 = vmatpush1.bf16.msra.mxu1 %v9939_v29  ;;  %7433 = vmatprep.mubr.bf16.mxu0 %v10992_v31  ;;  %v10076_v29 = vld [vmem:[#allocation16 + $0x7cc] ss:$16 sps:$4 sm:$0xff]  }
 0x7e9   :  { %7434 = vmatmul.mubr.bf16.vlgmr.msra.gmra.mrb[4].mxu0 %v10994_v33  ;;  %7212 = vmatprep.subr.bf16.mxu1 %v9944_v30  ;;  %v9981_v30 = vld [vmem:[#allocation16 + $0x4a0] ss:$16 sps:$4 sm:$0xff]  }
 0x7ea   :  { %7443 = vmatpush1.bf16.msra.mxu0 %v9990_v32  ;;  %v10074_v32 = vld [vmem:[#allocation16 + $0x7c8] ss:$16 sps:$4 sm:$0xff]  }
 0x7eb   :  { %7444 = vmatprep.subr.bf16.mxu0 %v9998_v36  ;;  %v10082_v36 = vld [vmem:[#allocation16 + $0x7ec] ss:$16 sps:$4 sm:$0xff]  }
 0x7ec   :  { %7213 = vmatpush1.bf16.msra.mxu1 %v9942_v37  ;;  %v9984_v37 = vld [vmem:[#allocation16 + $0x4c0] ss:$16 sps:$4 sm:$0xff]  }
 0x7ed   :  { %7214 = vmatprep.subr.bf16.mxu1 %v9947_v38  ;;  %v9989_v38 = vld [vmem:[#allocation16 + $0x4e4] ss:$16 sps:$4 sm:$0xff]  }
 0x7ee   :  { %7445 = vmatpush1.bf16.msra.mxu0 %v9996_v39  ;;  %v10080_v39 = vld [vmem:[#allocation16 + $0x7e8] ss:$16 sps:$4 sm:$0xff]  }
 0x7ef   :  { %7446 = vmatprep.subr.bf16.mxu0 %v10004_v40  ;;  %v9987_v40 = vld [vmem:[#allocation16 + $0x4e0] ss:$16 sps:$4 sm:$0xff]  }
 0x7f0   :  { %7215 = vmatpush1.bf16.msra.mxu1 %v9945_v41  ;;  %v9995_v41 = vld [vmem:[#allocation16 + $0x504] ss:$16 sps:$4 sm:$0xff]  }
 0x7f1   :  { %7216 = vmatprep.subr.bf16.mxu1 %v9950_v42  ;;  %v9993_v42 = vld [vmem:[#allocation16 + $0x500] ss:$16 sps:$4 sm:$0xff]  }
 0x7f2   :  { %7447 = vmatpush1.bf16.msra.mxu0 %v10002_v43  ;;  %v10001_v43 = vld [vmem:[#allocation16 + $0x524] ss:$16 sps:$4 sm:$0xff]  }
 0x7f3   :  { %7448 = vmatprep.subr.bf16.mxu0 %v10010_v35  ;;  %v9999_v35 = vld [vmem:[#allocation16 + $0x520] ss:$16 sps:$4 sm:$0xff]  }
 0x7f4   :  { %7217 = vmatpush1.bf16.msra.mxu1 %v9948_v44  ;;  %v10007_v44 = vld [vmem:[#allocation16 + $0x544] ss:$16 sps:$4 sm:$0xff]  }
 0x7f5   :  { %7218 = vmatprep.subr.bf16.mxu1 %v9953_v56  ;;  %v10005_v56 = vld [vmem:[#allocation16 + $0x540] ss:$16 sps:$4 sm:$0xff]  }
 0x7f6   :  { %7449 = vmatpush1.bf16.msra.mxu0 %v10008_v45  ;;  %v10013_v45 = vld [vmem:[#allocation16 + $0x564] ss:$16 sps:$4 sm:$0xff]  }
 0x7f7   :  { %7450 = vmatprep.subr.bf16.mxu0 %v10016_v48  ;;  %v10011_v48 = vld [vmem:[#allocation16 + $0x560] ss:$16 sps:$4 sm:$0xff]  }
 0x7f8   :  { %7219 = vmatpush1.bf16.msra.mxu1 %v9951_v50  ;;  %v10019_v50 = vld [vmem:[#allocation16 + $0x584] ss:$16 sps:$4 sm:$0xff]  }
 0x7f9   :  { %7220 = vmatprep.subr.bf16.mxu1 %v9956_v51  ;;  %v10017_v51 = vld [vmem:[#allocation16 + $0x580] ss:$16 sps:$4 sm:$0xff]  }
 0x7fa   :  { %7451 = vmatpush1.bf16.msra.mxu0 %v10014_v13  ;;  %v10025_v13 = vld [vmem:[#allocation16 + $0x5a4] ss:$16 sps:$4 sm:$0xff]  }
 0x7fb   :  { %7452 = vmatprep.subr.bf16.mxu0 %v10022_v52  ;;  %v10023_v52 = vld [vmem:[#allocation16 + $0x5a0] ss:$16 sps:$4 sm:$0xff]  }
 0x7fc   :  { %7221 = vmatpush1.bf16.msra.mxu1 %v9954_v53  ;;  %v10031_v53 = vld [vmem:[#allocation16 + $0x5c4] ss:$16 sps:$4 sm:$0xff]  }
 0x7fd   :  { %7222 = vmatprep.subr.bf16.mxu1 %v9959_v46  ;;  %v10029_v46 = vld [vmem:[#allocation16 + $0x5c0] ss:$16 sps:$4 sm:$0xff]  }
 0x7fe   :  { %7453 = vmatpush1.bf16.msra.mxu0 %v10020_v47  ;;  %v10037_v47 = vld [vmem:[#allocation16 + $0x5e4] ss:$16 sps:$4 sm:$0xff]  }
 0x7ff   :  { %7454 = vmatprep.subr.bf16.mxu0 %v10028_v54  ;;  %v10035_v54 = vld [vmem:[#allocation16 + $0x5e0] ss:$16 sps:$4 sm:$0xff]  }
 0x800   :  { %7223 = vmatpush1.bf16.msra.mxu1 %v9957_v55  ;;  %v10043_v55 = vld [vmem:[#allocation16 + $0x604] ss:$16 sps:$4 sm:$0xff]  }
 0x801   :  { %7224 = vmatprep.subr.bf16.mxu1 %v9962_v14  ;;  %v10041_v14 = vld [vmem:[#allocation16 + $0x600] ss:$16 sps:$4 sm:$0xff]  }
 0x802   :  { %7455 = vmatpush1.bf16.msra.mxu0 %v10026_v59  ;;  %v10049_v59 = vld [vmem:[#allocation16 + $0x624] ss:$16 sps:$4 sm:$0xff]  }
 0x803   :  { %7456 = vmatprep.subr.bf16.mxu0 %v10034_v60  ;;  %v10047_v60 = vld [vmem:[#allocation16 + $0x620] ss:$16 sps:$4 sm:$0xff]  }
 0x804   :  { %7225 = vmatpush1.bf16.msra.mxu1 %v9960_v61  ;;  %v10055_v61 = vld [vmem:[#allocation16 + $0x644] ss:$16 sps:$4 sm:$0xff]  }
 0x805   :  { %7226 = vmatprep.subr.bf16.mxu1 %v9965_v62  ;;  %v10053_v62 = vld [vmem:[#allocation16 + $0x640] ss:$16 sps:$4 sm:$0xff]  }
 0x806   :  { %7457 = vmatpush1.bf16.msra.mxu0 %v10032_v63  ;;  %v10061_v63 = vld [vmem:[#allocation16 + $0x664] ss:$16 sps:$4 sm:$0xff]  }
 0x807   :  { %7458 = vmatprep.subr.bf16.mxu0 %v10040_v20  ;;  %v10059_v20 = vld [vmem:[#allocation16 + $0x660] ss:$16 sps:$4 sm:$0xff]  }
 0x808   :  { %7227 = vmatpush1.bf16.msra.mxu1 %v9963_v0  ;;  %v10067_v0 = vld [vmem:[#allocation16 + $0x684] ss:$16 sps:$4 sm:$0xff]  }
 0x809   :  { %7237 = vmatprep.subr.bf16.mxu1 %v9968_v1  ;;  %v5531_v1 = vsub.s32 6, %v10870_v18 }
 0x80a   :  { %7459 = vmatpush1.bf16.msra.mxu0 %v10038_v57  ;;  %v10065_v57 = vld [vmem:[#allocation16 + $0x680] ss:$16 sps:$4 sm:$0xff]  }
 0x80b   :  { %7229 = vmatmul.mubr.bf16.vlgmr.msra.gmra.mrb[24].mxu1 %v10974_v34  ;;  %7460 = vmatprep.subr.bf16.mxu0 %v10046_v2  ;;  %v10064_v34 = vld [vmem:[#allocation16 + $0x78c] ss:$16 sps:$4 sm:$0xff]   ;;  %v5535_v2 = vsub.s32 7, %v10870_v18  ;;  %v10077_v18 = vld [vmem:[#allocation16 + $0x6c0] ss:$16 sps:$4 sm:$0xff]  }
 0x80c   :  { %7238 = vmatpush1.bf16.msra.mxu1 %v9966_v3  ;;  %7269 = vmatprep.mubr.bf16.mxu1 %v10992_v31  ;;  %v9986_v31 = vld [vmem:[#allocation16 + $0x4c4] ss:$16 sps:$4 sm:$0xff]   ;;  %v5532_v3 = vrot.slane %v10984_v7, %v5531_v1 }
 0x80d   :  { %7239 = vmatprep.subr.bf16.mxu1 %v9971_v4  ;;  %v5536_v4 = vrot.slane %v10984_v7, %v5535_v2 }
 0x80e   :  { %7461 = vmatpush1.bf16.msra.mxu0 %v10044_v5  ;;  %v10071_v5 = vld [vmem:[#allocation16 + $0x6a0] ss:$16 sps:$4 sm:$0xff]  }
 0x80f   :  { %7462 = vmatprep.subr.bf16.mxu0 %v10052_v23  ;;  %v5582_v23 = vrot.slane %v10988_v6, %v5531_v1 }
 0x810   :  { %7240 = vmatpush1.bf16.msra.mxu1 %v9969_v8  ;;  %v10079_v8 = vld [vmem:[#allocation16 + $0x6c4] ss:$16 sps:$4 sm:$0xff]  }
 0x811   :  { %7241 = vmatprep.subr.bf16.mxu1 %v9974_v9 }
 0x812   :  { %7463 = vmatpush1.bf16.msra.mxu0 %v10050_v10  ;;  %v5586_v10 = vrot.slane %v10988_v6, %v5535_v2  ;;  %v10086_v6 = vld [vmem:[#allocation16 + $0x700] ss:$16 sps:$4 sm:$0xff]  }
 0x813   :  { %7464 = vmatprep.subr.bf16.mxu0 %v10058_v11  ;;  %v7483_v2 = vld [vmem:[#allocation18] sm:$0xf] }
 0x814   :  { %7242 = vmatpush1.bf16.msra.mxu1 %v9972_v12 }
 0x815   :  { %7243 = vmatprep.subr.bf16.mxu1 %v9977_v58 }
 0x816   :  { %7465 = vmatpush1.bf16.msra.mxu0 %v10056_v15 }
 0x817   :  { %7466 = vmatprep.subr.bf16.mxu0 %v10064_v34 }
 0x818   :  { %7244 = vmatpush1.bf16.msra.mxu1 %v9975_v16 }
 0x819   :  { %7245 = vmatprep.subr.bf16.mxu1 %v9980_v49  ;;  %v10085_v49 = vld [vmem:[#allocation16 + $0x6e4] ss:$16 sps:$4 sm:$0xff]  }
 0x81a   :  { %7467 = vmatpush1.bf16.msra.mxu0 %v10062_v17 }
 0x81b   :  { %7468 = vmatprep.subr.bf16.mxu0 %v10070_v22 }
 0x81c   :  { %7246 = vmatpush1.bf16.msra.mxu1 %v9978_v24  ;;  %v10083_v24 = vld [vmem:[#allocation16 + $0x6e0] ss:$16 sps:$4 sm:$0xff]  }
 0x81d   :  { %7247 = vmatprep.subr.bf16.mxu1 %v9983_v25  ;;  %v10088_v25 = vld [vmem:[#allocation16 + $0x704] ss:$16 sps:$4 sm:$0xff]  }
 0x81e   :  { %7469 = vmatpush1.bf16.msra.mxu0 %v10068_v28 }
 0x81f   :  { %7470 = vmatprep.subr.bf16.mxu0 %v10076_v29 }
 0x820   :  { %7248 = vmatpush1.bf16.msra.mxu1 %v9981_v30  ;;  %v10091_v30 = vld [vmem:[#allocation16 + $0x724] ss:$16 sps:$4 sm:$0xff]  }
 0x821   :  { %7249 = vmatprep.subr.bf16.mxu1 %v9986_v31  ;;  %v10089_v31 = vld [vmem:[#allocation16 + $0x720] ss:$16 sps:$4 sm:$0xff]  }
 0x822   :  { %7471 = vmatpush1.bf16.msra.mxu0 %v10074_v32  ;;  %v10094_v32 = vld [vmem:[#allocation16 + $0x744] ss:$16 sps:$4 sm:$0xff]  }
 0x823   :  { %7472 = vmatprep.subr.bf16.mxu0 %v10082_v36  ;;  %v10092_v36 = vld [vmem:[#allocation16 + $0x740] ss:$16 sps:$4 sm:$0xff]  }
 0x824   :  { %7250 = vmatpush1.bf16.msra.mxu1 %v9984_v37  ;;  %v10097_v37 = vld [vmem:[#allocation16 + $0x764] ss:$16 sps:$4 sm:$0xff]  }
 0x825   :  { %7251 = vmatprep.subr.bf16.mxu1 %v9989_v38  ;;  %v10095_v38 = vld [vmem:[#allocation16 + $0x760] ss:$16 sps:$4 sm:$0xff]  }
 0x826   :  { %7473 = vmatpush1.bf16.msra.mxu0 %v10080_v39  ;;  %v10100_v39 = vld [vmem:[#allocation16 + $0x784] ss:$16 sps:$4 sm:$0xff]  }
 0x828   :  { %7252 = vmatpush1.bf16.msra.mxu1 %v9987_v40  ;;  %v10098_v40 = vld [vmem:[#allocation16 + $0x780] ss:$16 sps:$4 sm:$0xff]  }
 0x829   :  { %7253 = vmatprep.subr.bf16.mxu1 %v9995_v41  ;;  %v10103_v41 = vld [vmem:[#allocation16 + $0x7a4] ss:$16 sps:$4 sm:$0xff]  }
 0x82c   :  { %7254 = vmatpush1.bf16.msra.mxu1 %v9993_v42  ;;  %v10101_v42 = vld [vmem:[#allocation16 + $0x7a0] ss:$16 sps:$4 sm:$0xff]  }
 0x82d   :  { %7255 = vmatprep.subr.bf16.mxu1 %v10001_v43  ;;  %v10106_v43 = vld [vmem:[#allocation16 + $0x7c4] ss:$16 sps:$4 sm:$0xff]  }
 0x830   :  { %7256 = vmatpush1.bf16.msra.mxu1 %v9999_v35  ;;  %v10104_v35 = vld [vmem:[#allocation16 + $0x7c0] ss:$16 sps:$4 sm:$0xff]  }
 0x831   :  { %7257 = vmatprep.subr.bf16.mxu1 %v10007_v44  ;;  %v10109_v44 = vld [vmem:[#allocation16 + $0x7e4] ss:$16 sps:$4 sm:$0xff]  }
 0x834   :  { %7258 = vmatpush1.bf16.msra.mxu1 %v10005_v56  ;;  %v10107_v56 = vld [vmem:[#allocation16 + $0x7e0] ss:$16 sps:$4 sm:$0xff]  }
 0x835   :  { %7259 = vmatprep.subr.bf16.mxu1 %v10013_v45  ;;  %v10110_v45 = vld [vmem:[#allocation21 + $0x40] sm:$0xff]  }
 0x838   :  { %7260 = vmatpush1.bf16.msra.mxu1 %v10011_v48  ;;  %v10111_v48 = vld [vmem:[#allocation21] sm:$0xff]  }
 0x839   :  { %7261 = vmatprep.subr.bf16.mxu1 %v10019_v50  ;;  %v10112_v50 = vld [vmem:[#allocation21 + $0x48] sm:$0xff]  }
 0x83c   :  { %7262 = vmatpush1.bf16.msra.mxu1 %v10017_v51  ;;  %v10113_v51 = vld [vmem:[#allocation21 + $0x8] sm:$0xff]  }
 0x83d   :  { %7263 = vmatprep.subr.bf16.mxu1 %v10025_v13  ;;  %v10114_v13 = vld [vmem:[#allocation21 + $0x50] sm:$0xff]  }
 0x840   :  { %7264 = vmatpush1.bf16.msra.mxu1 %v10023_v52  ;;  %v10115_v52 = vld [vmem:[#allocation21 + $0x10] sm:$0xff]  }
 0x841   :  { %7265 = vmatprep.subr.bf16.mxu1 %v10031_v53  ;;  %v10116_v53 = vld [vmem:[#allocation21 + $0x58] sm:$0xff]  }
 0x844   :  { %7266 = vmatpush1.bf16.msra.mxu1 %v10029_v46  ;;  %v10117_v46 = vld [vmem:[#allocation21 + $0x18] sm:$0xff]  }
 0x845   :  { %7267 = vmatprep.subr.bf16.mxu1 %v10037_v47  ;;  %v10118_v47 = vld [vmem:[#allocation21 + $0x60] sm:$0xff]  }
 0x848   :  { %7268 = vmatpush1.bf16.msra.mxu1 %v10035_v54  ;;  %v10119_v54 = vld [vmem:[#allocation21 + $0x20] sm:$0xff]  }
 0x849   :  { %7278 = vmatprep.subr.bf16.mxu1 %v10043_v55  ;;  %v10120_v55 = vld [vmem:[#allocation21 + $0x68] sm:$0xff]  }
 0x84b   :  { %7270 = vmatmul.mubr.bf16.vlgmr.msra.gmra.mrb[24].mxu1 %v10994_v33  ;;  %v10073_v33 = vld [vmem:[#allocation16 + $0x6a4] ss:$16 sps:$4 sm:$0xff]  }
 0x84c   :  { %7279 = vmatpush1.bf16.msra.mxu1 %v10041_v14  ;;  %v10121_v14 = vld [vmem:[#allocation21 + $0x28] sm:$0xff]  }
 0x84d   :  { %7280 = vmatprep.subr.bf16.mxu1 %v10049_v59  ;;  %v10122_v59 = vld [vmem:[#allocation21 + $0x70] sm:$0xff]  }
 0x850   :  { %7281 = vmatpush1.bf16.msra.mxu1 %v10047_v60  ;;  %v10123_v60 = vld [vmem:[#allocation21 + $0x30] sm:$0xff]  }
 0x851   :  { %7282 = vmatprep.subr.bf16.mxu1 %v10055_v61  ;;  %v10124_v61 = vld [vmem:[#allocation21 + $0x78] sm:$0xff]  }
 0x854   :  { %7283 = vmatpush1.bf16.msra.mxu1 %v10053_v62  ;;  %v10125_v62 = vld [vmem:[#allocation21 + $0x38] sm:$0xff]  }
 0x855   :  { %7284 = vmatprep.subr.bf16.mxu1 %v10061_v63  ;;  %v10126_v63 = vld [vmem:[#allocation21 + $0xc0] sm:$0xff]  }
 0x858   :  { %7285 = vmatpush1.bf16.msra.mxu1 %v10059_v20 }
 0x859   :  { %7286 = vmatprep.subr.bf16.mxu1 %v10067_v0 }
 0x85c   :  { %7287 = vmatpush1.bf16.msra.mxu1 %v10065_v57 }
 0x85d   :  { %7288 = vmatprep.subr.bf16.mxu1 %v10073_v33  ;;  %v7500_v33 = vrot.slane %v7483_v2, %v10919_v27 }
 0x85e   :  { %v5496_v9 = vpop.f32.mrb[20].mxu1 }
 0x85f   :  { %v5551_v11 = vmul.f32 %v5532_v3, %v5496_v9  ;;  %v5498_v12 = vpop.f32.mrb[21].mxu1  ;;  %v7509_v3 = vld [vmem:[#allocation19] sm:$0xf] }
 0x860   :  { %v5552_v58 = vmul.f32 %v5536_v4, %v5498_v12  ;;  %v5500_v15 = vpop.f32.mrb[22].mxu1  ;;  %7289 = vmatpush1.bf16.msra.mxu1 %v10071_v5  ;;  %v7488_v4 = vrot.slane %v7483_v2, %v10873_v19  ;;  %v7514_v9 = vrot.slane %v7509_v3, %v10873_v19  ;;  %v10129_v19 = vld [vmem:[#allocation21 + $0x88] sm:$0xff]  }
 0x861   :  { %v5601_v34 = vadd.f32 %v5582_v23, %v5551_v11  ;;  %v5501_v16 = vpop.f32.mrb[23].mxu1  ;;  %7290 = vmatprep.subr.bf16.mxu1 %v10079_v8  ;;  %v7526_v23 = vrot.slane %v7509_v3, %v10919_v27  ;;  %v7492_v8 = vrot.slane %v7483_v2, %v10876_v21  ;;  %v7518_v11 = vrot.slane %v7509_v3, %v10876_v21  ;;  %v10127_v27 = vld [vmem:[#allocation21 + $0x80] sm:$0xff]   ;;  %v10130_v21 = vld [vmem:[#allocation21 + $0xd0] sm:$0xff]  }
 0x862   :  { %v5602_v17 = vadd.f32 %v5586_v10, %v5552_v58 }
 0x863   :  { %v5609_v7 = vmax.f32 %v5601_v34, 0.0 }
 0x864   :  { %v5610_v22 = vmax.f32 %v5602_v17, 0.0  ;;  %7291 = vmatpush1.bf16.msra.mxu1 %v10077_v18 }
 0x865   :  { %7292 = vmatprep.subr.bf16.mxu1 %v10085_v49  ;;  %v5617_v29 = vpack.c.bf16 %v5609_v7, %v5609_v7 }
 0x866   :  { %v5618_v28 = vpack.c.bf16 %v5610_v22, %v5610_v22 }
 0x868   :  { %7293 = vmatpush1.bf16.msra.mxu1 %v10083_v24  ;;  %7310 = vmatprep.mubr.bf16.mxu1 %v5618_v28 }
 0x869   :  { %7474 = vmatprep.mubr.bf16.mxu0 %v5618_v28  ;;  %7294 = vmatprep.subr.bf16.mxu1 %v10088_v25 }
 0x86a   :  { %7475 = vmatmul.mubr.bf16.vlgmr.msra.gmra.mrb[4].mxu0 %v5617_v29 }
 0x86c   :  { %7295 = vmatpush1.bf16.msra.mxu1 %v10086_v6 }
 0x86d   :  { %7296 = vmatprep.subr.bf16.mxu1 %v10091_v30  ;;  %v10131_v30 = vld [vmem:[#allocation21 + $0x90] sm:$0xff]  }
 0x870   :  { %7297 = vmatpush1.bf16.msra.mxu1 %v10089_v31  ;;  %v10132_v31 = vld [vmem:[#allocation21 + $0xd8] sm:$0xff]  }
 0x871   :  { %7298 = vmatprep.subr.bf16.mxu1 %v10094_v32  ;;  %v10133_v32 = vld [vmem:[#allocation21 + $0x98] sm:$0xff]  }
 0x874   :  { %7299 = vmatpush1.bf16.msra.mxu1 %v10092_v36  ;;  %v10134_v36 = vld [vmem:[#allocation21 + $0xe0] sm:$0xff]  }
 0x875   :  { %7300 = vmatprep.subr.bf16.mxu1 %v10097_v37  ;;  %v10135_v37 = vld [vmem:[#allocation21 + $0xa0] sm:$0xff]  }
 0x878   :  { %7301 = vmatpush1.bf16.msra.mxu1 %v10095_v38  ;;  %v7496_v38 = vrot.slane %v7483_v2, %v10916_v26 }
 0x879   :  { %7302 = vmatprep.subr.bf16.mxu1 %v10100_v39  ;;  %v10136_v39 = vld [vmem:[#allocation21 + $0xe8] sm:$0xff]  }
 0x87c   :  { %7303 = vmatpush1.bf16.msra.mxu1 %v10098_v40  ;;  %v10137_v40 = vld [vmem:[#allocation21 + $0xa8] sm:$0xff]  }
 0x87d   :  { %7304 = vmatprep.subr.bf16.mxu1 %v10103_v41 }
 0x880   :  { %7305 = vmatpush1.bf16.msra.mxu1 %v10101_v42  ;;  %v7522_v42 = vrot.slane %v7509_v3, %v10916_v26 }
 0x881   :  { %7306 = vmatprep.subr.bf16.mxu1 %v10106_v43  ;;  %v10138_v43 = vld [vmem:[#allocation21 + $0xf0] sm:$0xff]  }
 0x884   :  { %7307 = vmatpush1.bf16.msra.mxu1 %v10104_v35  ;;  %v10139_v35 = vld [vmem:[#allocation21 + $0xb0] sm:$0xff]  }
 0x885   :  { %7308 = vmatprep.subr.bf16.mxu1 %v10109_v44 }
 0x888   :  { %7309 = vmatpush1.bf16.msra.mxu1 %v10107_v56  ;;  %v10140_v56 = vld [vmem:[#allocation21 + $0xf8] sm:$0xff]  }
 0x889   :  { %8903 = vmatprep.subr.bf16.mxu1 %v10110_v45  ;;  %v10141_v45 = vld [vmem:[#allocation21 + $0xb8] sm:$0xff]  }
 0x88b   :  { %7311 = vmatmul.mubr.bf16.vlgmr.msra.gmra.mrb[24].mxu1 %v5617_v29  ;;  %v10128_v29 = vld [vmem:[#allocation21 + $0xc8] sm:$0xff]  }
 0x88c   :  { %8904 = vmatpush3.bf16.msra.mxu1 %v10111_v48 }
 0x88d   :  { %8905 = vmatprep.subr.bf16.mxu1 %v10112_v50 }
 0x890   :  { %8906 = vmatpush3.bf16.msra.mxu1 %v10113_v51 }
 0x891   :  { %8907 = vmatprep.subr.bf16.mxu1 %v10114_v13 }
 0x894   :  { %8908 = vmatpush3.bf16.msra.mxu1 %v10115_v52 }
 0x895   :  { %8909 = vmatprep.subr.bf16.mxu1 %v10116_v53 }
 0x898   :  { %8910 = vmatpush3.bf16.msra.mxu1 %v10117_v46 }
 0x899   :  { %8911 = vmatprep.subr.bf16.mxu1 %v10118_v47 }
 0x89c   :  { %8912 = vmatpush3.bf16.msra.mxu1 %v10119_v54 }
 0x89d   :  { %8913 = vmatprep.subr.bf16.mxu1 %v10120_v55 }
 0x8a0   :  { %8914 = vmatpush3.bf16.msra.mxu1 %v10121_v14  ;;  %v8901_v14 = vld [vmem:[#allocation22] ss:$0 sm:$0xff] }
 0x8a1   :  { %8915 = vmatprep.subr.bf16.mxu1 %v10122_v59 }
 0x8a4   :  { %8916 = vmatpush3.bf16.msra.mxu1 %v10123_v60 }
 0x8a5   :  { %8917 = vmatprep.subr.bf16.mxu1 %v10124_v61  ;;  %v8902_v61 = vld [vmem:[#allocation24] ss:$0 sm:$0xff] }
 0x8a8   :  { %8918 = vmatpush3.bf16.msra.mxu1 %v10125_v62 }
 0x8a9   :  { %8925 = vmatprep.subr.bf16.mxu1 %v10126_v63 }
 0x93d   :  { %v7476_v20 = vpop.f32.mrb[4].mxu0 }
 0x93e   :  { %v7478_v0 = vpop.f32.mrb[5].mxu0  ;;  %v7507_v41 = vmul.f32 %v7496_v38, %v7476_v20 }
 0x93f   :  { %v7480_v1 = vpop.f32.mrb[6].mxu0  ;;  %v7508_v5 = vmul.f32 %v7500_v33, %v7478_v0 }
 0x940   :  { %v7481_v57 = vpop.f32.mrb[7].mxu0  ;;  %v7533_v44 = vadd.f32 %v7522_v42, %v7507_v41 }
 0x941   :  { %v7534_v15 = vadd.f32 %v7526_v23, %v7508_v5 }
 0x942   :  { %v7537_v48 = vmax.f32 %v7533_v44, 0.0 }
 0x943   :  { %v7538_v22 = vmax.f32 %v7534_v15, 0.0 }
 0x944   :  { %v7541_v50 = vpack.c.bf16 %v7537_v48, %v7537_v48 }
 0x945   :  { %v7542_v6 = vpack.c.bf16 %v7538_v22, %v7538_v22 }
 0x95e   :  { %v7312_v10 = vpop.f32.mrb[24].mxu1 }
 0x95f   :  { %v7505_v12 = vmul.f32 %v7488_v4, %v7312_v10  ;;  %v7314_v58 = vpop.f32.mrb[25].mxu1 }
 0x960   :  { %v7506_v18 = vmul.f32 %v7492_v8, %v7314_v58  ;;  %v7316_v34 = vpop.f32.mrb[26].mxu1 }
 0x961   :  { %v7531_v16 = vadd.f32 %v7514_v9, %v7505_v12  ;;  %v7317_v49 = vpop.f32.mrb[27].mxu1 }
 0x962   :  { %v7532_v17 = vadd.f32 %v7518_v11, %v7506_v18 }
 0x963   :  { %v7535_v7 = vmax.f32 %v7531_v16, 0.0 }
 0x964   :  { %v7536_v24 = vmax.f32 %v7532_v17, 0.0 }
 0x965   :  { %v7539_v28 = vpack.c.bf16 %v7535_v7, %v7535_v7 }
 0x966   :  { %v7540_v25 = vpack.c.bf16 %v7536_v24, %v7536_v24 }
 0x968   :  { %7831 = vmatprep.mubr.bf16.mxu1 %v7540_v25 }
 0x969   :  { %7832 = vmatmul.mubr.bf16.vlgmr.msra.gmra.mrb[28].mxu1 %v7539_v28 }
 0x96a   :  { %8926 = vmatpush3.bf16.msra.mxu1 %v10127_v27  ;;  %7871 = vmatprep.mubr.bf16.mxu1 %v7542_v6 }
 0x96b   :  { %8927 = vmatprep.subr.bf16.mxu1 %v10128_v29 }
 0x96e   :  { %8928 = vmatpush3.bf16.msra.mxu1 %v10129_v19 }
 0x96f   :  { %8929 = vmatprep.subr.bf16.mxu1 %v10130_v21 }
 0x972   :  { %8930 = vmatpush3.bf16.msra.mxu1 %v10131_v30 }
 0x973   :  { %8931 = vmatprep.subr.bf16.mxu1 %v10132_v31 }
 0x976   :  { %8932 = vmatpush3.bf16.msra.mxu1 %v10133_v32 }
 0x977   :  { %8933 = vmatprep.subr.bf16.mxu1 %v10134_v36 }
 0x97a   :  { %8934 = vmatpush3.bf16.msra.mxu1 %v10135_v37 }
 0x97b   :  { %8935 = vmatprep.subr.bf16.mxu1 %v10136_v39 }
 0x97e   :  { %8936 = vmatpush3.bf16.msra.mxu1 %v10137_v40 }
 0x97f   :  { %8937 = vmatprep.subr.bf16.mxu1 %v10138_v43 }
 0x982   :  { %8938 = vmatpush3.bf16.msra.mxu1 %v10139_v35 }
 0x983   :  { %8939 = vmatprep.subr.bf16.mxu1 %v10140_v56 }
 0x986   :  { %8940 = vmatpush3.bf16.msra.mxu1 %v10141_v45 }
 0x989   :  { %7872 = vmatmul.mubr.bf16.vlgmr.msra.gmra.mrb[32].mxu1 %v7541_v50 }
 0xa3c   :  { %v8919_v51 = vpop.f32.mrb[28].mxu1 }
 0xa3d   :  { %v8920_v13 = vpop.f32.mrb[29].mxu1 }
 0xa3e   :  { %v8921_v52 = vadd.f32 %v8920_v13, %v8919_v51  ;;  %v8922_v53 = vpop.f32.mrb[30].mxu1 }
 0xa3f   :  { %v8923_v46 = vpop.f32.mrb[31].mxu1 }
 0xa5c   :  { %v8941_v26 = vpop.f32.mrb[32].mxu1 }
 0xa5d   :  { %v8942_v47 = vpop.f32.mrb[33].mxu1 }
 0xa5e   :  { %v8943_v54 = vadd.f32 %v8942_v47, %v8941_v26  ;;  %v8944_v55 = vpop.f32.mrb[34].mxu1 }
 0xa5f   :  { %v8945_v59 = vpop.f32.mrb[35].mxu1 }
 0xa60   :  { %v7874_v60 = vadd.f32 %v8943_v54, %v8921_v52 }
 0xa62   :  { %v7886_v62 = vmul.f32 %v8901_v14, %v7874_v60 }
 0xa64   :  { %v7894_v63 = vadd.f32 %v8902_v61, %v7886_v62 }
 0xa66   :  { %v7895_v20 = vmax.f32 %v7894_v63, 0.0 }
 0xa68   :  { %7896 = vst [vmem:[%s11034_s16] sm:$0xff] %v7895_v20 }
 0xa69   :  { %7901 = vsyncpa [#allocation3], 1 }
 0xa6a   :  { %7902 = vsyncpa [#allocation5], 1 }
 0xa6b   :  { %7903 = vsyncpa [#allocation8], 1 }
 0xa6c   :  { %7904 = vsyncpa [#allocation11], 1 }
 0xa6d   :  { %7905 = vsyncpa [#allocation14], 1 }
 0xa6e   :  { %7906 = vsyncpa [#allocation17], 1 }
 0xa6f   :  { %7907 = vsyncpa [#allocation20], 1 }
 0xa70   :  { %7908 = vsyncpa [#allocation23], 1 }

</bundles_post_ra>
